<compile_context>
chip_gen: v7x
topology: tpu7x:2x2x1
jax: 0.10.0
libtpu: 0.0.40
codegen_flags: <defaults>
</compile_context>

<pallas_src>
import numpy as np

import jax
import jax.numpy as jnp
from jax.experimental import pallas as pl
from jax.experimental.pallas import tpu as pltpu


def _act(y, kind):
    if kind == "relu":
        return jnp.maximum(y, 0.0)
    if kind == "gelu":
        # TODO(synk): PyTorch nn.GELU defaults to exact erf; tanh approx used.
        return jax.nn.gelu(y, approximate=True)
    return y


# ----------------------------------------------------------------------------
# Deterministic parameter construction (BN folded into conv, eval mode)
# ----------------------------------------------------------------------------
class ParamGen:
    def __init__(self, key):
        self.key = key
        self.i = 0

    def next(self, shape, scale=1.0):
        self.i += 1
        k = jax.random.fold_in(self.key, self.i)
        return jax.random.normal(k, shape, jnp.float32) * scale


def make_conv_bn(pg, w_shape, fan_in):
    """(folded_weight, folded_bias); out-channel axis is the LAST axis."""
    w = pg.next(w_shape, 1.0 / np.sqrt(fan_in))
    cout = w_shape[-1]
    gamma = 1.0 + 0.1 * pg.next((cout,))
    beta = 0.1 * pg.next((cout,))
    mean = 0.05 * pg.next((cout,))
    var = 1.0 + 0.1 * jnp.abs(pg.next((cout,)))
    s = gamma / jnp.sqrt(var + 1e-5)
    return w * s, beta - mean * s


def build_params(key, large_kernel_sizes, layers, channels, small_kernel,
                 dw_ratio, ffn_ratio):
    pg = ParamGen(key)
    c0 = channels[0]
    P = {
        "stem": [
            make_conv_bn(pg, (3, 3, c0), 3 * 3 * 1),   # 3x3 conv, Cin=1
            make_conv_bn(pg, (3, 3, c0), 3 * 3),       # 3x3 depthwise
            make_conv_bn(pg, (c0, c0), c0),            # 1x1
            make_conv_bn(pg, (3, 3, c0), 3 * 3),       # 3x3 depthwise
        ],
        "stages": [],
        "transitions": [],
    }
    for si in range(len(layers)):
        c = channels[si]
        cd = c * dw_ratio
        cf = c * ffn_ratio
        K = large_kernel_sizes[si]
        blocks = []
        for _ in range(layers[si]):
            blocks.append({
                "pw1": make_conv_bn(pg, (c, cd), c),
                "lk": make_conv_bn(pg, (K, K, cd), K * K),
                "sk": make_conv_bn(pg, (small_kernel, small_kernel, cd),
                                   small_kernel * small_kernel),
                "pw2": make_conv_bn(pg, (cd, c), cd),
                "ffn1": make_conv_bn(pg, (c, cf), c),
                "ffn2": make_conv_bn(pg, (cf, c), cf),
            })
        P["stages"].append(blocks)
        if si < len(layers) - 1:
            cn = channels[si + 1]
            P["transitions"].append({
                "pw": make_conv_bn(pg, (c, cn), c),
                "dw": make_conv_bn(pg, (3, 3, cn), 9),
            })
    return P


# ----------------------------------------------------------------------------
# Fused network: one pallas_call for the whole forward pass
# ----------------------------------------------------------------------------
def build_network_call(P, *, N, H, W, large_kernel_sizes, layers, channels,
                       small_kernel, dw_ratio, ffn_ratio, dtype=jnp.float32):
    num_stages = len(layers)
    c0 = channels[0]

    # Vertical halo derived from the largest kernel (correctness fix), rounded
    # up to a sublane multiple so the interior store stays 8-aligned.
    max_pad = max([1, small_kernel // 2] + [k // 2 for k in large_kernel_sizes])
    HV = max(8, (-(-max_pad // 8)) * 8)

    # ------------------------------------------------------------------ I/O
    inputs = [None]                                    # slot 0 = image
    in_specs = [pl.BlockSpec((1, H, W), lambda n: (n, 0, 0))]

    def add_input(arr):
        arr = jnp.asarray(arr, jnp.float32)
        nd = arr.ndim
        inputs.append(arr)
        in_specs.append(pl.BlockSpec(arr.shape, lambda n, _nd=nd: (0,) * _nd))
        return len(inputs) - 1

    # ----------------------------------------------- consolidated weight slabs
    bias_rows = {}     # lane width -> [(WC,) rows]
    dw_rows = {}       # lane width -> [(K*K, WC) packed tap blocks]
    pw_mats = {}       # (Kdim, Ndim) -> [block-diagonal matmul weights]

    def reg_bias(row):
        wc = int(row.shape[0])
        lst = bias_rows.setdefault(wc, [])
        lst.append(row)
        return wc, len(lst) - 1

    def reg_dw(mat):
        wc = int(mat.shape[1])
        lst = dw_rows.setdefault(wc, [])
        off = sum(m.shape[0] for m in lst)
        lst.append(mat)
        return wc, off

    def reg_pw(mat):
        key = (int(mat.shape[0]), int(mat.shape[1]))
        lst = pw_mats.setdefault(key, [])
        lst.append(mat)
        return key, len(lst) - 1

    # ------------------------------------------------ zero-halo VMEM scratch
    scratch_shapes = []
    scratch_idx = {}

    def get_scratch(h, wc):
        key = (HV + h + HV, wc)
        if key not in scratch_idx:
            scratch_idx[key] = len(scratch_shapes)
            scratch_shapes.append(pltpu.VMEM(key, jnp.float32))
        return scratch_idx[key]

    # --------------------------------------------------------- layer packing
    def pack_dw(wb, h, w_sp, cch):
        """(K,K,C) depthwise (or dense Cin=1) conv -> lane-packed taps."""
        wt = np.asarray(wb[0], np.float32)
        b = np.asarray(wb[1], np.float32)
        K = int(wt.shape[0])
        pad = K // 2
        Pm = np.zeros((K * K, w_sp * cch), np.float32)
        for kh in range(K):
            for kw in range(K):
                dwv = kw - pad
                lo, hi = max(0, -dwv), min(w_sp, w_sp - dwv)
                for wp in range(lo, hi):   # horizontal zero-pad folded in here
                    Pm[kh * K + kw, wp * cch:(wp + 1) * cch] = wt[kh, kw, :]
        return dict(K=K, h=h, w=w_sp, c=cch,
                    w_key=reg_dw(Pm), b_key=reg_bias(np.tile(b, w_sp)),
                    scr=get_scratch(h, w_sp * cch))

    def pack_pw(wb, w_sp):
        """1x1 conv (Cin,Cout) -> block-diagonal (W*Cin, W*Cout) matmul."""
        w1 = np.asarray(wb[0], np.float32)
        b = np.asarray(wb[1], np.float32)
        cin, cout = w1.shape
        Wbd = np.zeros((w_sp * cin, w_sp * cout), np.float32)
        for wp in range(w_sp):
            Wbd[wp * cin:(wp + 1) * cin, wp * cout:(wp + 1) * cout] = w1
        return dict(w_key=reg_pw(Wbd), b_key=reg_bias(np.tile(b, w_sp)))

    # ------------------------------------------------------------ static plan
    plan_stem = [
        pack_dw(P["stem"][0], H, W, c0),   # 3x3 dense (Cin=1), lane-packed taps
        pack_dw(P["stem"][1], H, W, c0),   # 3x3 depthwise
        pack_pw(P["stem"][2], W),          # 1x1
        pack_dw(P["stem"][3], H, W, c0),   # 3x3 depthwise
    ]

    h, w = H, W
    plan_stages, plan_trans = [], []
    for si in range(num_stages):
        c = channels[si]
        cd = c * dw_ratio
        blocks = []
        for blk in P["stages"][si]:
            blocks.append(dict(
                pw1=pack_pw(blk["pw1"], w),
                lk=pack_dw(blk["lk"], h, w, cd),
                sk=pack_dw(blk["sk"], h, w, cd),
                pw2=pack_pw(blk["pw2"], w),
                ffn1=pack_pw(blk["ffn1"], w),
                ffn2=pack_pw(blk["ffn2"], w),
            ))
        plan_stages.append(blocks)
        if si < num_stages - 1:
            t = P["transitions"][si]
            cn = channels[si + 1]
            ho, wo = h // 2, w // 2
            # Stride-2 subsample of the stride-1 depthwise output as two small
            # lane-dense selector matmuls (even rows, then even packed cols).
            # TODO(synk): O(h^2)+O((w*cn)^2) selectors; switch to strided ref
            # reads / space-to-depth for large inputs.
            row_sel = np.zeros((ho, h), np.float32)
            row_sel[np.arange(ho), 2 * np.arange(ho)] = 1.0
            col_sel = np.zeros((w * cn, wo * cn), np.float32)
            for q in range(wo):
                col_sel[(2 * q) * cn:(2 * q) * cn + cn,
                        q * cn:q * cn + cn] = np.eye(cn, dtype=np.float32)
            plan_trans.append(dict(pw=pack_pw(t["pw"], w),
                                   dw=pack_dw(t["dw"], h, w, cn),
                                   rs_np=row_sel, cs_np=col_sel))
            h, w = ho, wo
    Ho, Wo, Clast = h, w, channels[-1]

    # ------------------------------------------------ finalize pallas inputs
    bias_ref = {wc: add_input(np.stack(rows))
                for wc, rows in sorted(bias_rows.items())}
    dw_ref = {wc: add_input(np.concatenate(mats, axis=0))
              for wc, mats in sorted(dw_rows.items())}
    pw_ref = {key: add_input(np.stack(mats))
              for key, mats in sorted(pw_mats.items())}
    # Stem Cin=1 channel broadcast done as a tiny matmul (no duplicated stores)
    bc = np.zeros((W, W * c0), np.float32)
    for wp in range(W):
        bc[wp, wp * c0:(wp + 1) * c0] = 1.0
    bcast_pos = add_input(bc)
    for tp in plan_trans:
        tp["rowsel"] = add_input(tp.pop("rs_np"))
        tp["colsel"] = add_input(tp.pop("cs_np"))
    n_in = len(inputs)

    # ------------------------------------------------------------ the kernel
    def kernel(*refs):
        in_refs = refs[:n_in]
        out_ref = refs[n_in]
        scr_refs = refs[n_in + 1:]

        # Zero ONLY the vertical halo strips; interiors are fully overwritten
        # before every use.  Done per grid step (on v7x the parallel grid is
        # split across two TensorCores with separate scratch instances).
        for (hp, wc), si in scratch_idx.items():
            scr_refs[si][0:HV, :] = jnp.zeros((HV, wc), jnp.float32)
            scr_refs[si][hp - HV:hp, :] = jnp.zeros((HV, wc), jnp.float32)

        def bias_row(b_key):
            wc, row = b_key
            return in_refs[bias_ref[wc]][row:row + 1, :]             # (1, WC)

        def dw(x, e, act, add=None):
            """Depthwise conv on the lane-packed (H, W*C) layout."""
            K, pad = e["K"], e["K"] // 2
            h_, c = e["h"], e["c"]
            wc = e["w"] * c
            off = e["w_key"][1]
            wk = in_refs[dw_ref[e["w_key"][0]]][off:off + K * K, :]  # hoisted
            scr = scr_refs[e["scr"]]
            scr[HV:HV + h_, :] = x                   # 8-aligned interior store
            acc = jnp.broadcast_to(bias_row(e["b_key"]), (h_, wc))
            for kh in range(K):
                # Vertical tap shift = row offset into the zero-halo scratch.
                xs = scr[HV - pad + kh:HV - pad + kh + h_, :]
                for kw in range(K):
                    dwv = kw - pad
                    # Horizontal tap shift = XLU lane roll; wrapped columns are
                    # zeroed via the packed (boundary-masked) weights.
                    xr = xs if dwv == 0 else pltpu.roll(
                        xs, shift=(-dwv * c) % wc, axis=1)
                    t = kh * K + kw
                    acc = acc + xr * wk[t:t + 1, :]
            if add is not None:
                acc = acc + add                       # parallel branch (pre-act)
            return _act(acc, act)

        def pw(x, e, act, residual=None):
            """1x1 conv as block-diagonal MXU matmul (stays lane-packed)."""
            key, idx = e["w_key"]
            y = jnp.dot(x, in_refs[pw_ref[key]][idx],
                        preferred_element_type=jnp.float32)
            y = _act(y + bias_row(e["b_key"]), act)
            if residual is not None:
                y = y + residual
            return y

        # ---- stem ----
        img = in_refs[0][0].astype(jnp.float32)                      # (H, W)
        x = jnp.dot(img, in_refs[bcast_pos][...],
                    preferred_element_type=jnp.float32)              # (H, W*c0)
        x = dw(x, plan_stem[0], "relu")
        x = dw(x, plan_stem[1], "relu")
        x = pw(x, plan_stem[2], "relu")
        x = dw(x, plan_stem[3], "relu")

        # ---- stages & transitions ----
        for si in range(num_stages):
            for bp in plan_stages[si]:
                inp = x
                y = pw(x, bp["pw1"], "relu")
                y_large = dw(y, bp["lk"], None)
                y = dw(y, bp["sk"], "relu", add=y_large)
                x = pw(y, bp["pw2"], None, residual=inp)
                inp = x
                y = pw(x, bp["ffn1"], "gelu")
                x = pw(y, bp["ffn2"], None, residual=inp)
            if si < num_stages - 1:
                tp = plan_trans[si]
                x = pw(x, tp["pw"], "relu")
                x = dw(x, tp["dw"], "relu")
                x = jnp.dot(in_refs[tp["rowsel"]][...], x,
                            preferred_element_type=jnp.float32)      # even rows
                x = jnp.dot(x, in_refs[tp["colsel"]][...],
                            preferred_element_type=jnp.float32)      # even cols

        out_ref[0] = x.astype(out_ref.dtype)       # lane-dense (Ho, Wo*Clast)

    call = pl.pallas_call(
        kernel,
        out_shape=jax.ShapeDtypeStruct((N, Ho, Wo * Clast), dtype),
        grid=(N,),
        in_specs=in_specs,
        out_specs=pl.BlockSpec((1, Ho, Wo * Clast), lambda n: (n, 0, 0)),
        scratch_shapes=scratch_shapes,
        compiler_params=pltpu.CompilerParams(
            dimension_semantics=("parallel",)),      # batch across v7x TCs
    )

    weight_args = inputs[1:]

    @jax.jit
    def apply(x_nchw):
        # NCHW with C == 1 -> (N, H, W) is a pure reshape (no data movement).
        xs = x_nchw.reshape(N, H, W).astype(dtype)
        y = call(xs, *weight_args)                   # (N, Ho, Wo*Clast) packed
        y = y.reshape(N, Ho, Wo, Clast)
        return jnp.transpose(y, (0, 3, 1, 2))        # NHWC -> NCHW

    return apply


# ----------------------------------------------------------------------------
# Main
# ----------------------------------------------------------------------------
if __name__ == "__main__":
    key = jax.random.PRNGKey(0)

    # Small config consistent with the module signature
    large_kernel_sizes = [7, 5]
    layers = [1, 1]
    channels = [8, 16]
    small_kernel = 3
    dw_ratio = 1
    ffn_ratio = 2
    N, H, W = 2, 16, 16

    params = build_params(key, large_kernel_sizes, layers, channels,
                          small_kernel, dw_ratio, ffn_ratio)

    net = build_network_call(params, N=N, H=H, W=W,
                             large_kernel_sizes=large_kernel_sizes,
                             layers=layers, channels=channels,
                             small_kernel=small_kernel, dw_ratio=dw_ratio,
                             ffn_ratio=ffn_ratio)

    x = jax.random.normal(jax.random.fold_in(key, 12345), (N, 1, H, W),
                          jnp.float32)

    out = jax.block_until_ready(net(x))
    assert out.shape == (N, channels[-1], H // 2, W // 2), out.shape
    assert bool(jnp.all(jnp.isfinite(out)))
    print("KERNEL_OK")
</pallas_src>

<mosaic_0001>
module attributes {stable_mosaic.version = 11 : i64} {
  func.func @kernel(%arg0: i32, %arg1: memref<1x16x16xf32, #tpu.memory_space<vmem>>, %arg2: memref<14x128xf32, #tpu.memory_space<vmem>>, %arg3: memref<4x256xf32, #tpu.memory_space<vmem>>, %arg4: memref<119x128xf32, #tpu.memory_space<vmem>>, %arg5: memref<9x256xf32, #tpu.memory_space<vmem>>, %arg6: memref<5x128x128xf32, #tpu.memory_space<vmem>>, %arg7: memref<3x128x256xf32, #tpu.memory_space<vmem>>, %arg8: memref<2x256x128xf32, #tpu.memory_space<vmem>>, %arg9: memref<16x128xf32, #tpu.memory_space<vmem>>, %arg10: memref<8x16xf32, #tpu.memory_space<vmem>>, %arg11: memref<256x128xf32, #tpu.memory_space<vmem>>, %arg12: memref<1x8x128xf32, #tpu.memory_space<vmem>>, %arg13: memref<32x128xf32, #tpu.memory_space<vmem>>, %arg14: memref<32x256xf32, #tpu.memory_space<vmem>>, %arg15: memref<24x128xf32, #tpu.memory_space<vmem>>) attributes {dimension_semantics = [#tpu.dimension_semantics<parallel>], iteration_bounds = array<i64: 2>, scalar_prefetch = 0 : i64, scratch_operands = 3 : i64, tpu.core_type = #tpu.core_type<tc>, window_params = [{transform_indices = @transform_0, window_bounds = array<i64: 1, 16, 16>}, {pipeline_mode = #tpu.pipeline_mode<synchronous>, transform_indices = @transform_1, window_bounds = array<i64: 14, 128>}, {pipeline_mode = #tpu.pipeline_mode<synchronous>, transform_indices = @transform_2, window_bounds = array<i64: 4, 256>}, {pipeline_mode = #tpu.pipeline_mode<synchronous>, transform_indices = @transform_3, window_bounds = array<i64: 119, 128>}, {pipeline_mode = #tpu.pipeline_mode<synchronous>, transform_indices = @transform_4, window_bounds = array<i64: 9, 256>}, {pipeline_mode = #tpu.pipeline_mode<synchronous>, transform_indices = @transform_5, window_bounds = array<i64: 5, 128, 128>}, {pipeline_mode = #tpu.pipeline_mode<synchronous>, transform_indices = @transform_6, window_bounds = array<i64: 3, 128, 256>}, {pipeline_mode = #tpu.pipeline_mode<synchronous>, transform_indices = @transform_7, window_bounds = array<i64: 2, 256, 128>}, {pipeline_mode = #tpu.pipeline_mode<synchronous>, transform_indices = @transform_8, window_bounds = array<i64: 16, 128>}, {pipeline_mode = #tpu.pipeline_mode<synchronous>, transform_indices = @transform_9, window_bounds = array<i64: 8, 16>}, {pipeline_mode = #tpu.pipeline_mode<synchronous>, transform_indices = @transform_10, window_bounds = array<i64: 256, 128>}, {transform_indices = @transform_11, window_bounds = array<i64: 1, 8, 128>}]} {
    %cst = arith.constant 0.000000e+00 : f32
    %0 = vector.broadcast %cst : f32 to vector<8x128xf32>
    %c0 = arith.constant 0 : index
    %c0_0 = arith.constant 0 : index
    %1 = vector.load %arg13[%c0, %c0_0] : memref<32x128xf32, #tpu.memory_space<vmem>>, vector<8x128xf32>
    tpu.vector_store %arg13[%c0, %c0_0], %0 {strides = array<i32>} : memref<32x128xf32, #tpu.memory_space<vmem>>, vector<8x128xf32>,
    %cst_1 = arith.constant 0.000000e+00 : f32
    %2 = vector.broadcast %cst_1 : f32 to vector<8x128xf32>
    %c24 = arith.constant 24 : index
    %c0_2 = arith.constant 0 : index
    %3 = vector.load %arg13[%c24, %c0_2] : memref<32x128xf32, #tpu.memory_space<vmem>>, vector<8x128xf32>
    tpu.vector_store %arg13[%c24, %c0_2], %2 {strides = array<i32>} : memref<32x128xf32, #tpu.memory_space<vmem>>, vector<8x128xf32>,
    %cst_3 = arith.constant 0.000000e+00 : f32
    %4 = vector.broadcast %cst_3 : f32 to vector<8x256xf32>
    %c0_4 = arith.constant 0 : index
    %c0_5 = arith.constant 0 : index
    %5 = vector.load %arg14[%c0_4, %c0_5] : memref<32x256xf32, #tpu.memory_space<vmem>>, vector<8x256xf32>
    tpu.vector_store %arg14[%c0_4, %c0_5], %4 {strides = array<i32>} : memref<32x256xf32, #tpu.memory_space<vmem>>, vector<8x256xf32>,
    %cst_6 = arith.constant 0.000000e+00 : f32
    %6 = vector.broadcast %cst_6 : f32 to vector<8x256xf32>
    %c24_7 = arith.constant 24 : index
    %c0_8 = arith.constant 0 : index
    %7 = vector.load %arg14[%c24_7, %c0_8] : memref<32x256xf32, #tpu.memory_space<vmem>>, vector<8x256xf32>
    tpu.vector_store %arg14[%c24_7, %c0_8], %6 {strides = array<i32>} : memref<32x256xf32, #tpu.memory_space<vmem>>, vector<8x256xf32>,
    %cst_9 = arith.constant 0.000000e+00 : f32
    %8 = vector.broadcast %cst_9 : f32 to vector<8x128xf32>
    %c0_10 = arith.constant 0 : index
    %c0_11 = arith.constant 0 : index
    %9 = vector.load %arg15[%c0_10, %c0_11] : memref<24x128xf32, #tpu.memory_space<vmem>>, vector<8x128xf32>
    tpu.vector_store %arg15[%c0_10, %c0_11], %8 {strides = array<i32>} : memref<24x128xf32, #tpu.memory_space<vmem>>, vector<8x128xf32>,
    %cst_12 = arith.constant 0.000000e+00 : f32
    %10 = vector.broadcast %cst_12 : f32 to vector<8x128xf32>
    %c16 = arith.constant 16 : index
    %c0_13 = arith.constant 0 : index
    %11 = vector.load %arg15[%c16, %c0_13] : memref<24x128xf32, #tpu.memory_space<vmem>>, vector<8x128xf32>
    tpu.vector_store %arg15[%c16, %c0_13], %10 {strides = array<i32>} : memref<24x128xf32, #tpu.memory_space<vmem>>, vector<8x128xf32>,
    %c0_14 = arith.constant 0 : index
    %c0_15 = arith.constant 0 : index
    %c0_16 = arith.constant 0 : index
    %12 = vector.load %arg1[%c0_14, %c0_15, %c0_16] : memref<1x16x16xf32, #tpu.memory_space<vmem>>, vector<1x16x16xf32>
    %13 = vector.shape_cast %12 : vector<1x16x16xf32> to vector<16x16xf32>
    %c0_17 = arith.constant 0 : index
    %c0_18 = arith.constant 0 : index
    %14 = vector.load %arg9[%c0_17, %c0_18] : memref<16x128xf32, #tpu.memory_space<vmem>>, vector<16x128xf32>
    %cst_19 = arith.constant dense<0.000000e+00> : vector<16x128xf32>
    %15 = tpu.matmul %13, %14, %cst_19 {dimension_numbers = #tpu.dot_dimension_numbers<[1], [0], [0], [1], [0, 0, 1, 1], [], []>} : vector<16x16xf32>, vector<16x128xf32>, vector<16x128xf32> -> vector<16x128xf32>
    %c0_20 = arith.constant 0 : index
    %c0_21 = arith.constant 0 : index
    %16 = vector.load %arg4[%c0_20, %c0_21] : memref<119x128xf32, #tpu.memory_space<vmem>>, vector<9x128xf32>
    %c8 = arith.constant 8 : index
    %c0_22 = arith.constant 0 : index
    %17 = vector.load %arg13[%c8, %c0_22] : memref<32x128xf32, #tpu.memory_space<vmem>>, vector<16x128xf32>
    tpu.vector_store %arg13[%c8, %c0_22], %15 {strides = array<i32>} : memref<32x128xf32, #tpu.memory_space<vmem>>, vector<16x128xf32>,
    %c0_23 = arith.constant 0 : index
    %c0_24 = arith.constant 0 : index
    %18 = vector.load %arg2[%c0_23, %c0_24] : memref<14x128xf32, #tpu.memory_space<vmem>>, vector<1x128xf32>
    %19 = vector.shape_cast %18 : vector<1x128xf32> to vector<1x128xf32>
    %20 = vector.broadcast %19 : vector<1x128xf32> to vector<16x128xf32>
    %c7 = arith.constant 7 : index
    %c0_25 = arith.constant 0 : index
    %21 = vector.load %arg13[%c7, %c0_25] : memref<32x128xf32, #tpu.memory_space<vmem>>, vector<16x128xf32>
    %c8_i32 = arith.constant 8 : i32
    %22 = tpu.dynamic_rotate %21 by %c8_i32 dim 1 : vector<16x128xf32>, i32 -> vector<16x128xf32>
    %23 = vector.extract_strided_slice %16 {offsets = [0, 0], sizes = [1, 128], strides = [1, 1]} : vector<9x128xf32> to vector<1x128xf32>
    %24 = vector.broadcast %23 : vector<1x128xf32> to vector<16x128xf32>
    %25 = arith.mulf %22, %24 : vector<16x128xf32>
    %26 = arith.addf %20, %25 : vector<16x128xf32>
    %27 = vector.extract_strided_slice %16 {offsets = [1, 0], sizes = [1, 128], strides = [1, 1]} : vector<9x128xf32> to vector<1x128xf32>
    %28 = vector.broadcast %27 : vector<1x128xf32> to vector<16x128xf32>
    %29 = arith.mulf %21, %28 : vector<16x128xf32>
    %30 = arith.addf %26, %29 : vector<16x128xf32>
    %c120_i32 = arith.constant 120 : i32
    %31 = tpu.dynamic_rotate %21 by %c120_i32 dim 1 : vector<16x128xf32>, i32 -> vector<16x128xf32>
    %32 = vector.extract_strided_slice %16 {offsets = [2, 0], sizes = [1, 128], strides = [1, 1]} : vector<9x128xf32> to vector<1x128xf32>
    %33 = vector.broadcast %32 : vector<1x128xf32> to vector<16x128xf32>
    %34 = arith.mulf %31, %33 : vector<16x128xf32>
    %35 = arith.addf %30, %34 : vector<16x128xf32>
    %c8_26 = arith.constant 8 : index
    %c0_27 = arith.constant 0 : index
    %36 = vector.load %arg13[%c8_26, %c0_27] : memref<32x128xf32, #tpu.memory_space<vmem>>, vector<16x128xf32>
    %c8_i32_28 = arith.constant 8 : i32
    %37 = tpu.dynamic_rotate %36 by %c8_i32_28 dim 1 : vector<16x128xf32>, i32 -> vector<16x128xf32>
    %38 = vector.extract_strided_slice %16 {offsets = [3, 0], sizes = [1, 128], strides = [1, 1]} : vector<9x128xf32> to vector<1x128xf32>
    %39 = vector.broadcast %38 : vector<1x128xf32> to vector<16x128xf32>
    %40 = arith.mulf %37, %39 : vector<16x128xf32>
    %41 = arith.addf %35, %40 : vector<16x128xf32>
    %42 = vector.extract_strided_slice %16 {offsets = [4, 0], sizes = [1, 128], strides = [1, 1]} : vector<9x128xf32> to vector<1x128xf32>
    %43 = vector.broadcast %42 : vector<1x128xf32> to vector<16x128xf32>
    %44 = arith.mulf %36, %43 : vector<16x128xf32>
    %45 = arith.addf %41, %44 : vector<16x128xf32>
    %c120_i32_29 = arith.constant 120 : i32
    %46 = tpu.dynamic_rotate %36 by %c120_i32_29 dim 1 : vector<16x128xf32>, i32 -> vector<16x128xf32>
    %47 = vector.extract_strided_slice %16 {offsets = [5, 0], sizes = [1, 128], strides = [1, 1]} : vector<9x128xf32> to vector<1x128xf32>
    %48 = vector.broadcast %47 : vector<1x128xf32> to vector<16x128xf32>
    %49 = arith.mulf %46, %48 : vector<16x128xf32>
    %50 = arith.addf %45, %49 : vector<16x128xf32>
    %c9 = arith.constant 9 : index
    %c0_30 = arith.constant 0 : index
    %51 = vector.load %arg13[%c9, %c0_30] : memref<32x128xf32, #tpu.memory_space<vmem>>, vector<16x128xf32>
    %c8_i32_31 = arith.constant 8 : i32
    %52 = tpu.dynamic_rotate %51 by %c8_i32_31 dim 1 : vector<16x128xf32>, i32 -> vector<16x128xf32>
    %53 = vector.extract_strided_slice %16 {offsets = [6, 0], sizes = [1, 128], strides = [1, 1]} : vector<9x128xf32> to vector<1x128xf32>
    %54 = vector.broadcast %53 : vector<1x128xf32> to vector<16x128xf32>
    %55 = arith.mulf %52, %54 : vector<16x128xf32>
    %56 = arith.addf %50, %55 : vector<16x128xf32>
    %57 = vector.extract_strided_slice %16 {offsets = [7, 0], sizes = [1, 128], strides = [1, 1]} : vector<9x128xf32> to vector<1x128xf32>
    %58 = vector.broadcast %57 : vector<1x128xf32> to vector<16x128xf32>
    %59 = arith.mulf %51, %58 : vector<16x128xf32>
    %60 = arith.addf %56, %59 : vector<16x128xf32>
    %c120_i32_32 = arith.constant 120 : i32
    %61 = tpu.dynamic_rotate %51 by %c120_i32_32 dim 1 : vector<16x128xf32>, i32 -> vector<16x128xf32>
    %62 = vector.extract_strided_slice %16 {offsets = [8, 0], sizes = [1, 128], strides = [1, 1]} : vector<9x128xf32> to vector<1x128xf32>
    %63 = vector.broadcast %62 : vector<1x128xf32> to vector<16x128xf32>
    %64 = arith.mulf %61, %63 : vector<16x128xf32>
    %65 = arith.addf %60, %64 : vector<16x128xf32>
    %cst_33 = arith.constant 0.000000e+00 : f32
    %66 = vector.broadcast %cst_33 : f32 to vector<16x128xf32>
    %67 = arith.maximumf %65, %66 : vector<16x128xf32>
    %c9_34 = arith.constant 9 : index
    %c0_35 = arith.constant 0 : index
    %68 = vector.load %arg4[%c9_34, %c0_35] : memref<119x128xf32, #tpu.memory_space<vmem>>, vector<9x128xf32>
    %c8_36 = arith.constant 8 : index
    %c0_37 = arith.constant 0 : index
    %69 = vector.load %arg13[%c8_36, %c0_37] : memref<32x128xf32, #tpu.memory_space<vmem>>, vector<16x128xf32>
    tpu.vector_store %arg13[%c8_36, %c0_37], %67 {strides = array<i32>} : memref<32x128xf32, #tpu.memory_space<vmem>>, vector<16x128xf32>,
    %c1 = arith.constant 1 : index
    %c0_38 = arith.constant 0 : index
    %70 = vector.load %arg2[%c1, %c0_38] : memref<14x128xf32, #tpu.memory_space<vmem>>, vector<1x128xf32>
    %71 = vector.shape_cast %70 : vector<1x128xf32> to vector<1x128xf32>
    %72 = vector.broadcast %71 : vector<1x128xf32> to vector<16x128xf32>
    %c7_39 = arith.constant 7 : index
    %c0_40 = arith.constant 0 : index
    %73 = vector.load %arg13[%c7_39, %c0_40] : memref<32x128xf32, #tpu.memory_space<vmem>>, vector<16x128xf32>
    %c8_i32_41 = arith.constant 8 : i32
    %74 = tpu.dynamic_rotate %73 by %c8_i32_41 dim 1 : vector<16x128xf32>, i32 -> vector<16x128xf32>
    %75 = vector.extract_strided_slice %68 {offsets = [0, 0], sizes = [1, 128], strides = [1, 1]} : vector<9x128xf32> to vector<1x128xf32>
    %76 = vector.broadcast %75 : vector<1x128xf32> to vector<16x128xf32>
    %77 = arith.mulf %74, %76 : vector<16x128xf32>
    %78 = arith.addf %72, %77 : vector<16x128xf32>
    %79 = vector.extract_strided_slice %68 {offsets = [1, 0], sizes = [1, 128], strides = [1, 1]} : vector<9x128xf32> to vector<1x128xf32>
    %80 = vector.broadcast %79 : vector<1x128xf32> to vector<16x128xf32>
    %81 = arith.mulf %73, %80 : vector<16x128xf32>
    %82 = arith.addf %78, %81 : vector<16x128xf32>
    %c120_i32_42 = arith.constant 120 : i32
    %83 = tpu.dynamic_rotate %73 by %c120_i32_42 dim 1 : vector<16x128xf32>, i32 -> vector<16x128xf32>
    %84 = vector.extract_strided_slice %68 {offsets = [2, 0], sizes = [1, 128], strides = [1, 1]} : vector<9x128xf32> to vector<1x128xf32>
    %85 = vector.broadcast %84 : vector<1x128xf32> to vector<16x128xf32>
    %86 = arith.mulf %83, %85 : vector<16x128xf32>
    %87 = arith.addf %82, %86 : vector<16x128xf32>
    %c8_43 = arith.constant 8 : index
    %c0_44 = arith.constant 0 : index
    %88 = vector.load %arg13[%c8_43, %c0_44] : memref<32x128xf32, #tpu.memory_space<vmem>>, vector<16x128xf32>
    %c8_i32_45 = arith.constant 8 : i32
    %89 = tpu.dynamic_rotate %88 by %c8_i32_45 dim 1 : vector<16x128xf32>, i32 -> vector<16x128xf32>
    %90 = vector.extract_strided_slice %68 {offsets = [3, 0], sizes = [1, 128], strides = [1, 1]} : vector<9x128xf32> to vector<1x128xf32>
    %91 = vector.broadcast %90 : vector<1x128xf32> to vector<16x128xf32>
    %92 = arith.mulf %89, %91 : vector<16x128xf32>
    %93 = arith.addf %87, %92 : vector<16x128xf32>
    %94 = vector.extract_strided_slice %68 {offsets = [4, 0], sizes = [1, 128], strides = [1, 1]} : vector<9x128xf32> to vector<1x128xf32>
    %95 = vector.broadcast %94 : vector<1x128xf32> to vector<16x128xf32>
    %96 = arith.mulf %88, %95 : vector<16x128xf32>
    %97 = arith.addf %93, %96 : vector<16x128xf32>
    %c120_i32_46 = arith.constant 120 : i32
    %98 = tpu.dynamic_rotate %88 by %c120_i32_46 dim 1 : vector<16x128xf32>, i32 -> vector<16x128xf32>
    %99 = vector.extract_strided_slice %68 {offsets = [5, 0], sizes = [1, 128], strides = [1, 1]} : vector<9x128xf32> to vector<1x128xf32>
    %100 = vector.broadcast %99 : vector<1x128xf32> to vector<16x128xf32>
    %101 = arith.mulf %98, %100 : vector<16x128xf32>
    %102 = arith.addf %97, %101 : vector<16x128xf32>
    %c9_47 = arith.constant 9 : index
    %c0_48 = arith.constant 0 : index
    %103 = vector.load %arg13[%c9_47, %c0_48] : memref<32x128xf32, #tpu.memory_space<vmem>>, vector<16x128xf32>
    %c8_i32_49 = arith.constant 8 : i32
    %104 = tpu.dynamic_rotate %103 by %c8_i32_49 dim 1 : vector<16x128xf32>, i32 -> vector<16x128xf32>
    %105 = vector.extract_strided_slice %68 {offsets = [6, 0], sizes = [1, 128], strides = [1, 1]} : vector<9x128xf32> to vector<1x128xf32>
    %106 = vector.broadcast %105 : vector<1x128xf32> to vector<16x128xf32>
    %107 = arith.mulf %104, %106 : vector<16x128xf32>
    %108 = arith.addf %102, %107 : vector<16x128xf32>
    %109 = vector.extract_strided_slice %68 {offsets = [7, 0], sizes = [1, 128], strides = [1, 1]} : vector<9x128xf32> to vector<1x128xf32>
    %110 = vector.broadcast %109 : vector<1x128xf32> to vector<16x128xf32>
    %111 = arith.mulf %103, %110 : vector<16x128xf32>
    %112 = arith.addf %108, %111 : vector<16x128xf32>
    %c120_i32_50 = arith.constant 120 : i32
    %113 = tpu.dynamic_rotate %103 by %c120_i32_50 dim 1 : vector<16x128xf32>, i32 -> vector<16x128xf32>
    %114 = vector.extract_strided_slice %68 {offsets = [8, 0], sizes = [1, 128], strides = [1, 1]} : vector<9x128xf32> to vector<1x128xf32>
    %115 = vector.broadcast %114 : vector<1x128xf32> to vector<16x128xf32>
    %116 = arith.mulf %113, %115 : vector<16x128xf32>
    %117 = arith.addf %112, %116 : vector<16x128xf32>
    %cst_51 = arith.constant 0.000000e+00 : f32
    %118 = vector.broadcast %cst_51 : f32 to vector<16x128xf32>
    %119 = arith.maximumf %117, %118 : vector<16x128xf32>
    %c0_52 = arith.constant 0 : index
    %c0_53 = arith.constant 0 : index
    %c0_54 = arith.constant 0 : index
    %120 = vector.load %arg6[%c0_52, %c0_53, %c0_54] : memref<5x128x128xf32, #tpu.memory_space<vmem>>, vector<1x128x128xf32>
    %121 = vector.shape_cast %120 : vector<1x128x128xf32> to vector<128x128xf32>
    %cst_55 = arith.constant dense<0.000000e+00> : vector<16x128xf32>
    %122 = tpu.matmul %119, %121, %cst_55 {dimension_numbers = #tpu.dot_dimension_numbers<[1], [0], [0], [1], [0, 0, 1, 1], [], []>} : vector<16x128xf32>, vector<128x128xf32>, vector<16x128xf32> -> vector<16x128xf32>
    %c2 = arith.constant 2 : index
    %c0_56 = arith.constant 0 : index
    %123 = vector.load %arg2[%c2, %c0_56] : memref<14x128xf32, #tpu.memory_space<vmem>>, vector<1x128xf32>
    %124 = vector.broadcast %123 : vector<1x128xf32> to vector<16x128xf32>
    %125 = arith.addf %122, %124 : vector<16x128xf32>
    %cst_57 = arith.constant 0.000000e+00 : f32
    %126 = vector.broadcast %cst_57 : f32 to vector<16x128xf32>
    %127 = arith.maximumf %125, %126 : vector<16x128xf32>
    %c18 = arith.constant 18 : index
    %c0_58 = arith.constant 0 : index
    %128 = vector.load %arg4[%c18, %c0_58] : memref<119x128xf32, #tpu.memory_space<vmem>>, vector<9x128xf32>
    %c8_59 = arith.constant 8 : index
    %c0_60 = arith.constant 0 : index
    %129 = vector.load %arg13[%c8_59, %c0_60] : memref<32x128xf32, #tpu.memory_space<vmem>>, vector<16x128xf32>
    tpu.vector_store %arg13[%c8_59, %c0_60], %127 {strides = array<i32>} : memref<32x128xf32, #tpu.memory_space<vmem>>, vector<16x128xf32>,
    %c3 = arith.constant 3 : index
    %c0_61 = arith.constant 0 : index
    %130 = vector.load %arg2[%c3, %c0_61] : memref<14x128xf32, #tpu.memory_space<vmem>>, vector<1x128xf32>
    %131 = vector.shape_cast %130 : vector<1x128xf32> to vector<1x128xf32>
    %132 = vector.broadcast %131 : vector<1x128xf32> to vector<16x128xf32>
    %c7_62 = arith.constant 7 : index
    %c0_63 = arith.constant 0 : index
    %133 = vector.load %arg13[%c7_62, %c0_63] : memref<32x128xf32, #tpu.memory_space<vmem>>, vector<16x128xf32>
    %c8_i32_64 = arith.constant 8 : i32
    %134 = tpu.dynamic_rotate %133 by %c8_i32_64 dim 1 : vector<16x128xf32>, i32 -> vector<16x128xf32>
    %135 = vector.extract_strided_slice %128 {offsets = [0, 0], sizes = [1, 128], strides = [1, 1]} : vector<9x128xf32> to vector<1x128xf32>
    %136 = vector.broadcast %135 : vector<1x128xf32> to vector<16x128xf32>
    %137 = arith.mulf %134, %136 : vector<16x128xf32>
    %138 = arith.addf %132, %137 : vector<16x128xf32>
    %139 = vector.extract_strided_slice %128 {offsets = [1, 0], sizes = [1, 128], strides = [1, 1]} : vector<9x128xf32> to vector<1x128xf32>
    %140 = vector.broadcast %139 : vector<1x128xf32> to vector<16x128xf32>
    %141 = arith.mulf %133, %140 : vector<16x128xf32>
    %142 = arith.addf %138, %141 : vector<16x128xf32>
    %c120_i32_65 = arith.constant 120 : i32
    %143 = tpu.dynamic_rotate %133 by %c120_i32_65 dim 1 : vector<16x128xf32>, i32 -> vector<16x128xf32>
    %144 = vector.extract_strided_slice %128 {offsets = [2, 0], sizes = [1, 128], strides = [1, 1]} : vector<9x128xf32> to vector<1x128xf32>
    %145 = vector.broadcast %144 : vector<1x128xf32> to vector<16x128xf32>
    %146 = arith.mulf %143, %145 : vector<16x128xf32>
    %147 = arith.addf %142, %146 : vector<16x128xf32>
    %c8_66 = arith.constant 8 : index
    %c0_67 = arith.constant 0 : index
    %148 = vector.load %arg13[%c8_66, %c0_67] : memref<32x128xf32, #tpu.memory_space<vmem>>, vector<16x128xf32>
    %c8_i32_68 = arith.constant 8 : i32
    %149 = tpu.dynamic_rotate %148 by %c8_i32_68 dim 1 : vector<16x128xf32>, i32 -> vector<16x128xf32>
    %150 = vector.extract_strided_slice %128 {offsets = [3, 0], sizes = [1, 128], strides = [1, 1]} : vector<9x128xf32> to vector<1x128xf32>
    %151 = vector.broadcast %150 : vector<1x128xf32> to vector<16x128xf32>
    %152 = arith.mulf %149, %151 : vector<16x128xf32>
    %153 = arith.addf %147, %152 : vector<16x128xf32>
    %154 = vector.extract_strided_slice %128 {offsets = [4, 0], sizes = [1, 128], strides = [1, 1]} : vector<9x128xf32> to vector<1x128xf32>
    %155 = vector.broadcast %154 : vector<1x128xf32> to vector<16x128xf32>
    %156 = arith.mulf %148, %155 : vector<16x128xf32>
    %157 = arith.addf %153, %156 : vector<16x128xf32>
    %c120_i32_69 = arith.constant 120 : i32
    %158 = tpu.dynamic_rotate %148 by %c120_i32_69 dim 1 : vector<16x128xf32>, i32 -> vector<16x128xf32>
    %159 = vector.extract_strided_slice %128 {offsets = [5, 0], sizes = [1, 128], strides = [1, 1]} : vector<9x128xf32> to vector<1x128xf32>
    %160 = vector.broadcast %159 : vector<1x128xf32> to vector<16x128xf32>
    %161 = arith.mulf %158, %160 : vector<16x128xf32>
    %162 = arith.addf %157, %161 : vector<16x128xf32>
    %c9_70 = arith.constant 9 : index
    %c0_71 = arith.constant 0 : index
    %163 = vector.load %arg13[%c9_70, %c0_71] : memref<32x128xf32, #tpu.memory_space<vmem>>, vector<16x128xf32>
    %c8_i32_72 = arith.constant 8 : i32
    %164 = tpu.dynamic_rotate %163 by %c8_i32_72 dim 1 : vector<16x128xf32>, i32 -> vector<16x128xf32>
    %165 = vector.extract_strided_slice %128 {offsets = [6, 0], sizes = [1, 128], strides = [1, 1]} : vector<9x128xf32> to vector<1x128xf32>
    %166 = vector.broadcast %165 : vector<1x128xf32> to vector<16x128xf32>
    %167 = arith.mulf %164, %166 : vector<16x128xf32>
    %168 = arith.addf %162, %167 : vector<16x128xf32>
    %169 = vector.extract_strided_slice %128 {offsets = [7, 0], sizes = [1, 128], strides = [1, 1]} : vector<9x128xf32> to vector<1x128xf32>
    %170 = vector.broadcast %169 : vector<1x128xf32> to vector<16x128xf32>
    %171 = arith.mulf %163, %170 : vector<16x128xf32>
    %172 = arith.addf %168, %171 : vector<16x128xf32>
    %c120_i32_73 = arith.constant 120 : i32
    %173 = tpu.dynamic_rotate %163 by %c120_i32_73 dim 1 : vector<16x128xf32>, i32 -> vector<16x128xf32>
    %174 = vector.extract_strided_slice %128 {offsets = [8, 0], sizes = [1, 128], strides = [1, 1]} : vector<9x128xf32> to vector<1x128xf32>
    %175 = vector.broadcast %174 : vector<1x128xf32> to vector<16x128xf32>
    %176 = arith.mulf %173, %175 : vector<16x128xf32>
    %177 = arith.addf %172, %176 : vector<16x128xf32>
    %cst_74 = arith.constant 0.000000e+00 : f32
    %178 = vector.broadcast %cst_74 : f32 to vector<16x128xf32>
    %179 = arith.maximumf %177, %178 : vector<16x128xf32>
    %c1_75 = arith.constant 1 : index
    %c0_76 = arith.constant 0 : index
    %c0_77 = arith.constant 0 : index
    %180 = vector.load %arg6[%c1_75, %c0_76, %c0_77] : memref<5x128x128xf32, #tpu.memory_space<vmem>>, vector<1x128x128xf32>
    %181 = vector.shape_cast %180 : vector<1x128x128xf32> to vector<128x128xf32>
    %cst_78 = arith.constant dense<0.000000e+00> : vector<16x128xf32>
    %182 = tpu.matmul %179, %181, %cst_78 {dimension_numbers = #tpu.dot_dimension_numbers<[1], [0], [0], [1], [0, 0, 1, 1], [], []>} : vector<16x128xf32>, vector<128x128xf32>, vector<16x128xf32> -> vector<16x128xf32>
    %c4 = arith.constant 4 : index
    %c0_79 = arith.constant 0 : index
    %183 = vector.load %arg2[%c4, %c0_79] : memref<14x128xf32, #tpu.memory_space<vmem>>, vector<1x128xf32>
    %184 = vector.broadcast %183 : vector<1x128xf32> to vector<16x128xf32>
    %185 = arith.addf %182, %184 : vector<16x128xf32>
    %cst_80 = arith.constant 0.000000e+00 : f32
    %186 = vector.broadcast %cst_80 : f32 to vector<16x128xf32>
    %187 = arith.maximumf %185, %186 : vector<16x128xf32>
    %c27 = arith.constant 27 : index
    %c0_81 = arith.constant 0 : index
    %188 = vector.load %arg4[%c27, %c0_81] : memref<119x128xf32, #tpu.memory_space<vmem>>, vector<49x128xf32>
    %c8_82 = arith.constant 8 : index
    %c0_83 = arith.constant 0 : index
    %189 = vector.load %arg13[%c8_82, %c0_83] : memref<32x128xf32, #tpu.memory_space<vmem>>, vector<16x128xf32>
    tpu.vector_store %arg13[%c8_82, %c0_83], %187 {strides = array<i32>} : memref<32x128xf32, #tpu.memory_space<vmem>>, vector<16x128xf32>,
    %c5 = arith.constant 5 : index
    %c0_84 = arith.constant 0 : index
    %190 = vector.load %arg2[%c5, %c0_84] : memref<14x128xf32, #tpu.memory_space<vmem>>, vector<1x128xf32>
    %191 = vector.shape_cast %190 : vector<1x128xf32> to vector<1x128xf32>
    %192 = vector.broadcast %191 : vector<1x128xf32> to vector<16x128xf32>
    %c5_85 = arith.constant 5 : index
    %c0_86 = arith.constant 0 : index
    %193 = vector.load %arg13[%c5_85, %c0_86] : memref<32x128xf32, #tpu.memory_space<vmem>>, vector<16x128xf32>
    %c24_i32 = arith.constant 24 : i32
    %194 = tpu.dynamic_rotate %193 by %c24_i32 dim 1 : vector<16x128xf32>, i32 -> vector<16x128xf32>
    %195 = vector.extract_strided_slice %188 {offsets = [0, 0], sizes = [1, 128], strides = [1, 1]} : vector<49x128xf32> to vector<1x128xf32>
    %196 = vector.broadcast %195 : vector<1x128xf32> to vector<16x128xf32>
    %197 = arith.mulf %194, %196 : vector<16x128xf32>
    %198 = arith.addf %192, %197 : vector<16x128xf32>
    %c16_i32 = arith.constant 16 : i32
    %199 = tpu.dynamic_rotate %193 by %c16_i32 dim 1 : vector<16x128xf32>, i32 -> vector<16x128xf32>
    %200 = vector.extract_strided_slice %188 {offsets = [1, 0], sizes = [1, 128], strides = [1, 1]} : vector<49x128xf32> to vector<1x128xf32>
    %201 = vector.broadcast %200 : vector<1x128xf32> to vector<16x128xf32>
    %202 = arith.mulf %199, %201 : vector<16x128xf32>
    %203 = arith.addf %198, %202 : vector<16x128xf32>
    %c8_i32_87 = arith.constant 8 : i32
    %204 = tpu.dynamic_rotate %193 by %c8_i32_87 dim 1 : vector<16x128xf32>, i32 -> vector<16x128xf32>
    %205 = vector.extract_strided_slice %188 {offsets = [2, 0], sizes = [1, 128], strides = [1, 1]} : vector<49x128xf32> to vector<1x128xf32>
    %206 = vector.broadcast %205 : vector<1x128xf32> to vector<16x128xf32>
    %207 = arith.mulf %204, %206 : vector<16x128xf32>
    %208 = arith.addf %203, %207 : vector<16x128xf32>
    %209 = vector.extract_strided_slice %188 {offsets = [3, 0], sizes = [1, 128], strides = [1, 1]} : vector<49x128xf32> to vector<1x128xf32>
    %210 = vector.broadcast %209 : vector<1x128xf32> to vector<16x128xf32>
    %211 = arith.mulf %193, %210 : vector<16x128xf32>
    %212 = arith.addf %208, %211 : vector<16x128xf32>
    %c120_i32_88 = arith.constant 120 : i32
    %213 = tpu.dynamic_rotate %193 by %c120_i32_88 dim 1 : vector<16x128xf32>, i32 -> vector<16x128xf32>
    %214 = vector.extract_strided_slice %188 {offsets = [4, 0], sizes = [1, 128], strides = [1, 1]} : vector<49x128xf32> to vector<1x128xf32>
    %215 = vector.broadcast %214 : vector<1x128xf32> to vector<16x128xf32>
    %216 = arith.mulf %213, %215 : vector<16x128xf32>
    %217 = arith.addf %212, %216 : vector<16x128xf32>
    %c112_i32 = arith.constant 112 : i32
    %218 = tpu.dynamic_rotate %193 by %c112_i32 dim 1 : vector<16x128xf32>, i32 -> vector<16x128xf32>
    %219 = vector.extract_strided_slice %188 {offsets = [5, 0], sizes = [1, 128], strides = [1, 1]} : vector<49x128xf32> to vector<1x128xf32>
    %220 = vector.broadcast %219 : vector<1x128xf32> to vector<16x128xf32>
    %221 = arith.mulf %218, %220 : vector<16x128xf32>
    %222 = arith.addf %217, %221 : vector<16x128xf32>
    %c104_i32 = arith.constant 104 : i32
    %223 = tpu.dynamic_rotate %193 by %c104_i32 dim 1 : vector<16x128xf32>, i32 -> vector<16x128xf32>
    %224 = vector.extract_strided_slice %188 {offsets = [6, 0], sizes = [1, 128], strides = [1, 1]} : vector<49x128xf32> to vector<1x128xf32>
    %225 = vector.broadcast %224 : vector<1x128xf32> to vector<16x128xf32>
    %226 = arith.mulf %223, %225 : vector<16x128xf32>
    %227 = arith.addf %222, %226 : vector<16x128xf32>
    %c6 = arith.constant 6 : index
    %c0_89 = arith.constant 0 : index
    %228 = vector.load %arg13[%c6, %c0_89] : memref<32x128xf32, #tpu.memory_space<vmem>>, vector<16x128xf32>
    %c24_i32_90 = arith.constant 24 : i32
    %229 = tpu.dynamic_rotate %228 by %c24_i32_90 dim 1 : vector<16x128xf32>, i32 -> vector<16x128xf32>
    %230 = vector.extract_strided_slice %188 {offsets = [7, 0], sizes = [1, 128], strides = [1, 1]} : vector<49x128xf32> to vector<1x128xf32>
    %231 = vector.broadcast %230 : vector<1x128xf32> to vector<16x128xf32>
    %232 = arith.mulf %229, %231 : vector<16x128xf32>
    %233 = arith.addf %227, %232 : vector<16x128xf32>
    %c16_i32_91 = arith.constant 16 : i32
    %234 = tpu.dynamic_rotate %228 by %c16_i32_91 dim 1 : vector<16x128xf32>, i32 -> vector<16x128xf32>
    %235 = vector.extract_strided_slice %188 {offsets = [8, 0], sizes = [1, 128], strides = [1, 1]} : vector<49x128xf32> to vector<1x128xf32>
    %236 = vector.broadcast %235 : vector<1x128xf32> to vector<16x128xf32>
    %237 = arith.mulf %234, %236 : vector<16x128xf32>
    %238 = arith.addf %233, %237 : vector<16x128xf32>
    %c8_i32_92 = arith.constant 8 : i32
    %239 = tpu.dynamic_rotate %228 by %c8_i32_92 dim 1 : vector<16x128xf32>, i32 -> vector<16x128xf32>
    %240 = vector.extract_strided_slice %188 {offsets = [9, 0], sizes = [1, 128], strides = [1, 1]} : vector<49x128xf32> to vector<1x128xf32>
    %241 = vector.broadcast %240 : vector<1x128xf32> to vector<16x128xf32>
    %242 = arith.mulf %239, %241 : vector<16x128xf32>
    %243 = arith.addf %238, %242 : vector<16x128xf32>
    %244 = vector.extract_strided_slice %188 {offsets = [10, 0], sizes = [1, 128], strides = [1, 1]} : vector<49x128xf32> to vector<1x128xf32>
    %245 = vector.broadcast %244 : vector<1x128xf32> to vector<16x128xf32>
    %246 = arith.mulf %228, %245 : vector<16x128xf32>
    %247 = arith.addf %243, %246 : vector<16x128xf32>
    %c120_i32_93 = arith.constant 120 : i32
    %248 = tpu.dynamic_rotate %228 by %c120_i32_93 dim 1 : vector<16x128xf32>, i32 -> vector<16x128xf32>
    %249 = vector.extract_strided_slice %188 {offsets = [11, 0], sizes = [1, 128], strides = [1, 1]} : vector<49x128xf32> to vector<1x128xf32>
    %250 = vector.broadcast %249 : vector<1x128xf32> to vector<16x128xf32>
    %251 = arith.mulf %248, %250 : vector<16x128xf32>
    %252 = arith.addf %247, %251 : vector<16x128xf32>
    %c112_i32_94 = arith.constant 112 : i32
    %253 = tpu.dynamic_rotate %228 by %c112_i32_94 dim 1 : vector<16x128xf32>, i32 -> vector<16x128xf32>
    %254 = vector.extract_strided_slice %188 {offsets = [12, 0], sizes = [1, 128], strides = [1, 1]} : vector<49x128xf32> to vector<1x128xf32>
    %255 = vector.broadcast %254 : vector<1x128xf32> to vector<16x128xf32>
    %256 = arith.mulf %253, %255 : vector<16x128xf32>
    %257 = arith.addf %252, %256 : vector<16x128xf32>
    %c104_i32_95 = arith.constant 104 : i32
    %258 = tpu.dynamic_rotate %228 by %c104_i32_95 dim 1 : vector<16x128xf32>, i32 -> vector<16x128xf32>
    %259 = vector.extract_strided_slice %188 {offsets = [13, 0], sizes = [1, 128], strides = [1, 1]} : vector<49x128xf32> to vector<1x128xf32>
    %260 = vector.broadcast %259 : vector<1x128xf32> to vector<16x128xf32>
    %261 = arith.mulf %258, %260 : vector<16x128xf32>
    %262 = arith.addf %257, %261 : vector<16x128xf32>
    %c7_96 = arith.constant 7 : index
    %c0_97 = arith.constant 0 : index
    %263 = vector.load %arg13[%c7_96, %c0_97] : memref<32x128xf32, #tpu.memory_space<vmem>>, vector<16x128xf32>
    %c24_i32_98 = arith.constant 24 : i32
    %264 = tpu.dynamic_rotate %263 by %c24_i32_98 dim 1 : vector<16x128xf32>, i32 -> vector<16x128xf32>
    %265 = vector.extract_strided_slice %188 {offsets = [14, 0], sizes = [1, 128], strides = [1, 1]} : vector<49x128xf32> to vector<1x128xf32>
    %266 = vector.broadcast %265 : vector<1x128xf32> to vector<16x128xf32>
    %267 = arith.mulf %264, %266 : vector<16x128xf32>
    %268 = arith.addf %262, %267 : vector<16x128xf32>
    %c16_i32_99 = arith.constant 16 : i32
    %269 = tpu.dynamic_rotate %263 by %c16_i32_99 dim 1 : vector<16x128xf32>, i32 -> vector<16x128xf32>
    %270 = vector.extract_strided_slice %188 {offsets = [15, 0], sizes = [1, 128], strides = [1, 1]} : vector<49x128xf32> to vector<1x128xf32>
    %271 = vector.broadcast %270 : vector<1x128xf32> to vector<16x128xf32>
    %272 = arith.mulf %269, %271 : vector<16x128xf32>
    %273 = arith.addf %268, %272 : vector<16x128xf32>
    %c8_i32_100 = arith.constant 8 : i32
    %274 = tpu.dynamic_rotate %263 by %c8_i32_100 dim 1 : vector<16x128xf32>, i32 -> vector<16x128xf32>
    %275 = vector.extract_strided_slice %188 {offsets = [16, 0], sizes = [1, 128], strides = [1, 1]} : vector<49x128xf32> to vector<1x128xf32>
    %276 = vector.broadcast %275 : vector<1x128xf32> to vector<16x128xf32>
    %277 = arith.mulf %274, %276 : vector<16x128xf32>
    %278 = arith.addf %273, %277 : vector<16x128xf32>
    %279 = vector.extract_strided_slice %188 {offsets = [17, 0], sizes = [1, 128], strides = [1, 1]} : vector<49x128xf32> to vector<1x128xf32>
    %280 = vector.broadcast %279 : vector<1x128xf32> to vector<16x128xf32>
    %281 = arith.mulf %263, %280 : vector<16x128xf32>
    %282 = arith.addf %278, %281 : vector<16x128xf32>
    %c120_i32_101 = arith.constant 120 : i32
    %283 = tpu.dynamic_rotate %263 by %c120_i32_101 dim 1 : vector<16x128xf32>, i32 -> vector<16x128xf32>
    %284 = vector.extract_strided_slice %188 {offsets = [18, 0], sizes = [1, 128], strides = [1, 1]} : vector<49x128xf32> to vector<1x128xf32>
    %285 = vector.broadcast %284 : vector<1x128xf32> to vector<16x128xf32>
    %286 = arith.mulf %283, %285 : vector<16x128xf32>
    %287 = arith.addf %282, %286 : vector<16x128xf32>
    %c112_i32_102 = arith.constant 112 : i32
    %288 = tpu.dynamic_rotate %263 by %c112_i32_102 dim 1 : vector<16x128xf32>, i32 -> vector<16x128xf32>
    %289 = vector.extract_strided_slice %188 {offsets = [19, 0], sizes = [1, 128], strides = [1, 1]} : vector<49x128xf32> to vector<1x128xf32>
    %290 = vector.broadcast %289 : vector<1x128xf32> to vector<16x128xf32>
    %291 = arith.mulf %288, %290 : vector<16x128xf32>
    %292 = arith.addf %287, %291 : vector<16x128xf32>
    %c104_i32_103 = arith.constant 104 : i32
    %293 = tpu.dynamic_rotate %263 by %c104_i32_103 dim 1 : vector<16x128xf32>, i32 -> vector<16x128xf32>
    %294 = vector.extract_strided_slice %188 {offsets = [20, 0], sizes = [1, 128], strides = [1, 1]} : vector<49x128xf32> to vector<1x128xf32>
    %295 = vector.broadcast %294 : vector<1x128xf32> to vector<16x128xf32>
    %296 = arith.mulf %293, %295 : vector<16x128xf32>
    %297 = arith.addf %292, %296 : vector<16x128xf32>
    %c8_104 = arith.constant 8 : index
    %c0_105 = arith.constant 0 : index
    %298 = vector.load %arg13[%c8_104, %c0_105] : memref<32x128xf32, #tpu.memory_space<vmem>>, vector<16x128xf32>
    %c24_i32_106 = arith.constant 24 : i32
    %299 = tpu.dynamic_rotate %298 by %c24_i32_106 dim 1 : vector<16x128xf32>, i32 -> vector<16x128xf32>
    %300 = vector.extract_strided_slice %188 {offsets = [21, 0], sizes = [1, 128], strides = [1, 1]} : vector<49x128xf32> to vector<1x128xf32>
    %301 = vector.broadcast %300 : vector<1x128xf32> to vector<16x128xf32>
    %302 = arith.mulf %299, %301 : vector<16x128xf32>
    %303 = arith.addf %297, %302 : vector<16x128xf32>
    %c16_i32_107 = arith.constant 16 : i32
    %304 = tpu.dynamic_rotate %298 by %c16_i32_107 dim 1 : vector<16x128xf32>, i32 -> vector<16x128xf32>
    %305 = vector.extract_strided_slice %188 {offsets = [22, 0], sizes = [1, 128], strides = [1, 1]} : vector<49x128xf32> to vector<1x128xf32>
    %306 = vector.broadcast %305 : vector<1x128xf32> to vector<16x128xf32>
    %307 = arith.mulf %304, %306 : vector<16x128xf32>
    %308 = arith.addf %303, %307 : vector<16x128xf32>
    %c8_i32_108 = arith.constant 8 : i32
    %309 = tpu.dynamic_rotate %298 by %c8_i32_108 dim 1 : vector<16x128xf32>, i32 -> vector<16x128xf32>
    %310 = vector.extract_strided_slice %188 {offsets = [23, 0], sizes = [1, 128], strides = [1, 1]} : vector<49x128xf32> to vector<1x128xf32>
    %311 = vector.broadcast %310 : vector<1x128xf32> to vector<16x128xf32>
    %312 = arith.mulf %309, %311 : vector<16x128xf32>
    %313 = arith.addf %308, %312 : vector<16x128xf32>
    %314 = vector.extract_strided_slice %188 {offsets = [24, 0], sizes = [1, 128], strides = [1, 1]} : vector<49x128xf32> to vector<1x128xf32>
    %315 = vector.broadcast %314 : vector<1x128xf32> to vector<16x128xf32>
    %316 = arith.mulf %298, %315 : vector<16x128xf32>
    %317 = arith.addf %313, %316 : vector<16x128xf32>
    %c120_i32_109 = arith.constant 120 : i32
    %318 = tpu.dynamic_rotate %298 by %c120_i32_109 dim 1 : vector<16x128xf32>, i32 -> vector<16x128xf32>
    %319 = vector.extract_strided_slice %188 {offsets = [25, 0], sizes = [1, 128], strides = [1, 1]} : vector<49x128xf32> to vector<1x128xf32>
    %320 = vector.broadcast %319 : vector<1x128xf32> to vector<16x128xf32>
    %321 = arith.mulf %318, %320 : vector<16x128xf32>
    %322 = arith.addf %317, %321 : vector<16x128xf32>
    %c112_i32_110 = arith.constant 112 : i32
    %323 = tpu.dynamic_rotate %298 by %c112_i32_110 dim 1 : vector<16x128xf32>, i32 -> vector<16x128xf32>
    %324 = vector.extract_strided_slice %188 {offsets = [26, 0], sizes = [1, 128], strides = [1, 1]} : vector<49x128xf32> to vector<1x128xf32>
    %325 = vector.broadcast %324 : vector<1x128xf32> to vector<16x128xf32>
    %326 = arith.mulf %323, %325 : vector<16x128xf32>
    %327 = arith.addf %322, %326 : vector<16x128xf32>
    %c104_i32_111 = arith.constant 104 : i32
    %328 = tpu.dynamic_rotate %298 by %c104_i32_111 dim 1 : vector<16x128xf32>, i32 -> vector<16x128xf32>
    %329 = vector.extract_strided_slice %188 {offsets = [27, 0], sizes = [1, 128], strides = [1, 1]} : vector<49x128xf32> to vector<1x128xf32>
    %330 = vector.broadcast %329 : vector<1x128xf32> to vector<16x128xf32>
    %331 = arith.mulf %328, %330 : vector<16x128xf32>
    %332 = arith.addf %327, %331 : vector<16x128xf32>
    %c9_112 = arith.constant 9 : index
    %c0_113 = arith.constant 0 : index
    %333 = vector.load %arg13[%c9_112, %c0_113] : memref<32x128xf32, #tpu.memory_space<vmem>>, vector<16x128xf32>
    %c24_i32_114 = arith.constant 24 : i32
    %334 = tpu.dynamic_rotate %333 by %c24_i32_114 dim 1 : vector<16x128xf32>, i32 -> vector<16x128xf32>
    %335 = vector.extract_strided_slice %188 {offsets = [28, 0], sizes = [1, 128], strides = [1, 1]} : vector<49x128xf32> to vector<1x128xf32>
    %336 = vector.broadcast %335 : vector<1x128xf32> to vector<16x128xf32>
    %337 = arith.mulf %334, %336 : vector<16x128xf32>
    %338 = arith.addf %332, %337 : vector<16x128xf32>
    %c16_i32_115 = arith.constant 16 : i32
    %339 = tpu.dynamic_rotate %333 by %c16_i32_115 dim 1 : vector<16x128xf32>, i32 -> vector<16x128xf32>
    %340 = vector.extract_strided_slice %188 {offsets = [29, 0], sizes = [1, 128], strides = [1, 1]} : vector<49x128xf32> to vector<1x128xf32>
    %341 = vector.broadcast %340 : vector<1x128xf32> to vector<16x128xf32>
    %342 = arith.mulf %339, %341 : vector<16x128xf32>
    %343 = arith.addf %338, %342 : vector<16x128xf32>
    %c8_i32_116 = arith.constant 8 : i32
    %344 = tpu.dynamic_rotate %333 by %c8_i32_116 dim 1 : vector<16x128xf32>, i32 -> vector<16x128xf32>
    %345 = vector.extract_strided_slice %188 {offsets = [30, 0], sizes = [1, 128], strides = [1, 1]} : vector<49x128xf32> to vector<1x128xf32>
    %346 = vector.broadcast %345 : vector<1x128xf32> to vector<16x128xf32>
    %347 = arith.mulf %344, %346 : vector<16x128xf32>
    %348 = arith.addf %343, %347 : vector<16x128xf32>
    %349 = vector.extract_strided_slice %188 {offsets = [31, 0], sizes = [1, 128], strides = [1, 1]} : vector<49x128xf32> to vector<1x128xf32>
    %350 = vector.broadcast %349 : vector<1x128xf32> to vector<16x128xf32>
    %351 = arith.mulf %333, %350 : vector<16x128xf32>
    %352 = arith.addf %348, %351 : vector<16x128xf32>
    %c120_i32_117 = arith.constant 120 : i32
    %353 = tpu.dynamic_rotate %333 by %c120_i32_117 dim 1 : vector<16x128xf32>, i32 -> vector<16x128xf32>
    %354 = vector.extract_strided_slice %188 {offsets = [32, 0], sizes = [1, 128], strides = [1, 1]} : vector<49x128xf32> to vector<1x128xf32>
    %355 = vector.broadcast %354 : vector<1x128xf32> to vector<16x128xf32>
    %356 = arith.mulf %353, %355 : vector<16x128xf32>
    %357 = arith.addf %352, %356 : vector<16x128xf32>
    %c112_i32_118 = arith.constant 112 : i32
    %358 = tpu.dynamic_rotate %333 by %c112_i32_118 dim 1 : vector<16x128xf32>, i32 -> vector<16x128xf32>
    %359 = vector.extract_strided_slice %188 {offsets = [33, 0], sizes = [1, 128], strides = [1, 1]} : vector<49x128xf32> to vector<1x128xf32>
    %360 = vector.broadcast %359 : vector<1x128xf32> to vector<16x128xf32>
    %361 = arith.mulf %358, %360 : vector<16x128xf32>
    %362 = arith.addf %357, %361 : vector<16x128xf32>
    %c104_i32_119 = arith.constant 104 : i32
    %363 = tpu.dynamic_rotate %333 by %c104_i32_119 dim 1 : vector<16x128xf32>, i32 -> vector<16x128xf32>
    %364 = vector.extract_strided_slice %188 {offsets = [34, 0], sizes = [1, 128], strides = [1, 1]} : vector<49x128xf32> to vector<1x128xf32>
    %365 = vector.broadcast %364 : vector<1x128xf32> to vector<16x128xf32>
    %366 = arith.mulf %363, %365 : vector<16x128xf32>
    %367 = arith.addf %362, %366 : vector<16x128xf32>
    %c10 = arith.constant 10 : index
    %c0_120 = arith.constant 0 : index
    %368 = vector.load %arg13[%c10, %c0_120] : memref<32x128xf32, #tpu.memory_space<vmem>>, vector<16x128xf32>
    %c24_i32_121 = arith.constant 24 : i32
    %369 = tpu.dynamic_rotate %368 by %c24_i32_121 dim 1 : vector<16x128xf32>, i32 -> vector<16x128xf32>
    %370 = vector.extract_strided_slice %188 {offsets = [35, 0], sizes = [1, 128], strides = [1, 1]} : vector<49x128xf32> to vector<1x128xf32>
    %371 = vector.broadcast %370 : vector<1x128xf32> to vector<16x128xf32>
    %372 = arith.mulf %369, %371 : vector<16x128xf32>
    %373 = arith.addf %367, %372 : vector<16x128xf32>
    %c16_i32_122 = arith.constant 16 : i32
    %374 = tpu.dynamic_rotate %368 by %c16_i32_122 dim 1 : vector<16x128xf32>, i32 -> vector<16x128xf32>
    %375 = vector.extract_strided_slice %188 {offsets = [36, 0], sizes = [1, 128], strides = [1, 1]} : vector<49x128xf32> to vector<1x128xf32>
    %376 = vector.broadcast %375 : vector<1x128xf32> to vector<16x128xf32>
    %377 = arith.mulf %374, %376 : vector<16x128xf32>
    %378 = arith.addf %373, %377 : vector<16x128xf32>
    %c8_i32_123 = arith.constant 8 : i32
    %379 = tpu.dynamic_rotate %368 by %c8_i32_123 dim 1 : vector<16x128xf32>, i32 -> vector<16x128xf32>
    %380 = vector.extract_strided_slice %188 {offsets = [37, 0], sizes = [1, 128], strides = [1, 1]} : vector<49x128xf32> to vector<1x128xf32>
    %381 = vector.broadcast %380 : vector<1x128xf32> to vector<16x128xf32>
    %382 = arith.mulf %379, %381 : vector<16x128xf32>
    %383 = arith.addf %378, %382 : vector<16x128xf32>
    %384 = vector.extract_strided_slice %188 {offsets = [38, 0], sizes = [1, 128], strides = [1, 1]} : vector<49x128xf32> to vector<1x128xf32>
    %385 = vector.broadcast %384 : vector<1x128xf32> to vector<16x128xf32>
    %386 = arith.mulf %368, %385 : vector<16x128xf32>
    %387 = arith.addf %383, %386 : vector<16x128xf32>
    %c120_i32_124 = arith.constant 120 : i32
    %388 = tpu.dynamic_rotate %368 by %c120_i32_124 dim 1 : vector<16x128xf32>, i32 -> vector<16x128xf32>
    %389 = vector.extract_strided_slice %188 {offsets = [39, 0], sizes = [1, 128], strides = [1, 1]} : vector<49x128xf32> to vector<1x128xf32>
    %390 = vector.broadcast %389 : vector<1x128xf32> to vector<16x128xf32>
    %391 = arith.mulf %388, %390 : vector<16x128xf32>
    %392 = arith.addf %387, %391 : vector<16x128xf32>
    %c112_i32_125 = arith.constant 112 : i32
    %393 = tpu.dynamic_rotate %368 by %c112_i32_125 dim 1 : vector<16x128xf32>, i32 -> vector<16x128xf32>
    %394 = vector.extract_strided_slice %188 {offsets = [40, 0], sizes = [1, 128], strides = [1, 1]} : vector<49x128xf32> to vector<1x128xf32>
    %395 = vector.broadcast %394 : vector<1x128xf32> to vector<16x128xf32>
    %396 = arith.mulf %393, %395 : vector<16x128xf32>
    %397 = arith.addf %392, %396 : vector<16x128xf32>
    %c104_i32_126 = arith.constant 104 : i32
    %398 = tpu.dynamic_rotate %368 by %c104_i32_126 dim 1 : vector<16x128xf32>, i32 -> vector<16x128xf32>
    %399 = vector.extract_strided_slice %188 {offsets = [41, 0], sizes = [1, 128], strides = [1, 1]} : vector<49x128xf32> to vector<1x128xf32>
    %400 = vector.broadcast %399 : vector<1x128xf32> to vector<16x128xf32>
    %401 = arith.mulf %398, %400 : vector<16x128xf32>
    %402 = arith.addf %397, %401 : vector<16x128xf32>
    %c11 = arith.constant 11 : index
    %c0_127 = arith.constant 0 : index
    %403 = vector.load %arg13[%c11, %c0_127] : memref<32x128xf32, #tpu.memory_space<vmem>>, vector<16x128xf32>
    %c24_i32_128 = arith.constant 24 : i32
    %404 = tpu.dynamic_rotate %403 by %c24_i32_128 dim 1 : vector<16x128xf32>, i32 -> vector<16x128xf32>
    %405 = vector.extract_strided_slice %188 {offsets = [42, 0], sizes = [1, 128], strides = [1, 1]} : vector<49x128xf32> to vector<1x128xf32>
    %406 = vector.broadcast %405 : vector<1x128xf32> to vector<16x128xf32>
    %407 = arith.mulf %404, %406 : vector<16x128xf32>
    %408 = arith.addf %402, %407 : vector<16x128xf32>
    %c16_i32_129 = arith.constant 16 : i32
    %409 = tpu.dynamic_rotate %403 by %c16_i32_129 dim 1 : vector<16x128xf32>, i32 -> vector<16x128xf32>
    %410 = vector.extract_strided_slice %188 {offsets = [43, 0], sizes = [1, 128], strides = [1, 1]} : vector<49x128xf32> to vector<1x128xf32>
    %411 = vector.broadcast %410 : vector<1x128xf32> to vector<16x128xf32>
    %412 = arith.mulf %409, %411 : vector<16x128xf32>
    %413 = arith.addf %408, %412 : vector<16x128xf32>
    %c8_i32_130 = arith.constant 8 : i32
    %414 = tpu.dynamic_rotate %403 by %c8_i32_130 dim 1 : vector<16x128xf32>, i32 -> vector<16x128xf32>
    %415 = vector.extract_strided_slice %188 {offsets = [44, 0], sizes = [1, 128], strides = [1, 1]} : vector<49x128xf32> to vector<1x128xf32>
    %416 = vector.broadcast %415 : vector<1x128xf32> to vector<16x128xf32>
    %417 = arith.mulf %414, %416 : vector<16x128xf32>
    %418 = arith.addf %413, %417 : vector<16x128xf32>
    %419 = vector.extract_strided_slice %188 {offsets = [45, 0], sizes = [1, 128], strides = [1, 1]} : vector<49x128xf32> to vector<1x128xf32>
    %420 = vector.broadcast %419 : vector<1x128xf32> to vector<16x128xf32>
    %421 = arith.mulf %403, %420 : vector<16x128xf32>
    %422 = arith.addf %418, %421 : vector<16x128xf32>
    %c120_i32_131 = arith.constant 120 : i32
    %423 = tpu.dynamic_rotate %403 by %c120_i32_131 dim 1 : vector<16x128xf32>, i32 -> vector<16x128xf32>
    %424 = vector.extract_strided_slice %188 {offsets = [46, 0], sizes = [1, 128], strides = [1, 1]} : vector<49x128xf32> to vector<1x128xf32>
    %425 = vector.broadcast %424 : vector<1x128xf32> to vector<16x128xf32>
    %426 = arith.mulf %423, %425 : vector<16x128xf32>
    %427 = arith.addf %422, %426 : vector<16x128xf32>
    %c112_i32_132 = arith.constant 112 : i32
    %428 = tpu.dynamic_rotate %403 by %c112_i32_132 dim 1 : vector<16x128xf32>, i32 -> vector<16x128xf32>
    %429 = vector.extract_strided_slice %188 {offsets = [47, 0], sizes = [1, 128], strides = [1, 1]} : vector<49x128xf32> to vector<1x128xf32>
    %430 = vector.broadcast %429 : vector<1x128xf32> to vector<16x128xf32>
    %431 = arith.mulf %428, %430 : vector<16x128xf32>
    %432 = arith.addf %427, %431 : vector<16x128xf32>
    %c104_i32_133 = arith.constant 104 : i32
    %433 = tpu.dynamic_rotate %403 by %c104_i32_133 dim 1 : vector<16x128xf32>, i32 -> vector<16x128xf32>
    %434 = vector.extract_strided_slice %188 {offsets = [48, 0], sizes = [1, 128], strides = [1, 1]} : vector<49x128xf32> to vector<1x128xf32>
    %435 = vector.broadcast %434 : vector<1x128xf32> to vector<16x128xf32>
    %436 = arith.mulf %433, %435 : vector<16x128xf32>
    %437 = arith.addf %432, %436 : vector<16x128xf32>
    %c76 = arith.constant 76 : index
    %c0_134 = arith.constant 0 : index
    %438 = vector.load %arg4[%c76, %c0_134] : memref<119x128xf32, #tpu.memory_space<vmem>>, vector<9x128xf32>
    %c8_135 = arith.constant 8 : index
    %c0_136 = arith.constant 0 : index
    %439 = vector.load %arg13[%c8_135, %c0_136] : memref<32x128xf32, #tpu.memory_space<vmem>>, vector<16x128xf32>
    tpu.vector_store %arg13[%c8_135, %c0_136], %187 {strides = array<i32>} : memref<32x128xf32, #tpu.memory_space<vmem>>, vector<16x128xf32>,
    %c6_137 = arith.constant 6 : index
    %c0_138 = arith.constant 0 : index
    %440 = vector.load %arg2[%c6_137, %c0_138] : memref<14x128xf32, #tpu.memory_space<vmem>>, vector<1x128xf32>
    %441 = vector.shape_cast %440 : vector<1x128xf32> to vector<1x128xf32>
    %442 = vector.broadcast %441 : vector<1x128xf32> to vector<16x128xf32>
    %c7_139 = arith.constant 7 : index
    %c0_140 = arith.constant 0 : index
    %443 = vector.load %arg13[%c7_139, %c0_140] : memref<32x128xf32, #tpu.memory_space<vmem>>, vector<16x128xf32>
    %c8_i32_141 = arith.constant 8 : i32
    %444 = tpu.dynamic_rotate %443 by %c8_i32_141 dim 1 : vector<16x128xf32>, i32 -> vector<16x128xf32>
    %445 = vector.extract_strided_slice %438 {offsets = [0, 0], sizes = [1, 128], strides = [1, 1]} : vector<9x128xf32> to vector<1x128xf32>
    %446 = vector.broadcast %445 : vector<1x128xf32> to vector<16x128xf32>
    %447 = arith.mulf %444, %446 : vector<16x128xf32>
    %448 = arith.addf %442, %447 : vector<16x128xf32>
    %449 = vector.extract_strided_slice %438 {offsets = [1, 0], sizes = [1, 128], strides = [1, 1]} : vector<9x128xf32> to vector<1x128xf32>
    %450 = vector.broadcast %449 : vector<1x128xf32> to vector<16x128xf32>
    %451 = arith.mulf %443, %450 : vector<16x128xf32>
    %452 = arith.addf %448, %451 : vector<16x128xf32>
    %c120_i32_142 = arith.constant 120 : i32
    %453 = tpu.dynamic_rotate %443 by %c120_i32_142 dim 1 : vector<16x128xf32>, i32 -> vector<16x128xf32>
    %454 = vector.extract_strided_slice %438 {offsets = [2, 0], sizes = [1, 128], strides = [1, 1]} : vector<9x128xf32> to vector<1x128xf32>
    %455 = vector.broadcast %454 : vector<1x128xf32> to vector<16x128xf32>
    %456 = arith.mulf %453, %455 : vector<16x128xf32>
    %457 = arith.addf %452, %456 : vector<16x128xf32>
    %c8_143 = arith.constant 8 : index
    %c0_144 = arith.constant 0 : index
    %458 = vector.load %arg13[%c8_143, %c0_144] : memref<32x128xf32, #tpu.memory_space<vmem>>, vector<16x128xf32>
    %c8_i32_145 = arith.constant 8 : i32
    %459 = tpu.dynamic_rotate %458 by %c8_i32_145 dim 1 : vector<16x128xf32>, i32 -> vector<16x128xf32>
    %460 = vector.extract_strided_slice %438 {offsets = [3, 0], sizes = [1, 128], strides = [1, 1]} : vector<9x128xf32> to vector<1x128xf32>
    %461 = vector.broadcast %460 : vector<1x128xf32> to vector<16x128xf32>
    %462 = arith.mulf %459, %461 : vector<16x128xf32>
    %463 = arith.addf %457, %462 : vector<16x128xf32>
    %464 = vector.extract_strided_slice %438 {offsets = [4, 0], sizes = [1, 128], strides = [1, 1]} : vector<9x128xf32> to vector<1x128xf32>
    %465 = vector.broadcast %464 : vector<1x128xf32> to vector<16x128xf32>
    %466 = arith.mulf %458, %465 : vector<16x128xf32>
    %467 = arith.addf %463, %466 : vector<16x128xf32>
    %c120_i32_146 = arith.constant 120 : i32
    %468 = tpu.dynamic_rotate %458 by %c120_i32_146 dim 1 : vector<16x128xf32>, i32 -> vector<16x128xf32>
    %469 = vector.extract_strided_slice %438 {offsets = [5, 0], sizes = [1, 128], strides = [1, 1]} : vector<9x128xf32> to vector<1x128xf32>
    %470 = vector.broadcast %469 : vector<1x128xf32> to vector<16x128xf32>
    %471 = arith.mulf %468, %470 : vector<16x128xf32>
    %472 = arith.addf %467, %471 : vector<16x128xf32>
    %c9_147 = arith.constant 9 : index
    %c0_148 = arith.constant 0 : index
    %473 = vector.load %arg13[%c9_147, %c0_148] : memref<32x128xf32, #tpu.memory_space<vmem>>, vector<16x128xf32>
    %c8_i32_149 = arith.constant 8 : i32
    %474 = tpu.dynamic_rotate %473 by %c8_i32_149 dim 1 : vector<16x128xf32>, i32 -> vector<16x128xf32>
    %475 = vector.extract_strided_slice %438 {offsets = [6, 0], sizes = [1, 128], strides = [1, 1]} : vector<9x128xf32> to vector<1x128xf32>
    %476 = vector.broadcast %475 : vector<1x128xf32> to vector<16x128xf32>
    %477 = arith.mulf %474, %476 : vector<16x128xf32>
    %478 = arith.addf %472, %477 : vector<16x128xf32>
    %479 = vector.extract_strided_slice %438 {offsets = [7, 0], sizes = [1, 128], strides = [1, 1]} : vector<9x128xf32> to vector<1x128xf32>
    %480 = vector.broadcast %479 : vector<1x128xf32> to vector<16x128xf32>
    %481 = arith.mulf %473, %480 : vector<16x128xf32>
    %482 = arith.addf %478, %481 : vector<16x128xf32>
    %c120_i32_150 = arith.constant 120 : i32
    %483 = tpu.dynamic_rotate %473 by %c120_i32_150 dim 1 : vector<16x128xf32>, i32 -> vector<16x128xf32>
    %484 = vector.extract_strided_slice %438 {offsets = [8, 0], sizes = [1, 128], strides = [1, 1]} : vector<9x128xf32> to vector<1x128xf32>
    %485 = vector.broadcast %484 : vector<1x128xf32> to vector<16x128xf32>
    %486 = arith.mulf %483, %485 : vector<16x128xf32>
    %487 = arith.addf %482, %486 : vector<16x128xf32>
    %488 = arith.addf %487, %437 : vector<16x128xf32>
    %cst_151 = arith.constant 0.000000e+00 : f32
    %489 = vector.broadcast %cst_151 : f32 to vector<16x128xf32>
    %490 = arith.maximumf %488, %489 : vector<16x128xf32>
    %c2_152 = arith.constant 2 : index
    %c0_153 = arith.constant 0 : index
    %c0_154 = arith.constant 0 : index
    %491 = vector.load %arg6[%c2_152, %c0_153, %c0_154] : memref<5x128x128xf32, #tpu.memory_space<vmem>>, vector<1x128x128xf32>
    %492 = vector.shape_cast %491 : vector<1x128x128xf32> to vector<128x128xf32>
    %cst_155 = arith.constant dense<0.000000e+00> : vector<16x128xf32>
    %493 = tpu.matmul %490, %492, %cst_155 {dimension_numbers = #tpu.dot_dimension_numbers<[1], [0], [0], [1], [0, 0, 1, 1], [], []>} : vector<16x128xf32>, vector<128x128xf32>, vector<16x128xf32> -> vector<16x128xf32>
    %c7_156 = arith.constant 7 : index
    %c0_157 = arith.constant 0 : index
    %494 = vector.load %arg2[%c7_156, %c0_157] : memref<14x128xf32, #tpu.memory_space<vmem>>, vector<1x128xf32>
    %495 = vector.broadcast %494 : vector<1x128xf32> to vector<16x128xf32>
    %496 = arith.addf %493, %495 : vector<16x128xf32>
    %497 = arith.addf %496, %179 : vector<16x128xf32>
    %c0_158 = arith.constant 0 : index
    %c0_159 = arith.constant 0 : index
    %c0_160 = arith.constant 0 : index
    %498 = vector.load %arg7[%c0_158, %c0_159, %c0_160] : memref<3x128x256xf32, #tpu.memory_space<vmem>>, vector<1x128x256xf32>
    %499 = vector.shape_cast %498 : vector<1x128x256xf32> to vector<128x256xf32>
    %cst_161 = arith.constant dense<0.000000e+00> : vector<16x256xf32>
    %500 = tpu.matmul %497, %499, %cst_161 {dimension_numbers = #tpu.dot_dimension_numbers<[1], [0], [0], [1], [0, 0, 1, 1], [], []>} : vector<16x128xf32>, vector<128x256xf32>, vector<16x256xf32> -> vector<16x256xf32>
    %c0_162 = arith.constant 0 : index
    %c0_163 = arith.constant 0 : index
    %501 = vector.load %arg3[%c0_162, %c0_163] : memref<4x256xf32, #tpu.memory_space<vmem>>, vector<1x256xf32>
    %502 = vector.broadcast %501 : vector<1x256xf32> to vector<16x256xf32>
    %503 = arith.addf %500, %502 : vector<16x256xf32>
    %504 = arith.mulf %503, %503 : vector<16x256xf32>
    %505 = arith.mulf %503, %504 : vector<16x256xf32>
    %cst_164 = arith.constant 4.471500e-02 : f32
    %506 = vector.broadcast %cst_164 : f32 to vector<16x256xf32>
    %507 = arith.mulf %506, %505 : vector<16x256xf32>
    %508 = arith.addf %503, %507 : vector<16x256xf32>
    %cst_165 = arith.constant 0.797884583 : f32
    %509 = vector.broadcast %cst_165 : f32 to vector<16x256xf32>
    %510 = arith.mulf %509, %508 : vector<16x256xf32>
    %511 = math.tanh %510 : vector<16x256xf32>
    %cst_166 = arith.constant 1.000000e+00 : f32
    %512 = vector.broadcast %cst_166 : f32 to vector<16x256xf32>
    %513 = arith.addf %512, %511 : vector<16x256xf32>
    %cst_167 = arith.constant 5.000000e-01 : f32
    %514 = vector.broadcast %cst_167 : f32 to vector<16x256xf32>
    %515 = arith.mulf %514, %513 : vector<16x256xf32>
    %516 = arith.mulf %503, %515 : vector<16x256xf32>
    %c0_168 = arith.constant 0 : index
    %c0_169 = arith.constant 0 : index
    %c0_170 = arith.constant 0 : index
    %517 = vector.load %arg8[%c0_168, %c0_169, %c0_170] : memref<2x256x128xf32, #tpu.memory_space<vmem>>, vector<1x256x128xf32>
    %518 = vector.shape_cast %517 : vector<1x256x128xf32> to vector<256x128xf32>
    %cst_171 = arith.constant dense<0.000000e+00> : vector<16x128xf32>
    %519 = tpu.matmul %516, %518, %cst_171 {dimension_numbers = #tpu.dot_dimension_numbers<[1], [0], [0], [1], [0, 0, 1, 1], [], []>} : vector<16x256xf32>, vector<256x128xf32>, vector<16x128xf32> -> vector<16x128xf32>
    %c8_172 = arith.constant 8 : index
    %c0_173 = arith.constant 0 : index
    %520 = vector.load %arg2[%c8_172, %c0_173] : memref<14x128xf32, #tpu.memory_space<vmem>>, vector<1x128xf32>
    %521 = vector.broadcast %520 : vector<1x128xf32> to vector<16x128xf32>
    %522 = arith.addf %519, %521 : vector<16x128xf32>
    %523 = arith.addf %522, %497 : vector<16x128xf32>
    %c1_174 = arith.constant 1 : index
    %c0_175 = arith.constant 0 : index
    %c0_176 = arith.constant 0 : index
    %524 = vector.load %arg7[%c1_174, %c0_175, %c0_176] : memref<3x128x256xf32, #tpu.memory_space<vmem>>, vector<1x128x256xf32>
    %525 = vector.shape_cast %524 : vector<1x128x256xf32> to vector<128x256xf32>
    %cst_177 = arith.constant dense<0.000000e+00> : vector<16x256xf32>
    %526 = tpu.matmul %523, %525, %cst_177 {dimension_numbers = #tpu.dot_dimension_numbers<[1], [0], [0], [1], [0, 0, 1, 1], [], []>} : vector<16x128xf32>, vector<128x256xf32>, vector<16x256xf32> -> vector<16x256xf32>
    %c1_178 = arith.constant 1 : index
    %c0_179 = arith.constant 0 : index
    %527 = vector.load %arg3[%c1_178, %c0_179] : memref<4x256xf32, #tpu.memory_space<vmem>>, vector<1x256xf32>
    %528 = vector.broadcast %527 : vector<1x256xf32> to vector<16x256xf32>
    %529 = arith.addf %526, %528 : vector<16x256xf32>
    %cst_180 = arith.constant 0.000000e+00 : f32
    %530 = vector.broadcast %cst_180 : f32 to vector<16x256xf32>
    %531 = arith.maximumf %529, %530 : vector<16x256xf32>
    %c0_181 = arith.constant 0 : index
    %c0_182 = arith.constant 0 : index
    %532 = vector.load %arg5[%c0_181, %c0_182] : memref<9x256xf32, #tpu.memory_space<vmem>>, vector<9x256xf32>
    %c8_183 = arith.constant 8 : index
    %c0_184 = arith.constant 0 : index
    %533 = vector.load %arg14[%c8_183, %c0_184] : memref<32x256xf32, #tpu.memory_space<vmem>>, vector<16x256xf32>
    tpu.vector_store %arg14[%c8_183, %c0_184], %531 {strides = array<i32>} : memref<32x256xf32, #tpu.memory_space<vmem>>, vector<16x256xf32>,
    %c2_185 = arith.constant 2 : index
    %c0_186 = arith.constant 0 : index
    %534 = vector.load %arg3[%c2_185, %c0_186] : memref<4x256xf32, #tpu.memory_space<vmem>>, vector<1x256xf32>
    %535 = vector.shape_cast %534 : vector<1x256xf32> to vector<1x256xf32>
    %536 = vector.broadcast %535 : vector<1x256xf32> to vector<16x256xf32>
    %c7_187 = arith.constant 7 : index
    %c0_188 = arith.constant 0 : index
    %537 = vector.load %arg14[%c7_187, %c0_188] : memref<32x256xf32, #tpu.memory_space<vmem>>, vector<16x256xf32>
    %c16_i32_189 = arith.constant 16 : i32
    %538 = tpu.dynamic_rotate %537 by %c16_i32_189 dim 1 : vector<16x256xf32>, i32 -> vector<16x256xf32>
    %539 = vector.extract_strided_slice %532 {offsets = [0, 0], sizes = [1, 256], strides = [1, 1]} : vector<9x256xf32> to vector<1x256xf32>
    %540 = vector.broadcast %539 : vector<1x256xf32> to vector<16x256xf32>
    %541 = arith.mulf %538, %540 : vector<16x256xf32>
    %542 = arith.addf %536, %541 : vector<16x256xf32>
    %543 = vector.extract_strided_slice %532 {offsets = [1, 0], sizes = [1, 256], strides = [1, 1]} : vector<9x256xf32> to vector<1x256xf32>
    %544 = vector.broadcast %543 : vector<1x256xf32> to vector<16x256xf32>
    %545 = arith.mulf %537, %544 : vector<16x256xf32>
    %546 = arith.addf %542, %545 : vector<16x256xf32>
    %c240_i32 = arith.constant 240 : i32
    %547 = tpu.dynamic_rotate %537 by %c240_i32 dim 1 : vector<16x256xf32>, i32 -> vector<16x256xf32>
    %548 = vector.extract_strided_slice %532 {offsets = [2, 0], sizes = [1, 256], strides = [1, 1]} : vector<9x256xf32> to vector<1x256xf32>
    %549 = vector.broadcast %548 : vector<1x256xf32> to vector<16x256xf32>
    %550 = arith.mulf %547, %549 : vector<16x256xf32>
    %551 = arith.addf %546, %550 : vector<16x256xf32>
    %c8_190 = arith.constant 8 : index
    %c0_191 = arith.constant 0 : index
    %552 = vector.load %arg14[%c8_190, %c0_191] : memref<32x256xf32, #tpu.memory_space<vmem>>, vector<16x256xf32>
    %c16_i32_192 = arith.constant 16 : i32
    %553 = tpu.dynamic_rotate %552 by %c16_i32_192 dim 1 : vector<16x256xf32>, i32 -> vector<16x256xf32>
    %554 = vector.extract_strided_slice %532 {offsets = [3, 0], sizes = [1, 256], strides = [1, 1]} : vector<9x256xf32> to vector<1x256xf32>
    %555 = vector.broadcast %554 : vector<1x256xf32> to vector<16x256xf32>
    %556 = arith.mulf %553, %555 : vector<16x256xf32>
    %557 = arith.addf %551, %556 : vector<16x256xf32>
    %558 = vector.extract_strided_slice %532 {offsets = [4, 0], sizes = [1, 256], strides = [1, 1]} : vector<9x256xf32> to vector<1x256xf32>
    %559 = vector.broadcast %558 : vector<1x256xf32> to vector<16x256xf32>
    %560 = arith.mulf %552, %559 : vector<16x256xf32>
    %561 = arith.addf %557, %560 : vector<16x256xf32>
    %c240_i32_193 = arith.constant 240 : i32
    %562 = tpu.dynamic_rotate %552 by %c240_i32_193 dim 1 : vector<16x256xf32>, i32 -> vector<16x256xf32>
    %563 = vector.extract_strided_slice %532 {offsets = [5, 0], sizes = [1, 256], strides = [1, 1]} : vector<9x256xf32> to vector<1x256xf32>
    %564 = vector.broadcast %563 : vector<1x256xf32> to vector<16x256xf32>
    %565 = arith.mulf %562, %564 : vector<16x256xf32>
    %566 = arith.addf %561, %565 : vector<16x256xf32>
    %c9_194 = arith.constant 9 : index
    %c0_195 = arith.constant 0 : index
    %567 = vector.load %arg14[%c9_194, %c0_195] : memref<32x256xf32, #tpu.memory_space<vmem>>, vector<16x256xf32>
    %c16_i32_196 = arith.constant 16 : i32
    %568 = tpu.dynamic_rotate %567 by %c16_i32_196 dim 1 : vector<16x256xf32>, i32 -> vector<16x256xf32>
    %569 = vector.extract_strided_slice %532 {offsets = [6, 0], sizes = [1, 256], strides = [1, 1]} : vector<9x256xf32> to vector<1x256xf32>
    %570 = vector.broadcast %569 : vector<1x256xf32> to vector<16x256xf32>
    %571 = arith.mulf %568, %570 : vector<16x256xf32>
    %572 = arith.addf %566, %571 : vector<16x256xf32>
    %573 = vector.extract_strided_slice %532 {offsets = [7, 0], sizes = [1, 256], strides = [1, 1]} : vector<9x256xf32> to vector<1x256xf32>
    %574 = vector.broadcast %573 : vector<1x256xf32> to vector<16x256xf32>
    %575 = arith.mulf %567, %574 : vector<16x256xf32>
    %576 = arith.addf %572, %575 : vector<16x256xf32>
    %c240_i32_197 = arith.constant 240 : i32
    %577 = tpu.dynamic_rotate %567 by %c240_i32_197 dim 1 : vector<16x256xf32>, i32 -> vector<16x256xf32>
    %578 = vector.extract_strided_slice %532 {offsets = [8, 0], sizes = [1, 256], strides = [1, 1]} : vector<9x256xf32> to vector<1x256xf32>
    %579 = vector.broadcast %578 : vector<1x256xf32> to vector<16x256xf32>
    %580 = arith.mulf %577, %579 : vector<16x256xf32>
    %581 = arith.addf %576, %580 : vector<16x256xf32>
    %cst_198 = arith.constant 0.000000e+00 : f32
    %582 = vector.broadcast %cst_198 : f32 to vector<16x256xf32>
    %583 = arith.maximumf %581, %582 : vector<16x256xf32>
    %c0_199 = arith.constant 0 : index
    %c0_200 = arith.constant 0 : index
    %584 = vector.load %arg10[%c0_199, %c0_200] : memref<8x16xf32, #tpu.memory_space<vmem>>, vector<8x16xf32>
    %cst_201 = arith.constant dense<0.000000e+00> : vector<8x256xf32>
    %585 = tpu.matmul %584, %583, %cst_201 {dimension_numbers = #tpu.dot_dimension_numbers<[1], [0], [0], [1], [0, 0, 1, 1], [], []>} : vector<8x16xf32>, vector<16x256xf32>, vector<8x256xf32> -> vector<8x256xf32>
    %c0_202 = arith.constant 0 : index
    %c0_203 = arith.constant 0 : index
    %586 = vector.load %arg11[%c0_202, %c0_203] : memref<256x128xf32, #tpu.memory_space<vmem>>, vector<256x128xf32>
    %cst_204 = arith.constant dense<0.000000e+00> : vector<8x128xf32>
    %587 = tpu.matmul %585, %586, %cst_204 {dimension_numbers = #tpu.dot_dimension_numbers<[1], [0], [0], [1], [0, 0, 1, 1], [], []>} : vector<8x256xf32>, vector<256x128xf32>, vector<8x128xf32> -> vector<8x128xf32>
    %c3_205 = arith.constant 3 : index
    %c0_206 = arith.constant 0 : index
    %c0_207 = arith.constant 0 : index
    %588 = vector.load %arg6[%c3_205, %c0_206, %c0_207] : memref<5x128x128xf32, #tpu.memory_space<vmem>>, vector<1x128x128xf32>
    %589 = vector.shape_cast %588 : vector<1x128x128xf32> to vector<128x128xf32>
    %cst_208 = arith.constant dense<0.000000e+00> : vector<8x128xf32>
    %590 = tpu.matmul %587, %589, %cst_208 {dimension_numbers = #tpu.dot_dimension_numbers<[1], [0], [0], [1], [0, 0, 1, 1], [], []>} : vector<8x128xf32>, vector<128x128xf32>, vector<8x128xf32> -> vector<8x128xf32>
    %c9_209 = arith.constant 9 : index
    %c0_210 = arith.constant 0 : index
    %591 = vector.load %arg2[%c9_209, %c0_210] : memref<14x128xf32, #tpu.memory_space<vmem>>, vector<1x128xf32>
    %592 = vector.broadcast %591 : vector<1x128xf32> to vector<8x128xf32>
    %593 = arith.addf %590, %592 : vector<8x128xf32>
    %cst_211 = arith.constant 0.000000e+00 : f32
    %594 = vector.broadcast %cst_211 : f32 to vector<8x128xf32>
    %595 = arith.maximumf %593, %594 : vector<8x128xf32>
    %c85 = arith.constant 85 : index
    %c0_212 = arith.constant 0 : index
    %596 = vector.load %arg4[%c85, %c0_212] : memref<119x128xf32, #tpu.memory_space<vmem>>, vector<25x128xf32>
    %c8_213 = arith.constant 8 : index
    %c0_214 = arith.constant 0 : index
    %597 = vector.load %arg15[%c8_213, %c0_214] : memref<24x128xf32, #tpu.memory_space<vmem>>, vector<8x128xf32>
    tpu.vector_store %arg15[%c8_213, %c0_214], %595 {strides = array<i32>} : memref<24x128xf32, #tpu.memory_space<vmem>>, vector<8x128xf32>,
    %c10_215 = arith.constant 10 : index
    %c0_216 = arith.constant 0 : index
    %598 = vector.load %arg2[%c10_215, %c0_216] : memref<14x128xf32, #tpu.memory_space<vmem>>, vector<1x128xf32>
    %599 = vector.shape_cast %598 : vector<1x128xf32> to vector<1x128xf32>
    %600 = vector.broadcast %599 : vector<1x128xf32> to vector<8x128xf32>
    %c6_217 = arith.constant 6 : index
    %c0_218 = arith.constant 0 : index
    %601 = vector.load %arg15[%c6_217, %c0_218] : memref<24x128xf32, #tpu.memory_space<vmem>>, vector<8x128xf32>
    %c32_i32 = arith.constant 32 : i32
    %602 = tpu.dynamic_rotate %601 by %c32_i32 dim 1 : vector<8x128xf32>, i32 -> vector<8x128xf32>
    %603 = vector.extract_strided_slice %596 {offsets = [0, 0], sizes = [1, 128], strides = [1, 1]} : vector<25x128xf32> to vector<1x128xf32>
    %604 = vector.broadcast %603 : vector<1x128xf32> to vector<8x128xf32>
    %605 = arith.mulf %602, %604 : vector<8x128xf32>
    %606 = arith.addf %600, %605 : vector<8x128xf32>
    %c16_i32_219 = arith.constant 16 : i32
    %607 = tpu.dynamic_rotate %601 by %c16_i32_219 dim 1 : vector<8x128xf32>, i32 -> vector<8x128xf32>
    %608 = vector.extract_strided_slice %596 {offsets = [1, 0], sizes = [1, 128], strides = [1, 1]} : vector<25x128xf32> to vector<1x128xf32>
    %609 = vector.broadcast %608 : vector<1x128xf32> to vector<8x128xf32>
    %610 = arith.mulf %607, %609 : vector<8x128xf32>
    %611 = arith.addf %606, %610 : vector<8x128xf32>
    %612 = vector.extract_strided_slice %596 {offsets = [2, 0], sizes = [1, 128], strides = [1, 1]} : vector<25x128xf32> to vector<1x128xf32>
    %613 = vector.broadcast %612 : vector<1x128xf32> to vector<8x128xf32>
    %614 = arith.mulf %601, %613 : vector<8x128xf32>
    %615 = arith.addf %611, %614 : vector<8x128xf32>
    %c112_i32_220 = arith.constant 112 : i32
    %616 = tpu.dynamic_rotate %601 by %c112_i32_220 dim 1 : vector<8x128xf32>, i32 -> vector<8x128xf32>
    %617 = vector.extract_strided_slice %596 {offsets = [3, 0], sizes = [1, 128], strides = [1, 1]} : vector<25x128xf32> to vector<1x128xf32>
    %618 = vector.broadcast %617 : vector<1x128xf32> to vector<8x128xf32>
    %619 = arith.mulf %616, %618 : vector<8x128xf32>
    %620 = arith.addf %615, %619 : vector<8x128xf32>
    %c96_i32 = arith.constant 96 : i32
    %621 = tpu.dynamic_rotate %601 by %c96_i32 dim 1 : vector<8x128xf32>, i32 -> vector<8x128xf32>
    %622 = vector.extract_strided_slice %596 {offsets = [4, 0], sizes = [1, 128], strides = [1, 1]} : vector<25x128xf32> to vector<1x128xf32>
    %623 = vector.broadcast %622 : vector<1x128xf32> to vector<8x128xf32>
    %624 = arith.mulf %621, %623 : vector<8x128xf32>
    %625 = arith.addf %620, %624 : vector<8x128xf32>
    %c7_221 = arith.constant 7 : index
    %c0_222 = arith.constant 0 : index
    %626 = vector.load %arg15[%c7_221, %c0_222] : memref<24x128xf32, #tpu.memory_space<vmem>>, vector<8x128xf32>
    %c32_i32_223 = arith.constant 32 : i32
    %627 = tpu.dynamic_rotate %626 by %c32_i32_223 dim 1 : vector<8x128xf32>, i32 -> vector<8x128xf32>
    %628 = vector.extract_strided_slice %596 {offsets = [5, 0], sizes = [1, 128], strides = [1, 1]} : vector<25x128xf32> to vector<1x128xf32>
    %629 = vector.broadcast %628 : vector<1x128xf32> to vector<8x128xf32>
    %630 = arith.mulf %627, %629 : vector<8x128xf32>
    %631 = arith.addf %625, %630 : vector<8x128xf32>
    %c16_i32_224 = arith.constant 16 : i32
    %632 = tpu.dynamic_rotate %626 by %c16_i32_224 dim 1 : vector<8x128xf32>, i32 -> vector<8x128xf32>
    %633 = vector.extract_strided_slice %596 {offsets = [6, 0], sizes = [1, 128], strides = [1, 1]} : vector<25x128xf32> to vector<1x128xf32>
    %634 = vector.broadcast %633 : vector<1x128xf32> to vector<8x128xf32>
    %635 = arith.mulf %632, %634 : vector<8x128xf32>
    %636 = arith.addf %631, %635 : vector<8x128xf32>
    %637 = vector.extract_strided_slice %596 {offsets = [7, 0], sizes = [1, 128], strides = [1, 1]} : vector<25x128xf32> to vector<1x128xf32>
    %638 = vector.broadcast %637 : vector<1x128xf32> to vector<8x128xf32>
    %639 = arith.mulf %626, %638 : vector<8x128xf32>
    %640 = arith.addf %636, %639 : vector<8x128xf32>
    %c112_i32_225 = arith.constant 112 : i32
    %641 = tpu.dynamic_rotate %626 by %c112_i32_225 dim 1 : vector<8x128xf32>, i32 -> vector<8x128xf32>
    %642 = vector.extract_strided_slice %596 {offsets = [8, 0], sizes = [1, 128], strides = [1, 1]} : vector<25x128xf32> to vector<1x128xf32>
    %643 = vector.broadcast %642 : vector<1x128xf32> to vector<8x128xf32>
    %644 = arith.mulf %641, %643 : vector<8x128xf32>
    %645 = arith.addf %640, %644 : vector<8x128xf32>
    %c96_i32_226 = arith.constant 96 : i32
    %646 = tpu.dynamic_rotate %626 by %c96_i32_226 dim 1 : vector<8x128xf32>, i32 -> vector<8x128xf32>
    %647 = vector.extract_strided_slice %596 {offsets = [9, 0], sizes = [1, 128], strides = [1, 1]} : vector<25x128xf32> to vector<1x128xf32>
    %648 = vector.broadcast %647 : vector<1x128xf32> to vector<8x128xf32>
    %649 = arith.mulf %646, %648 : vector<8x128xf32>
    %650 = arith.addf %645, %649 : vector<8x128xf32>
    %c8_227 = arith.constant 8 : index
    %c0_228 = arith.constant 0 : index
    %651 = vector.load %arg15[%c8_227, %c0_228] : memref<24x128xf32, #tpu.memory_space<vmem>>, vector<8x128xf32>
    %c32_i32_229 = arith.constant 32 : i32
    %652 = tpu.dynamic_rotate %651 by %c32_i32_229 dim 1 : vector<8x128xf32>, i32 -> vector<8x128xf32>
    %653 = vector.extract_strided_slice %596 {offsets = [10, 0], sizes = [1, 128], strides = [1, 1]} : vector<25x128xf32> to vector<1x128xf32>
    %654 = vector.broadcast %653 : vector<1x128xf32> to vector<8x128xf32>
    %655 = arith.mulf %652, %654 : vector<8x128xf32>
    %656 = arith.addf %650, %655 : vector<8x128xf32>
    %c16_i32_230 = arith.constant 16 : i32
    %657 = tpu.dynamic_rotate %651 by %c16_i32_230 dim 1 : vector<8x128xf32>, i32 -> vector<8x128xf32>
    %658 = vector.extract_strided_slice %596 {offsets = [11, 0], sizes = [1, 128], strides = [1, 1]} : vector<25x128xf32> to vector<1x128xf32>
    %659 = vector.broadcast %658 : vector<1x128xf32> to vector<8x128xf32>
    %660 = arith.mulf %657, %659 : vector<8x128xf32>
    %661 = arith.addf %656, %660 : vector<8x128xf32>
    %662 = vector.extract_strided_slice %596 {offsets = [12, 0], sizes = [1, 128], strides = [1, 1]} : vector<25x128xf32> to vector<1x128xf32>
    %663 = vector.broadcast %662 : vector<1x128xf32> to vector<8x128xf32>
    %664 = arith.mulf %651, %663 : vector<8x128xf32>
    %665 = arith.addf %661, %664 : vector<8x128xf32>
    %c112_i32_231 = arith.constant 112 : i32
    %666 = tpu.dynamic_rotate %651 by %c112_i32_231 dim 1 : vector<8x128xf32>, i32 -> vector<8x128xf32>
    %667 = vector.extract_strided_slice %596 {offsets = [13, 0], sizes = [1, 128], strides = [1, 1]} : vector<25x128xf32> to vector<1x128xf32>
    %668 = vector.broadcast %667 : vector<1x128xf32> to vector<8x128xf32>
    %669 = arith.mulf %666, %668 : vector<8x128xf32>
    %670 = arith.addf %665, %669 : vector<8x128xf32>
    %c96_i32_232 = arith.constant 96 : i32
    %671 = tpu.dynamic_rotate %651 by %c96_i32_232 dim 1 : vector<8x128xf32>, i32 -> vector<8x128xf32>
    %672 = vector.extract_strided_slice %596 {offsets = [14, 0], sizes = [1, 128], strides = [1, 1]} : vector<25x128xf32> to vector<1x128xf32>
    %673 = vector.broadcast %672 : vector<1x128xf32> to vector<8x128xf32>
    %674 = arith.mulf %671, %673 : vector<8x128xf32>
    %675 = arith.addf %670, %674 : vector<8x128xf32>
    %c9_233 = arith.constant 9 : index
    %c0_234 = arith.constant 0 : index
    %676 = vector.load %arg15[%c9_233, %c0_234] : memref<24x128xf32, #tpu.memory_space<vmem>>, vector<8x128xf32>
    %c32_i32_235 = arith.constant 32 : i32
    %677 = tpu.dynamic_rotate %676 by %c32_i32_235 dim 1 : vector<8x128xf32>, i32 -> vector<8x128xf32>
    %678 = vector.extract_strided_slice %596 {offsets = [15, 0], sizes = [1, 128], strides = [1, 1]} : vector<25x128xf32> to vector<1x128xf32>
    %679 = vector.broadcast %678 : vector<1x128xf32> to vector<8x128xf32>
    %680 = arith.mulf %677, %679 : vector<8x128xf32>
    %681 = arith.addf %675, %680 : vector<8x128xf32>
    %c16_i32_236 = arith.constant 16 : i32
    %682 = tpu.dynamic_rotate %676 by %c16_i32_236 dim 1 : vector<8x128xf32>, i32 -> vector<8x128xf32>
    %683 = vector.extract_strided_slice %596 {offsets = [16, 0], sizes = [1, 128], strides = [1, 1]} : vector<25x128xf32> to vector<1x128xf32>
    %684 = vector.broadcast %683 : vector<1x128xf32> to vector<8x128xf32>
    %685 = arith.mulf %682, %684 : vector<8x128xf32>
    %686 = arith.addf %681, %685 : vector<8x128xf32>
    %687 = vector.extract_strided_slice %596 {offsets = [17, 0], sizes = [1, 128], strides = [1, 1]} : vector<25x128xf32> to vector<1x128xf32>
    %688 = vector.broadcast %687 : vector<1x128xf32> to vector<8x128xf32>
    %689 = arith.mulf %676, %688 : vector<8x128xf32>
    %690 = arith.addf %686, %689 : vector<8x128xf32>
    %c112_i32_237 = arith.constant 112 : i32
    %691 = tpu.dynamic_rotate %676 by %c112_i32_237 dim 1 : vector<8x128xf32>, i32 -> vector<8x128xf32>
    %692 = vector.extract_strided_slice %596 {offsets = [18, 0], sizes = [1, 128], strides = [1, 1]} : vector<25x128xf32> to vector<1x128xf32>
    %693 = vector.broadcast %692 : vector<1x128xf32> to vector<8x128xf32>
    %694 = arith.mulf %691, %693 : vector<8x128xf32>
    %695 = arith.addf %690, %694 : vector<8x128xf32>
    %c96_i32_238 = arith.constant 96 : i32
    %696 = tpu.dynamic_rotate %676 by %c96_i32_238 dim 1 : vector<8x128xf32>, i32 -> vector<8x128xf32>
    %697 = vector.extract_strided_slice %596 {offsets = [19, 0], sizes = [1, 128], strides = [1, 1]} : vector<25x128xf32> to vector<1x128xf32>
    %698 = vector.broadcast %697 : vector<1x128xf32> to vector<8x128xf32>
    %699 = arith.mulf %696, %698 : vector<8x128xf32>
    %700 = arith.addf %695, %699 : vector<8x128xf32>
    %c10_239 = arith.constant 10 : index
    %c0_240 = arith.constant 0 : index
    %701 = vector.load %arg15[%c10_239, %c0_240] : memref<24x128xf32, #tpu.memory_space<vmem>>, vector<8x128xf32>
    %c32_i32_241 = arith.constant 32 : i32
    %702 = tpu.dynamic_rotate %701 by %c32_i32_241 dim 1 : vector<8x128xf32>, i32 -> vector<8x128xf32>
    %703 = vector.extract_strided_slice %596 {offsets = [20, 0], sizes = [1, 128], strides = [1, 1]} : vector<25x128xf32> to vector<1x128xf32>
    %704 = vector.broadcast %703 : vector<1x128xf32> to vector<8x128xf32>
    %705 = arith.mulf %702, %704 : vector<8x128xf32>
    %706 = arith.addf %700, %705 : vector<8x128xf32>
    %c16_i32_242 = arith.constant 16 : i32
    %707 = tpu.dynamic_rotate %701 by %c16_i32_242 dim 1 : vector<8x128xf32>, i32 -> vector<8x128xf32>
    %708 = vector.extract_strided_slice %596 {offsets = [21, 0], sizes = [1, 128], strides = [1, 1]} : vector<25x128xf32> to vector<1x128xf32>
    %709 = vector.broadcast %708 : vector<1x128xf32> to vector<8x128xf32>
    %710 = arith.mulf %707, %709 : vector<8x128xf32>
    %711 = arith.addf %706, %710 : vector<8x128xf32>
    %712 = vector.extract_strided_slice %596 {offsets = [22, 0], sizes = [1, 128], strides = [1, 1]} : vector<25x128xf32> to vector<1x128xf32>
    %713 = vector.broadcast %712 : vector<1x128xf32> to vector<8x128xf32>
    %714 = arith.mulf %701, %713 : vector<8x128xf32>
    %715 = arith.addf %711, %714 : vector<8x128xf32>
    %c112_i32_243 = arith.constant 112 : i32
    %716 = tpu.dynamic_rotate %701 by %c112_i32_243 dim 1 : vector<8x128xf32>, i32 -> vector<8x128xf32>
    %717 = vector.extract_strided_slice %596 {offsets = [23, 0], sizes = [1, 128], strides = [1, 1]} : vector<25x128xf32> to vector<1x128xf32>
    %718 = vector.broadcast %717 : vector<1x128xf32> to vector<8x128xf32>
    %719 = arith.mulf %716, %718 : vector<8x128xf32>
    %720 = arith.addf %715, %719 : vector<8x128xf32>
    %c96_i32_244 = arith.constant 96 : i32
    %721 = tpu.dynamic_rotate %701 by %c96_i32_244 dim 1 : vector<8x128xf32>, i32 -> vector<8x128xf32>
    %722 = vector.extract_strided_slice %596 {offsets = [24, 0], sizes = [1, 128], strides = [1, 1]} : vector<25x128xf32> to vector<1x128xf32>
    %723 = vector.broadcast %722 : vector<1x128xf32> to vector<8x128xf32>
    %724 = arith.mulf %721, %723 : vector<8x128xf32>
    %725 = arith.addf %720, %724 : vector<8x128xf32>
    %c110 = arith.constant 110 : index
    %c0_245 = arith.constant 0 : index
    %726 = vector.load %arg4[%c110, %c0_245] : memref<119x128xf32, #tpu.memory_space<vmem>>, vector<9x128xf32>
    %c8_246 = arith.constant 8 : index
    %c0_247 = arith.constant 0 : index
    %727 = vector.load %arg15[%c8_246, %c0_247] : memref<24x128xf32, #tpu.memory_space<vmem>>, vector<8x128xf32>
    tpu.vector_store %arg15[%c8_246, %c0_247], %595 {strides = array<i32>} : memref<24x128xf32, #tpu.memory_space<vmem>>, vector<8x128xf32>,
    %c11_248 = arith.constant 11 : index
    %c0_249 = arith.constant 0 : index
    %728 = vector.load %arg2[%c11_248, %c0_249] : memref<14x128xf32, #tpu.memory_space<vmem>>, vector<1x128xf32>
    %729 = vector.shape_cast %728 : vector<1x128xf32> to vector<1x128xf32>
    %730 = vector.broadcast %729 : vector<1x128xf32> to vector<8x128xf32>
    %c7_250 = arith.constant 7 : index
    %c0_251 = arith.constant 0 : index
    %731 = vector.load %arg15[%c7_250, %c0_251] : memref<24x128xf32, #tpu.memory_space<vmem>>, vector<8x128xf32>
    %c16_i32_252 = arith.constant 16 : i32
    %732 = tpu.dynamic_rotate %731 by %c16_i32_252 dim 1 : vector<8x128xf32>, i32 -> vector<8x128xf32>
    %733 = vector.extract_strided_slice %726 {offsets = [0, 0], sizes = [1, 128], strides = [1, 1]} : vector<9x128xf32> to vector<1x128xf32>
    %734 = vector.broadcast %733 : vector<1x128xf32> to vector<8x128xf32>
    %735 = arith.mulf %732, %734 : vector<8x128xf32>
    %736 = arith.addf %730, %735 : vector<8x128xf32>
    %737 = vector.extract_strided_slice %726 {offsets = [1, 0], sizes = [1, 128], strides = [1, 1]} : vector<9x128xf32> to vector<1x128xf32>
    %738 = vector.broadcast %737 : vector<1x128xf32> to vector<8x128xf32>
    %739 = arith.mulf %731, %738 : vector<8x128xf32>
    %740 = arith.addf %736, %739 : vector<8x128xf32>
    %c112_i32_253 = arith.constant 112 : i32
    %741 = tpu.dynamic_rotate %731 by %c112_i32_253 dim 1 : vector<8x128xf32>, i32 -> vector<8x128xf32>
    %742 = vector.extract_strided_slice %726 {offsets = [2, 0], sizes = [1, 128], strides = [1, 1]} : vector<9x128xf32> to vector<1x128xf32>
    %743 = vector.broadcast %742 : vector<1x128xf32> to vector<8x128xf32>
    %744 = arith.mulf %741, %743 : vector<8x128xf32>
    %745 = arith.addf %740, %744 : vector<8x128xf32>
    %c8_254 = arith.constant 8 : index
    %c0_255 = arith.constant 0 : index
    %746 = vector.load %arg15[%c8_254, %c0_255] : memref<24x128xf32, #tpu.memory_space<vmem>>, vector<8x128xf32>
    %c16_i32_256 = arith.constant 16 : i32
    %747 = tpu.dynamic_rotate %746 by %c16_i32_256 dim 1 : vector<8x128xf32>, i32 -> vector<8x128xf32>
    %748 = vector.extract_strided_slice %726 {offsets = [3, 0], sizes = [1, 128], strides = [1, 1]} : vector<9x128xf32> to vector<1x128xf32>
    %749 = vector.broadcast %748 : vector<1x128xf32> to vector<8x128xf32>
    %750 = arith.mulf %747, %749 : vector<8x128xf32>
    %751 = arith.addf %745, %750 : vector<8x128xf32>
    %752 = vector.extract_strided_slice %726 {offsets = [4, 0], sizes = [1, 128], strides = [1, 1]} : vector<9x128xf32> to vector<1x128xf32>
    %753 = vector.broadcast %752 : vector<1x128xf32> to vector<8x128xf32>
    %754 = arith.mulf %746, %753 : vector<8x128xf32>
    %755 = arith.addf %751, %754 : vector<8x128xf32>
    %c112_i32_257 = arith.constant 112 : i32
    %756 = tpu.dynamic_rotate %746 by %c112_i32_257 dim 1 : vector<8x128xf32>, i32 -> vector<8x128xf32>
    %757 = vector.extract_strided_slice %726 {offsets = [5, 0], sizes = [1, 128], strides = [1, 1]} : vector<9x128xf32> to vector<1x128xf32>
    %758 = vector.broadcast %757 : vector<1x128xf32> to vector<8x128xf32>
    %759 = arith.mulf %756, %758 : vector<8x128xf32>
    %760 = arith.addf %755, %759 : vector<8x128xf32>
    %c9_258 = arith.constant 9 : index
    %c0_259 = arith.constant 0 : index
    %761 = vector.load %arg15[%c9_258, %c0_259] : memref<24x128xf32, #tpu.memory_space<vmem>>, vector<8x128xf32>
    %c16_i32_260 = arith.constant 16 : i32
    %762 = tpu.dynamic_rotate %761 by %c16_i32_260 dim 1 : vector<8x128xf32>, i32 -> vector<8x128xf32>
    %763 = vector.extract_strided_slice %726 {offsets = [6, 0], sizes = [1, 128], strides = [1, 1]} : vector<9x128xf32> to vector<1x128xf32>
    %764 = vector.broadcast %763 : vector<1x128xf32> to vector<8x128xf32>
    %765 = arith.mulf %762, %764 : vector<8x128xf32>
    %766 = arith.addf %760, %765 : vector<8x128xf32>
    %767 = vector.extract_strided_slice %726 {offsets = [7, 0], sizes = [1, 128], strides = [1, 1]} : vector<9x128xf32> to vector<1x128xf32>
    %768 = vector.broadcast %767 : vector<1x128xf32> to vector<8x128xf32>
    %769 = arith.mulf %761, %768 : vector<8x128xf32>
    %770 = arith.addf %766, %769 : vector<8x128xf32>
    %c112_i32_261 = arith.constant 112 : i32
    %771 = tpu.dynamic_rotate %761 by %c112_i32_261 dim 1 : vector<8x128xf32>, i32 -> vector<8x128xf32>
    %772 = vector.extract_strided_slice %726 {offsets = [8, 0], sizes = [1, 128], strides = [1, 1]} : vector<9x128xf32> to vector<1x128xf32>
    %773 = vector.broadcast %772 : vector<1x128xf32> to vector<8x128xf32>
    %774 = arith.mulf %771, %773 : vector<8x128xf32>
    %775 = arith.addf %770, %774 : vector<8x128xf32>
    %776 = arith.addf %775, %725 : vector<8x128xf32>
    %cst_262 = arith.constant 0.000000e+00 : f32
    %777 = vector.broadcast %cst_262 : f32 to vector<8x128xf32>
    %778 = arith.maximumf %776, %777 : vector<8x128xf32>
    %c4_263 = arith.constant 4 : index
    %c0_264 = arith.constant 0 : index
    %c0_265 = arith.constant 0 : index
    %779 = vector.load %arg6[%c4_263, %c0_264, %c0_265] : memref<5x128x128xf32, #tpu.memory_space<vmem>>, vector<1x128x128xf32>
    %780 = vector.shape_cast %779 : vector<1x128x128xf32> to vector<128x128xf32>
    %cst_266 = arith.constant dense<0.000000e+00> : vector<8x128xf32>
    %781 = tpu.matmul %778, %780, %cst_266 {dimension_numbers = #tpu.dot_dimension_numbers<[1], [0], [0], [1], [0, 0, 1, 1], [], []>} : vector<8x128xf32>, vector<128x128xf32>, vector<8x128xf32> -> vector<8x128xf32>
    %c12 = arith.constant 12 : index
    %c0_267 = arith.constant 0 : index
    %782 = vector.load %arg2[%c12, %c0_267] : memref<14x128xf32, #tpu.memory_space<vmem>>, vector<1x128xf32>
    %783 = vector.broadcast %782 : vector<1x128xf32> to vector<8x128xf32>
    %784 = arith.addf %781, %783 : vector<8x128xf32>
    %785 = arith.addf %784, %587 : vector<8x128xf32>
    %c2_268 = arith.constant 2 : index
    %c0_269 = arith.constant 0 : index
    %c0_270 = arith.constant 0 : index
    %786 = vector.load %arg7[%c2_268, %c0_269, %c0_270] : memref<3x128x256xf32, #tpu.memory_space<vmem>>, vector<1x128x256xf32>
    %787 = vector.shape_cast %786 : vector<1x128x256xf32> to vector<128x256xf32>
    %cst_271 = arith.constant dense<0.000000e+00> : vector<8x256xf32>
    %788 = tpu.matmul %785, %787, %cst_271 {dimension_numbers = #tpu.dot_dimension_numbers<[1], [0], [0], [1], [0, 0, 1, 1], [], []>} : vector<8x128xf32>, vector<128x256xf32>, vector<8x256xf32> -> vector<8x256xf32>
    %c3_272 = arith.constant 3 : index
    %c0_273 = arith.constant 0 : index
    %789 = vector.load %arg3[%c3_272, %c0_273] : memref<4x256xf32, #tpu.memory_space<vmem>>, vector<1x256xf32>
    %790 = vector.broadcast %789 : vector<1x256xf32> to vector<8x256xf32>
    %791 = arith.addf %788, %790 : vector<8x256xf32>
    %792 = arith.mulf %791, %791 : vector<8x256xf32>
    %793 = arith.mulf %791, %792 : vector<8x256xf32>
    %cst_274 = arith.constant 4.471500e-02 : f32
    %794 = vector.broadcast %cst_274 : f32 to vector<8x256xf32>
    %795 = arith.mulf %794, %793 : vector<8x256xf32>
    %796 = arith.addf %791, %795 : vector<8x256xf32>
    %cst_275 = arith.constant 0.797884583 : f32
    %797 = vector.broadcast %cst_275 : f32 to vector<8x256xf32>
    %798 = arith.mulf %797, %796 : vector<8x256xf32>
    %799 = math.tanh %798 : vector<8x256xf32>
    %cst_276 = arith.constant 1.000000e+00 : f32
    %800 = vector.broadcast %cst_276 : f32 to vector<8x256xf32>
    %801 = arith.addf %800, %799 : vector<8x256xf32>
    %cst_277 = arith.constant 5.000000e-01 : f32
    %802 = vector.broadcast %cst_277 : f32 to vector<8x256xf32>
    %803 = arith.mulf %802, %801 : vector<8x256xf32>
    %804 = arith.mulf %791, %803 : vector<8x256xf32>
    %c1_278 = arith.constant 1 : index
    %c0_279 = arith.constant 0 : index
    %c0_280 = arith.constant 0 : index
    %805 = vector.load %arg8[%c1_278, %c0_279, %c0_280] : memref<2x256x128xf32, #tpu.memory_space<vmem>>, vector<1x256x128xf32>
    %806 = vector.shape_cast %805 : vector<1x256x128xf32> to vector<256x128xf32>
    %cst_281 = arith.constant dense<0.000000e+00> : vector<8x128xf32>
    %807 = tpu.matmul %804, %806, %cst_281 {dimension_numbers = #tpu.dot_dimension_numbers<[1], [0], [0], [1], [0, 0, 1, 1], [], []>} : vector<8x256xf32>, vector<256x128xf32>, vector<8x128xf32> -> vector<8x128xf32>
    %c13 = arith.constant 13 : index
    %c0_282 = arith.constant 0 : index
    %808 = vector.load %arg2[%c13, %c0_282] : memref<14x128xf32, #tpu.memory_space<vmem>>, vector<1x128xf32>
    %809 = vector.broadcast %808 : vector<1x128xf32> to vector<8x128xf32>
    %810 = arith.addf %807, %809 : vector<8x128xf32>
    %811 = arith.addf %810, %785 : vector<8x128xf32>
    %c0_283 = arith.constant 0 : index
    %c0_284 = arith.constant 0 : index
    %c0_285 = arith.constant 0 : index
    %812 = vector.load %arg12[%c0_283, %c0_284, %c0_285] : memref<1x8x128xf32, #tpu.memory_space<vmem>>, vector<1x8x128xf32>
    %813 = vector.shape_cast %812 : vector<1x8x128xf32> to vector<8x128xf32>
    %814 = vector.shape_cast %811 : vector<8x128xf32> to vector<1x8x128xf32>
    tpu.vector_store %arg12[%c0_283, %c0_284, %c0_285], %814 {strides = array<i32>} : memref<1x8x128xf32, #tpu.memory_space<vmem>>, vector<1x8x128xf32>,
    return
  }
  func.func @transform_0(%arg0: i32) -> (i32, i32, i32) {
    %c0_i32 = arith.constant 0 : i32
    %c0_i32_0 = arith.constant 0 : i32
    %c0_i32_1 = arith.constant 0 : i32
    return %arg0, %c0_i32, %c0_i32_0 : i32, i32, i32
  }
  func.func @transform_1(%arg0: i32) -> (i32, i32) {
    %c0_i32 = arith.constant 0 : i32
    %c0_i32_0 = arith.constant 0 : i32
    %c0_i32_1 = arith.constant 0 : i32
    return %c0_i32, %c0_i32_0 : i32, i32
  }
  func.func @transform_2(%arg0: i32) -> (i32, i32) {
    %c0_i32 = arith.constant 0 : i32
    %c0_i32_0 = arith.constant 0 : i32
    %c0_i32_1 = arith.constant 0 : i32
    return %c0_i32, %c0_i32_0 : i32, i32
  }
  func.func @transform_3(%arg0: i32) -> (i32, i32) {
    %c0_i32 = arith.constant 0 : i32
    %c0_i32_0 = arith.constant 0 : i32
    %c0_i32_1 = arith.constant 0 : i32
    return %c0_i32, %c0_i32_0 : i32, i32
  }
  func.func @transform_4(%arg0: i32) -> (i32, i32) {
    %c0_i32 = arith.constant 0 : i32
    %c0_i32_0 = arith.constant 0 : i32
    %c0_i32_1 = arith.constant 0 : i32
    return %c0_i32, %c0_i32_0 : i32, i32
  }
  func.func @transform_5(%arg0: i32) -> (i32, i32, i32) {
    %c0_i32 = arith.constant 0 : i32
    %c0_i32_0 = arith.constant 0 : i32
    %c0_i32_1 = arith.constant 0 : i32
    %c0_i32_2 = arith.constant 0 : i32
    return %c0_i32, %c0_i32_0, %c0_i32_1 : i32, i32, i32
  }
  func.func @transform_6(%arg0: i32) -> (i32, i32, i32) {
    %c0_i32 = arith.constant 0 : i32
    %c0_i32_0 = arith.constant 0 : i32
    %c0_i32_1 = arith.constant 0 : i32
    %c0_i32_2 = arith.constant 0 : i32
    return %c0_i32, %c0_i32_0, %c0_i32_1 : i32, i32, i32
  }
  func.func @transform_7(%arg0: i32) -> (i32, i32, i32) {
    %c0_i32 = arith.constant 0 : i32
    %c0_i32_0 = arith.constant 0 : i32
    %c0_i32_1 = arith.constant 0 : i32
    %c0_i32_2 = arith.constant 0 : i32
    return %c0_i32, %c0_i32_0, %c0_i32_1 : i32, i32, i32
  }
  func.func @transform_8(%arg0: i32) -> (i32, i32) {
    %c0_i32 = arith.constant 0 : i32
    %c0_i32_0 = arith.constant 0 : i32
    %c0_i32_1 = arith.constant 0 : i32
    return %c0_i32, %c0_i32_0 : i32, i32
  }
  func.func @transform_9(%arg0: i32) -> (i32, i32) {
    %c0_i32 = arith.constant 0 : i32
    %c0_i32_0 = arith.constant 0 : i32
    %c0_i32_1 = arith.constant 0 : i32
    return %c0_i32, %c0_i32_0 : i32, i32
  }
  func.func @transform_10(%arg0: i32) -> (i32, i32) {
    %c0_i32 = arith.constant 0 : i32
    %c0_i32_0 = arith.constant 0 : i32
    %c0_i32_1 = arith.constant 0 : i32
    return %c0_i32, %c0_i32_0 : i32, i32
  }
  func.func @transform_11(%arg0: i32) -> (i32, i32, i32) {
    %c0_i32 = arith.constant 0 : i32
    %c0_i32_0 = arith.constant 0 : i32
    %c0_i32_1 = arith.constant 0 : i32
    return %arg0, %c0_i32, %c0_i32_0 : i32, i32, i32
  }
}

</mosaic_0001>

<bundles_post_ra>
// kernel: apply.1
= control target key start
LH: loop header
LB: loop body
LE: loop exit
PB: predicated region body
PF: predicated region fallthrough
CT: control target
= control target key end

     0   :  { %s6440_s0 = inlined_call_operand.hbm [shape: f32[2,16,16], index: 0, kind: input, shape index: {}]   ;;  %s6441_s1 = inlined_call_operand.hbm [shape: f32[14,128], index: 1, kind: input, shape index: {}]   ;;  %s6442_s2 = inlined_call_operand.hbm [shape: f32[4,256], index: 2, kind: input, shape index: {}]   ;;  %s6443_s3 = inlined_call_operand.hbm [shape: f32[119,128], index: 3, kind: input, shape index: {}]   ;;  %s6444_s4 = inlined_call_operand.hbm [shape: f32[9,256], index: 4, kind: input, shape index: {}]   ;;  %s6445_s5 = inlined_call_operand.hbm [shape: f32[5,128,128], index: 5, kind: input, shape index: {}]   ;;  %s6446_s6 = inlined_call_operand.hbm [shape: f32[3,128,256], index: 6, kind: input, shape index: {}]   ;;  %s6447_s7 = inlined_call_operand.hbm [shape: f32[2,256,128], index: 7, kind: input, shape index: {}]   ;;  %s6448_s8 = inlined_call_operand.vmem [shape: f32[16,128], index: 8, kind: input, shape index: {}]   ;;  %s6449_s9 = inlined_call_operand.vmem [shape: f32[8,16], index: 9, kind: input, shape index: {}]   ;;  %s6450_s10 = inlined_call_operand.hbm [shape: f32[256,128], index: 10, kind: input, shape index: {}]   ;;  %s6451_s11 = inlined_call_operand.vmem [shape: f32[2,8,128], index: 11, kind: output, shape index: {}]  }
   0x1   :  { %6471 = sst [smem:[#allocation48_spill]] %s6441_s1 }
   0x2   :  { %6472 = sst [smem:[#allocation49_spill]] %s6448_s8 }
   0x3   :  { %6473 = sst [smem:[#allocation50_spill]] %s6449_s9 }
   0x4   :  { %6474 = sst [smem:[#allocation51_spill]] %s6451_s11 }
   0x5   :  { %16 = vsyncpa [#allocation6], 0 }
   0x6   :  { %18 = vsyncpa [#allocation6 + $0x1], 0 }
   0x7   :  { %19 = vsyncpa [#allocation8], 0 }
   0x8   :  { %20 = vsyncpa [#allocation11], 0 }
   0x9   :  { %21 = vsyncpa [#allocation14], 0 }
   0xa   :  { %22 = vsyncpa [#allocation17], 0  ;;  %s5048_s17 = smov 0   ;;  %s5050_s18 = smov 0  }
   0xb   :  { %s5052_s19 = smov 0   ;;  %s5054_s20 = smov 0  }
   0xc LB: > { %s4964_s21 = smov [#allocation7]   ;;  %s5069_s23 = sadd.s32 4294967295, %s4962_s20   ;;  %s4962_s20 = sphi %s5054_s20, %s6549_s20   ;;  %s4958_s19 = sphi %s5052_s19, %s6548_s19   ;;  %s4954_s18 = sphi %s5050_s18, %s6547_s18   ;;  %s4950_s17 = sphi %s5048_s17, %s6546_s17  }
   0xd   : > { %s307_s22 = sshll.u32 %s4964_s21, 4  ;;  %p3728_p0 = scmp.ge.s32.totalorder %s4962_s20, 1  ;;  %s5074_s22 = int_to_ptr.vmem [resolvable:$true] %s307_s22 }
   0xe   : > { %p6453_p1 = scmp.eq.s32.totalorder %s5069_s23, 0  ;;  %p295_p2 = scmp.lt.s32.totalorder %s4962_s20, 3 }
   0xf   : > { %s4965_s25 = smov [#allocation10]   ;;  %s4966_s28 = smov [#allocation13]  }
  0x10   : > { %p5076_p3 = pnand %p3728_p0, %p295_p2  ;;  %s331_s26 = sshll.u32 %s4965_s25, 4  ;;  %s5088_s26 = int_to_ptr.vmem [resolvable:$true] %s331_s26 }
  0x11   : > { %s357_s29 = sshll.u32 %s4966_s28, 4  ;;  %s6477_s1 = sld [smem:[#allocation48_spill]]  ;;  %s5090_s29 = int_to_ptr.vmem [resolvable:$true] %s357_s29 }
  0x12   : > { %s6475_s24 = scalar_select %p5076_p3, 1, 0 }
  0x13   : > { %p4541_p4 = pneg %p5076_p3 }
  0x15   : > { %p5084_p5 = pnand %p4541_p4, %p6453_p1 }
  0x17   : > { %s4658_s13 = scalar_lea.hbm %s6477_s1, 256  ;;  %p5100_p7 = pneg %p5084_p5 }
  0x18   : > { %p4659_p6 = scmp.ne.s32.totalorder %s6477_s1, %s4658_s13  ;;  %p4665_p10 = scmp.lt.u32.totalorder %s4658_s13, %s6477_s1 }
  0x1a   : > { %p4661_p8 = pnand %p5100_p7, %p4659_p6 }
  0x1c   : > { %p4662_p9 = pneg %p4661_p8 }
  0x1e   : > { %p4667_p11 = pnand %p4665_p10, %p4662_p9 }
  0x20   : > { %4670 = shalt.err (!%p4667_p11)
}
  0x21   : > { %s4671_s28 = scalar_lea.vmem %s5074_s22, 256  ;;  %p4679_p2 = scmp.lt.s32.totalorder %s5074_s22, %s5074_s22 }
  0x22   : > { %p4672_p12 = scmp.ne.s32.totalorder %s5074_s22, %s4671_s28  ;;  %p4680_p4 = scmp.lt.s32.totalorder %s4671_s28, %s4671_s28 }
  0x24   : > { %p4674_p13 = pnand %p4672_p12, %p5100_p7  ;;  %p4681_p6 = por %p4680_p4, %p4679_p2 }
  0x26   : > { %p4675_p0 = pneg %p4674_p13 }
  0x28   : > { %p4682_p8 = pnand %p4681_p6, %p4675_p0 }
  0x2a   : > { %4685 = shalt.err (!%p4682_p8)
}
  0x2b   : > { %s6455_s30 = smov 128   ;;  %s4968_s12 = smov 8  }
  0x2c   : > { %4544 = dma.hbm_to_vmem [thread:$0]  (!%p5084_p5), %s6477_s1, 256, %s5074_s22, [#allocation8], %s6455_s30, %s6455_s30, %s4968_s12  }
  0x2d   : > { %s4686_s25 = scalar_lea.hbm %s6443_s3, 1920 }
  0x2e   : > { %p4687_p9 = scmp.ne.s32.totalorder %s6443_s3, %s4686_s25  ;;  %p4693_p12 = scmp.lt.u32.totalorder %s4686_s25, %s6443_s3 }
  0x30   : > { %p4689_p10 = pnand %p4687_p9, %p5100_p7 }
  0x32   : > { %p4690_p11 = pneg %p4689_p10 }
  0x34   : > { %p4695_p13 = pnand %p4693_p12, %p4690_p11 }
  0x36   : > { %4698 = shalt.err (!%p4695_p13)
}
  0x37   : > { %s4699_s22 = scalar_lea.vmem %s5088_s26, 1920  ;;  %p4707_p6 = scmp.lt.s32.totalorder %s5088_s26, %s5088_s26 }
  0x38   : > { %p4700_p0 = scmp.ne.s32.totalorder %s5088_s26, %s4699_s22  ;;  %p4708_p8 = scmp.lt.s32.totalorder %s4699_s22, %s4699_s22 }
  0x3a   : > { %p4702_p2 = pnand %p4700_p0, %p5100_p7  ;;  %p4709_p9 = por %p4708_p8, %p4707_p6 }
  0x3c   : > { %p4703_p4 = pneg %p4702_p2 }
  0x3e   : > { %p4710_p10 = pnand %p4709_p9, %p4703_p4 }
  0x40   : > { %4713 = shalt.err (!%p4710_p10)
}
  0x41   : > { %4550 = dma.hbm_to_vmem [thread:$0]  (!%p5084_p5), %s6443_s3, 1920, %s5088_s26, [#allocation11], %s6455_s30, %s6455_s30, %s4968_s12  }
  0x42   : > { %s4714_s14 = scalar_lea.hbm %s6445_s5, 10240 }
  0x43   : > { %p4715_p11 = scmp.ne.s32.totalorder %s6445_s5, %s4714_s14  ;;  %p4721_p0 = scmp.lt.u32.totalorder %s4714_s14, %s6445_s5 }
  0x45   : > { %p4717_p12 = pnand %p4715_p11, %p5100_p7 }
  0x47   : > { %p4718_p13 = pneg %p4717_p12 }
  0x49   : > { %p4723_p2 = pnand %p4721_p0, %p4718_p13 }
  0x4b   : > { %4726 = shalt.err (!%p4723_p2)
}
  0x4c   : > { %s4727_s26 = scalar_lea.vmem %s5090_s29, 10240  ;;  %p4735_p9 = scmp.lt.s32.totalorder %s5090_s29, %s5090_s29 }
  0x4d   : > { %p4728_p4 = scmp.ne.s32.totalorder %s5090_s29, %s4727_s26  ;;  %p4736_p10 = scmp.lt.s32.totalorder %s4727_s26, %s4727_s26 }
  0x4f   : > { %p4730_p6 = pnand %p4728_p4, %p5100_p7  ;;  %p4737_p11 = por %p4736_p10, %p4735_p9 }
  0x51   : > { %p4731_p8 = pneg %p4730_p6 }
  0x53   : > { %p4738_p12 = pnand %p4737_p11, %p4731_p8 }
  0x55   : > { %4741 = shalt.err (!%p4738_p12)
}
  0x56   : > { %4556 = dma.hbm_to_vmem [thread:$0]  (!%p5084_p5), %s6445_s5, 10240, %s5090_s29, [#allocation14], %s6455_s30, %s6455_s30, %s4968_s12  }
  0x57   : > { %s4969_s9 = smov [#allocation16]   ;;  %s4970_s13 = smov [#allocation9]  }
  0x58   : > { %s383_s11 = sshll.u32 %s4969_s9, 4  ;;  %s321_s14 = sshll.u32 %s4970_s13, 4  ;;  %s384_s11 = int_to_ptr.vmem [resolvable:$true] %s383_s11  ;;  %s322_s14 = int_to_ptr.vmem [resolvable:$true] %s321_s14 }
  0x59   : > { %s4742_s25 = scalar_lea.hbm %s6447_s7, 8192 }
  0x5a   : > { %p4743_p13 = scmp.ne.s32.totalorder %s6447_s7, %s4742_s25  ;;  %p4749_p4 = scmp.lt.u32.totalorder %s4742_s25, %s6447_s7 }
  0x5c   : > { %p4745_p0 = pnand %p4743_p13, %p5100_p7 }
  0x5e   : > { %p4746_p2 = pneg %p4745_p0 }
  0x60   : > { %p4751_p6 = pnand %p4749_p4, %p4746_p2 }
  0x62   : > { %4754 = shalt.err (!%p4751_p6)
}
  0x63   : > { %s4755_s29 = scalar_lea.vmem %s384_s11, 8192  ;;  %p4763_p11 = scmp.lt.s32.totalorder %s384_s11, %s384_s11 }
  0x64   : > { %p4756_p8 = scmp.ne.s32.totalorder %s384_s11, %s4755_s29  ;;  %p4764_p12 = scmp.lt.s32.totalorder %s4755_s29, %s4755_s29 }
  0x66   : > { %p4758_p9 = pnand %p4756_p8, %p5100_p7  ;;  %p4765_p1 = por %p4764_p12, %p4763_p11 }
  0x68   : > { %p4759_p10 = pneg %p4758_p9 }
  0x6a   : > { %p4766_p3 = pnand %p4765_p1, %p4759_p10 }
  0x6c   : > { %4769 = shalt.err (!%p4766_p3)
}
  0x6d   : > { %4562 = dma.hbm_to_vmem [thread:$0]  (!%p5084_p5), %s6447_s7, 8192, %s384_s11, [#allocation17], %s6455_s30, %s6455_s30, %s4968_s12  }
  0x6e   : > { %s4770_s15 = scalar_lea.hbm %s6442_s2, 128 }
  0x6f   : > { %p4771_p1 = scmp.ne.s32.totalorder %s6442_s2, %s4770_s15  ;;  %p4777_p0 = scmp.lt.u32.totalorder %s4770_s15, %s6442_s2 }
  0x71   : > { %p4773_p3 = pnand %p4771_p1, %p5100_p7 }
  0x73   : > { %p4774_p13 = pneg %p4773_p3 }
  0x75   : > { %p4779_p2 = pnand %p4777_p0, %p4774_p13 }
  0x77   : > { %4782 = shalt.err (!%p4779_p2)
}
  0x78   : > { %s4783_s22 = scalar_lea.vmem %s322_s14, 128  ;;  %p4791_p9 = scmp.lt.s32.totalorder %s322_s14, %s322_s14 }
  0x79   : > { %p4784_p4 = scmp.ne.s32.totalorder %s322_s14, %s4783_s22  ;;  %p4792_p10 = scmp.lt.s32.totalorder %s4783_s22, %s4783_s22 }
  0x7b   : > { %p4786_p6 = pnand %p4784_p4, %p5100_p7  ;;  %p4793_p11 = por %p4792_p10, %p4791_p9 }
  0x7d   : > { %p4787_p8 = pneg %p4786_p6 }
  0x7f   : > { %p4794_p12 = pnand %p4793_p11, %p4787_p8 }
  0x81   : > { %4797 = shalt.err (!%p4794_p12)
}
  0x82   : > { %4547 = dma.hbm_to_vmem [thread:$0]  (!%p5084_p5), %s6442_s2, 128, %s322_s14, [#allocation8]  }
  0x83   : > { %s4971_s1 = smov [#allocation12]   ;;  %s4798_s15 = scalar_lea.hbm %s6444_s4, 512 }
  0x84   : > { %s344_s8 = sshll.u32 %s4971_s1, 4  ;;  %p4799_p1 = scmp.ne.s32.totalorder %s6444_s4, %s4798_s15  ;;  %s345_s8 = int_to_ptr.vmem [resolvable:$true] %s344_s8 }
  0x85   : > { %p4805_p0 = scmp.lt.u32.totalorder %s4798_s15, %s6444_s4 }
  0x86   : > { %p4801_p3 = pnand %p4799_p1, %p5100_p7 }
  0x88   : > { %p4802_p13 = pneg %p4801_p3 }
  0x8a   : > { %p4807_p2 = pnand %p4805_p0, %p4802_p13 }
  0x8c   : > { %4810 = shalt.err (!%p4807_p2)
}
  0x8d   : > { %s4811_s14 = scalar_lea.vmem %s345_s8, 512  ;;  %p4819_p9 = scmp.lt.s32.totalorder %s345_s8, %s345_s8 }
  0x8e   : > { %p4812_p4 = scmp.ne.s32.totalorder %s345_s8, %s4811_s14  ;;  %p4820_p10 = scmp.lt.s32.totalorder %s4811_s14, %s4811_s14 }
  0x90   : > { %p4814_p6 = pnand %p4812_p4, %p5100_p7  ;;  %p4821_p11 = por %p4820_p10, %p4819_p9 }
  0x92   : > { %p4815_p8 = pneg %p4814_p6 }
  0x94   : > { %p4822_p12 = pnand %p4821_p11, %p4815_p8 }
  0x96   : > { %4825 = shalt.err (!%p4822_p12)
}
  0x97   : > { %s4972_s22 = smov 256   ;;  %s4973_s11 = smov 16  }
  0x98   : > { %4553 = dma.hbm_to_vmem [thread:$0]  (!%p5084_p5), %s6444_s4, 512, %s345_s8, [#allocation11], %s4972_s22, %s4972_s22, %s4973_s11  }
  0x99   : > { %s4974_s9 = smov [#allocation15]   ;;  %s4975_s15 = smov [#allocation18]  }
  0x9a   : > { %s370_s13 = sshll.u32 %s4974_s9, 4  ;;  %s402_s21 = sshll.u32 %s4975_s15, 4  ;;  %s371_s13 = int_to_ptr.vmem [resolvable:$true] %s370_s13  ;;  %s5233_s21 = int_to_ptr.vmem [resolvable:$true] %s402_s21 }
  0x9b   : > { %s4826_s26 = scalar_lea.hbm %s6446_s6, 12288 }
  0x9c   : > { %p4827_p1 = scmp.ne.s32.totalorder %s6446_s6, %s4826_s26  ;;  %p4833_p0 = scmp.lt.u32.totalorder %s4826_s26, %s6446_s6 }
  0x9e   : > { %p4829_p3 = pnand %p4827_p1, %p5100_p7 }
  0xa0   : > { %p4830_p13 = pneg %p4829_p3 }
  0xa2   : > { %p4835_p2 = pnand %p4833_p0, %p4830_p13 }
  0xa4   : > { %4838 = shalt.err (!%p4835_p2)
}
  0xa5   : > { %s4839_s1 = scalar_lea.vmem %s371_s13, 12288  ;;  %p4847_p9 = scmp.lt.s32.totalorder %s371_s13, %s371_s13 }
  0xa6   : > { %p4840_p4 = scmp.ne.s32.totalorder %s371_s13, %s4839_s1  ;;  %p4848_p10 = scmp.lt.s32.totalorder %s4839_s1, %s4839_s1 }
  0xa8   : > { %p4842_p6 = pnand %p4840_p4, %p5100_p7  ;;  %p4849_p11 = por %p4848_p10, %p4847_p9 }
  0xaa   : > { %p4843_p8 = pneg %p4842_p6 }
  0xac   : > { %p4850_p12 = pnand %p4849_p11, %p4843_p8 }
  0xae   : > { %4853 = shalt.err (!%p4850_p12)
}
  0xaf   : > { %4559 = dma.hbm_to_vmem [thread:$0]  (!%p5084_p5), %s6446_s6, 12288, %s371_s13, [#allocation14], %s4972_s22, %s4972_s22, %s4973_s11  }
  0xb0   : > { %s4854_s28 = scalar_lea.hbm %s6450_s10, 4096 }
  0xb1   : > { %p4855_p1 = scmp.ne.s32.totalorder %s6450_s10, %s4854_s28  ;;  %p4861_p0 = scmp.lt.u32.totalorder %s4854_s28, %s6450_s10 }
  0xb3   : > { %p4857_p3 = pnand %p4855_p1, %p5100_p7 }
  0xb5   : > { %p4858_p13 = pneg %p4857_p3 }
  0xb7   : > { %p4863_p2 = pnand %p4861_p0, %p4858_p13 }
  0xb9   : > { %4866 = shalt.err (!%p4863_p2)
}
  0xba   : > { %s4867_s22 = scalar_lea.vmem %s5233_s21, 4096  ;;  %p4875_p9 = scmp.lt.s32.totalorder %s5233_s21, %s5233_s21 }
  0xbb   : > { %p4868_p4 = scmp.ne.s32.totalorder %s5233_s21, %s4867_s22  ;;  %p4876_p10 = scmp.lt.s32.totalorder %s4867_s22, %s4867_s22 }
  0xbd   : > { %p4870_p6 = pnand %p4868_p4, %p5100_p7  ;;  %p4877_p11 = por %p4876_p10, %p4875_p9 }
  0xbf   : > { %p4871_p8 = pneg %p4870_p6 }
  0xc1   : > { %p4878_p12 = pnand %p4877_p11, %p4871_p8 }
  0xc3   : > { %4881 = shalt.err (!%p4878_p12)
}
  0xc4   : > { %s6479_s11 = smov 128   ;;  %s5280_s27 = sadd.s32 1, %s4962_s20  }
  0xc5   : > { %4565 = dma.hbm_to_vmem [thread:$0]  (!%p5084_p5), %s6450_s10, 4096, %s5233_s21, [#allocation17], %s6479_s11, %s6479_s11, %s4968_s12  }
  0xc6   : > { %s35_s16 = sadd.s32 1, %s4958_s19  ;;  %s32_s30 = ssub.s32 %s4962_s20, %s5280_s27 }
  0xc7   : > { %p42_p7 = scmp.ne.s32.totalorder %s4958_s19, %s4954_s18  ;;  %p33_p1 = scmp.eq.s32.totalorder %s32_s30, 0 }
  0xc8   : > { %p43_p3 = scmp.eq.s32.totalorder %s4962_s20, 0  ;;  %p48_p13 = scmp.ne.s32.totalorder %s4954_s18, %s4950_s17 }
  0xc9   : > { %p4578_p0 = scmp.lt.s32.totalorder %s4962_s20, 2  ;;  %p6480_p4 = scmp.eq.s32.totalorder %s5069_s23, 0 }
  0xca   : > { %s5292_s9 = scalar_select %p33_p1, %s4958_s19, %s35_s16  }
  0xcb   : > { %p44_p2 = por %p43_p3, %p42_p7  ;;  %p5296_p6 = por %p6480_p4, %p48_p13 }
  0xcc   : > { %s416_s25 = sand.u32 1, %s4958_s19   ;;  %s3780_s21 = sshll.u32 %s4962_s20, 8 }
  0xcd   : > { %s3738_s28 = sshll.u32 %s416_s25, 4  ;;  %s5305_s29 = scalar_lea.hbm %s6440_s0, %s3780_s21 }
  0xce   : > { %s420_s17 = scalar_lea.vmem [#allocation5], %s3738_s28  ;;  %p5307_p5 = pnand %p4578_p0, %p44_p2 }
  0xcf   : > { %s427_s8 = sshll.u32 %s420_s17, 4  ;;  %s5313_s20 = scalar_lea.sflag [#allocation6], %s416_s25  ;;  %s5311_s8 = int_to_ptr.vmem [resolvable:$true] %s427_s8 }
  0xd0   : > { %s4882_s13 = scalar_lea.hbm %s5305_s29, 256  ;;  %p4884_p9 = pneg %p5307_p5 }
  0xd1   : > { %p4883_p8 = scmp.ne.s32.totalorder %s5305_s29, %s4882_s13  ;;  %s4887_s30 = scalar_lea.hbm %s6440_s0, 512 }
  0xd2   : > { %p4888_p12 = scmp.lt.u32.totalorder %s5305_s29, %s6440_s0  ;;  %p4889_p7 = scmp.lt.u32.totalorder %s4887_s30, %s4882_s13 }
  0xd3   : > { %p4885_p10 = pnand %p4884_p9, %p4883_p8  ;;  %p4891_p3 = scmp.lt.u32.totalorder %s4882_s13, %s5305_s29 }
  0xd4   : > { %p4890_p1 = por %p4889_p7, %p4888_p12 }
  0xd5   : > { %p4886_p11 = pneg %p4885_p10 }
  0xd6   : > { %p4892_p13 = por %p4891_p3, %p4890_p1 }
  0xd8   : > { %p4893_p0 = pnand %p4892_p13, %p4886_p11 }
  0xda   : > { %4896 = shalt.err (!%p4893_p0)
}
  0xdb   : > { %s4897_s25 = scalar_lea.vmem %s5311_s8, 256  ;;  %s4976_s26 = smov [#allocation5]  }
  0xdc   : > { %p4898_p2 = scmp.ne.s32.totalorder %s5311_s8, %s4897_s25  ;;  %s4902_s14 = sshll.u32 %s4976_s26, 4  ;;  %s4903_s14 = int_to_ptr.vmem [resolvable:$false] %s4902_s14 }
  0xdd   : > { %s4904_s17 = scalar_lea.vmem %s4903_s14, 512  ;;  %p4905_p10 = scmp.lt.s32.totalorder %s5311_s8, %s4903_s14 }
  0xde   : > { %p4900_p4 = pnand %p4898_p2, %p4884_p9  ;;  %p4906_p12 = scmp.lt.s32.totalorder %s4904_s17, %s4897_s25 }
  0xe0   : > { %p4901_p8 = pneg %p4900_p4  ;;  %p4907_p7 = por %p4906_p12, %p4905_p10 }
  0xe2   : > { %p4908_p1 = pnand %p4907_p7, %p4901_p8 }
  0xe4   : > { %4911 = shalt.err (!%p4908_p1)
}
  0xe5   : > { %4569 = dma.hbm_to_vmem [thread:$0]  (!%p5307_p5), %s5305_s29, 256, %s5311_s8, %s5313_s20, %s6479_s11, %s6479_s11, %s4968_s12  }
  0xe6   : > { %p6483_p9 = scmp.ne.s32.totalorder %s6475_s24, 0 }
  0xe8   : > { %439 = sbr.rel (%p6483_p9) target bundleno = 4258 (0x10a2), region = 64 }
  0xef   : > { %s441_s13 = sand.u32 1, %s4954_s18  }
  0xf0   : > { %s3742_s1 = sshll.u32 %s441_s13, 4  ;;  %s442_s16 = scalar_lea.sflag [#allocation6], %s441_s13 }
  0xf1   : > { %s445_s30 = scalar_lea.vmem [#allocation5], %s3742_s1 }
  0xf2   : > { %4929 = dma.done.wait (%p5296_p6), %s442_s16, 256  }
  0xf3   : > { %4931 = vsyncadd (%p5296_p6), %s442_s16, 4294967040  ;;  %p6484_p11 = scmp.eq.s32.totalorder %s5069_s23, 0 }
  0xf5   : > { %4933 = dma.done.wait (%p6484_p11), [#allocation8], 384   ;;  %p6485_p3 = pmov %p6484_p11 }
  0xf7   : > { %4935 = vsyncadd (%p6485_p3), [#allocation8], 4294966912  ;;  %p6486_p5 = pmov %p6485_p3 }
  0xf8   : > { %p6487_p13 = pmov %p6485_p3 }
  0xf9   : > { %4937 = dma.done.wait (%p6486_p5), [#allocation11], 2432  }
  0xfa   : > { %4939 = vsyncadd (%p6487_p13), [#allocation11], 4294964864  ;;  %p6488_p0 = pmov %p6485_p3 }
  0xfc   : > { %4941 = dma.done.wait (%p6488_p0), [#allocation14], 22528   ;;  %p6489_p2 = pmov %p6488_p0 }
  0xfd   : > { %p6490_p6 = pmov %p6488_p0 }
  0xfe   : > { %4943 = vsyncadd (%p6489_p2), [#allocation14], 4294944768 }
  0xff   : > { %4945 = dma.done.wait (%p6490_p6), [#allocation17], 12288   ;;  %p6491_p4 = pmov %p6488_p0 }
 0x100   : > { %vm531_vm0 = vcmask 130048   ;;  %s6492_s11 = sld [smem:[#allocation49_spill]]  ;;  %v527_v2 = vld [vmem:[%s445_s30] sm:$0xff]  ;;  %v528_v4 = vld [vmem:[%s445_s30 + $0x8] sm:$0xff]  ;;  %v4977_v5 = vmov 0.0   ;;  %s4978_s8 = smov 8   ;;  %v6457_v18 = vlaneseq }
 0x101   : > { %4947 = vsyncadd (%p6491_p4), [#allocation17], 4294955008  ;;  %3985 = vmatprep.mubr.msk.f32.mxu1 %vm531_vm0, %v527_v2  ;;  %519 = vst [vmem:[#allocation2] sm:$0xff] %v4977_v5  ;;  %s4979_s22 = smov 120   ;;  %v839_v12 = vld [vmem:[#allocation13] sm:$0xff]  ;;  %v840_v13 = vld [vmem:[#allocation13 + $0x8] sm:$0xff] }
 0x102   : > { %520 = vst [vmem:[#allocation2 + $0x18] sm:$0xff] %v4977_v5  ;;  %521 = vst [vmem:[#allocation3] sm:$0xff] %v4977_v5  ;;  %v841_v14 = vld [vmem:[#allocation13 + $0x10] sm:$0xff]  ;;  %v4167_v15 = vpack.c.bf16 %v840_v13, %v839_v12  ;;  %v842_v16 = vld [vmem:[#allocation13 + $0x18] sm:$0xff]  ;;  %v629_v19 = vshrl.u32 %v6457_v18, 7  ;;  %s4980_s20 = smov 24  }
 0x103   : > { %522 = vst [vmem:[#allocation3 + $0x8] sm:$0xff] %v4977_v5  ;;  %523 = vst [vmem:[#allocation3 + $0x30] sm:$0xff] %v4977_v5  ;;  %v4171_v17 = vpack.c.bf16 %v842_v16, %v841_v14  ;;  %v613_v22 = vld [vmem:[#allocation10] sm:$0xff]  ;;  %v3754_v27 = vld [vmem:[#allocation7] ss:$0 sm:$0xff]  ;;  %s4981_s21 = smov 16  }
 0x104   : > { %524 = vst [vmem:[#allocation3 + $0x38] sm:$0xff] %v4977_v5  ;;  %525 = vst [vmem:[#allocation4] sm:$0xff] %v4977_v5  ;;  %v5414_v20 = vsub.s32 0, %v629_v19  ;;  %v5416_v21 = vsub.s32 1, %v629_v19  ;;  %v5420_v26 = vsub.s32 2, %v629_v19  ;;  %v5422_v31 = vsub.s32 4, %v629_v19 }
 0x105   : > { %526 = vst [vmem:[#allocation4 + $0x10] sm:$0xff] %v4977_v5  ;;  %v5424_v32 = vsub.s32 3, %v629_v19  ;;  %v5429_v45 = vsub.s32 5, %v629_v19  ;;  %v5431_v48 = vsub.s32 6, %v629_v19  ;;  %v5434_v54 = vsub.s32 7, %v629_v19  ;;  %s4982_s28 = smov 112  }
 0x106   : > { %v529_v0 = vld [vmem:[%s6492_s11] sm:$0xff]  ;;  %v530_v1 = vld [vmem:[%s6492_s11 + $0x8] sm:$0xff]  ;;  %v631_v24 = vrot.slane %v613_v22, %v5414_v20  ;;  %v639_v25 = vrot.slane %v613_v22, %v5416_v21  ;;  %v651_v34 = vrot.slane %v613_v22, %v5420_v26  ;;  %v673_v40 = vrot.slane %v613_v22, %v5422_v31  ;;  %v3755_v14 = vld [vmem:[#allocation10 + $0x8] ss:$0 sm:$0xff]  ;;  %s4983_s25 = smov 104   ;;  %s6544_s17 = sld [smem:[#allocation50_spill]] }
 0x107   : > { %v4163_v3 = vpack.c.bf16 %v530_v1, %v529_v0  ;;  %v665_v41 = vrot.slane %v613_v22, %v5424_v32  ;;  %v685_v58 = vrot.slane %v613_v22, %v5429_v45  ;;  %v699_v1 = vrot.slane %v613_v22, %v5431_v48  ;;  %s4986_s13 = smov 32   ;;  %s4987_s1 = smov 96  }
 0x108   : > { %vm2382_vm1 = vcmask 1040384   ;;  %vm2581_vm2 = vcmask 1046528   ;;  %vm4985_vm5 = vmmov 0   ;;  %p515_p8 = scmp.lt.s32.totalorder %s5069_s23, 1  ;;  %s6545_s12 = sld [smem:[#allocation51_spill]] }
 0x109   : > { %4164 = vmatprep.subr.bf16.mxu1 %v4163_v3 }
 0x10a   : > { %4166 = vmatpush3.bf16.msra.mxu1 %v4163_v3  ;;  %s6551_s23 = smov (!%p515_p8, %s5069_s23), 1 }
 0x10b   : > { %4168 = vmatprep.subr.bf16.mxu1 %v4167_v15  ;;  %s3751_s16 = sshll.u32 %s6551_s23, 3 }
 0x10d   : > { %3986 = vmatmul.mubr.msk.f32.vlgmr.msra.gmra.mrb[0].mxu1 %vm531_vm0, %v528_v4  ;;  %v707_v4 = vrot.slane %v613_v22, %v5434_v54 }
 0x10e   : > { %4170 = vmatpush3.bf16.msra.mxu1 %v4167_v15  ;;  %s518_s15 = scalar_lea.vmem %s6545_s12, %s3751_s16 }
 0x10f   : > { %4172 = vmatprep.subr.bf16.mxu1 %v4171_v17 }
 0x112   : > { %4174 = vmatpush3.bf16.msra.mxu1 %v4171_v17 }
 0x1e0   : > { %v5383_v6 = vpop.f32.mrb[0].mxu1 }
 0x1e1   : > { %616 = vst [vmem:[#allocation2 + $0x10] sm:$0xff] %v5383_v6  ;;  %v5386_v7 = vpop.f32.mrb[1].mxu1  ;;  %660 = vrot.lane.b32.xlu1 %v5383_v6, %s4978_s8  ;;  %v675_v59 = vmul.f32 %v5383_v6, %v673_v40 }
 0x1e2   : > { %615 = vst [vmem:[#allocation2 + $0x8] sm:$0xff] %v5386_v7  ;;  %v674_v53 = vmul.f32 %v673_v40, %v5386_v7 }
 0x1e8   : > { %v5399_v10 = vld [vmem:[#allocation2 + $0x11] sm:$0xff] }
 0x1e9   : > { %v622_v8 = vld [vmem:[#allocation2 + $0x7] sm:$0xff]  ;;  %v623_v9 = vld [vmem:[#allocation2 + $0xf] sm:$0xff]  ;;  %v709_v17 = vmul.f32 %v707_v4, %v5399_v10 }
 0x1ea   : > { %624 = vrot.lane.b32.xlu0 %v622_v8, %s4978_s8  ;;  %644 = vrot.lane.b32.xlu1 %v622_v8, %s4979_s22  ;;  %v5405_v11 = vld [vmem:[#allocation2 + $0x9] sm:$0xff]  ;;  %v640_v35 = vmul.f32 %v639_v25, %v622_v8  ;;  %v641_v44 = vmul.f32 %v639_v25, %v623_v9 }
 0x1eb   : > { %v708_v19 = vmul.f32 %v707_v4, %v5405_v11 }
 0x1ee   : > { %626 = vrot.lane.b32.xlu0 %v623_v9, %s4978_s8  ;;  %646 = vrot.lane.b32.xlu1 %v623_v9, %s4979_s22 }
 0x1f2   : > { %658 = vrot.lane.b32.xlu0 %v5386_v7, %s4978_s8  ;;  %680 = vrot.lane.b32.xlu1 %v5383_v6, %s4979_s22 }
 0x1f6   : > { %678 = vrot.lane.b32.xlu0 %v5386_v7, %s4979_s22  ;;  %694 = vrot.lane.b32.xlu1 %v5399_v10, %s4978_s8 }
 0x1fa   : > { %692 = vrot.lane.b32.xlu0 %v5405_v11, %s4978_s8  ;;  %714 = vrot.lane.b32.xlu1 %v5399_v10, %s4979_s22  ;;  %v845_v10 = vld [vmem:[#allocation13 + $0x30] sm:$0xff] }
 0x1fe   : > { %712 = vrot.lane.b32.xlu0 %v5405_v11, %s4979_s22  ;;  %v846_v11 = vld [vmem:[#allocation13 + $0x38] sm:$0xff] }
 0x253   : > { %v661_v23 = vpop.permute.xlu1 %660 }
 0x254   : > { %v667_v55 = vmul.f32 %v665_v41, %v661_v23 }
 0x25c   : > { %v625_v28 = vpop.permute.xlu0 %624  ;;  %v645_v29 = vpop.permute.xlu1 %644 }
 0x25d   : > { %v632_v30 = vmul.f32 %v631_v24, %v625_v28  ;;  %v652_v42 = vmul.f32 %v651_v34, %v645_v29 }
 0x25f   : > { %v634_v33 = vadd.f32 %v3754_v27, %v632_v30  ;;  %v843_v30 = vld [vmem:[#allocation13 + $0x20] sm:$0xff] }
 0x260   : > { %v627_v36 = vpop.permute.xlu0 %626  ;;  %v647_v37 = vpop.permute.xlu1 %646 }
 0x261   : > { %v642_v38 = vadd.f32 %v640_v35, %v634_v33  ;;  %v633_v39 = vmul.f32 %v631_v24, %v627_v36  ;;  %v653_v51 = vmul.f32 %v651_v34, %v647_v37  ;;  %v844_v33 = vld [vmem:[#allocation13 + $0x28] sm:$0xff]  ;;  %v4179_v37 = vpack.c.bf16 %v846_v11, %v845_v10 }
 0x262   : > { %v4175_v34 = vpack.c.bf16 %v844_v33, %v843_v30 }
 0x263   : > { %v635_v43 = vadd.f32 %v3754_v27, %v633_v39  ;;  %v654_v49 = vadd.f32 %v652_v42, %v642_v38  ;;  %v847_v38 = vld [vmem:[#allocation13 + $0x40] sm:$0xff]  ;;  %v848_v39 = vld [vmem:[#allocation13 + $0x48] sm:$0xff] }
 0x264   : > { %v659_v46 = vpop.permute.xlu0 %658  ;;  %v681_v47 = vpop.permute.xlu1 %680  ;;  %4176 = vmatprep.subr.bf16.mxu1 %v4175_v34  ;;  %v4183_v40 = vpack.c.bf16 %v848_v39, %v847_v38 }
 0x265   : > { %v643_v50 = vadd.f32 %v641_v44, %v635_v43  ;;  %v666_v52 = vmul.f32 %v665_v41, %v659_v46  ;;  %v687_v3 = vmul.f32 %v685_v58, %v681_v47  ;;  %4178 = vmatpush3.bf16.msra.mxu1 %v4175_v34  ;;  %v849_v43 = vld [vmem:[#allocation13 + $0x50] sm:$0xff]  ;;  %v850_v44 = vld [vmem:[#allocation13 + $0x58] sm:$0xff]  ;;  %v851_v47 = vld [vmem:[#allocation13 + $0x60] sm:$0xff] }
 0x266   : > { %4180 = vmatprep.subr.bf16.mxu1 %v4179_v37  ;;  %v4187_v46 = vpack.c.bf16 %v850_v44, %v849_v43 }
 0x267   : > { %v655_v56 = vadd.f32 %v653_v51, %v643_v50  ;;  %v668_v57 = vadd.f32 %v666_v52, %v654_v49  ;;  %v852_v49 = vld [vmem:[#allocation13 + $0x68] sm:$0xff]  ;;  %v853_v51 = vld [vmem:[#allocation13 + $0x70] sm:$0xff]  ;;  %v854_v52 = vld [vmem:[#allocation13 + $0x78] sm:$0xff] }
 0x268   : > { %v679_v60 = vpop.permute.xlu0 %678  ;;  %v695_v61 = vpop.permute.xlu1 %694  ;;  %v4191_v50 = vpack.c.bf16 %v852_v49, %v851_v47  ;;  %v3757_v49 = vld [vmem:[#allocation10 + $0x11] ss:$0 sm:$0xff] }
 0x269   : > { %v669_v62 = vadd.f32 %v667_v55, %v655_v56  ;;  %v676_v63 = vadd.f32 %v674_v53, %v668_v57  ;;  %v686_v0 = vmul.f32 %v685_v58, %v679_v60  ;;  %v701_v12 = vmul.f32 %v699_v1, %v695_v61  ;;  %4182 = vmatpush3.bf16.msra.mxu1 %v4179_v37  ;;  %v726_v57 = vld [vmem:[#allocation10 + $0x9] sm:$0xff] }
 0x26a   : > { %4184 = vmatprep.subr.bf16.mxu1 %v4183_v40  ;;  %v4195_v53 = vpack.c.bf16 %v854_v52, %v853_v51  ;;  %v744_v58 = vrot.slane %v726_v57, %v5414_v20  ;;  %v3756_v60 = vld [vmem:[#allocation7 + $0x1] ss:$0 sm:$0xff]  ;;  %v812_v11 = vrot.slane %v726_v57, %v5431_v48 }
 0x26b   : > { %v677_v2 = vadd.f32 %v675_v59, %v669_v62  ;;  %v688_v9 = vadd.f32 %v686_v0, %v676_v63  ;;  %v752_v59 = vrot.slane %v726_v57, %v5416_v21 }
 0x26c   : > { %v693_v7 = vpop.permute.xlu0 %692  ;;  %v715_v15 = vpop.permute.xlu1 %714 }
 0x26d   : > { %v689_v8 = vadd.f32 %v687_v3, %v677_v2  ;;  %v700_v13 = vmul.f32 %v699_v1, %v693_v7  ;;  %v721_v25 = vmul.f32 %v3755_v14, %v715_v15  ;;  %4186 = vmatpush3.bf16.msra.mxu1 %v4183_v40  ;;  %v764_v1 = vrot.slane %v726_v57, %v5420_v26 }
 0x26e   : > { %4188 = vmatprep.subr.bf16.mxu1 %v4187_v46 }
 0x26f   : > { %v703_v16 = vadd.f32 %v701_v12, %v689_v8  ;;  %v702_v6 = vadd.f32 %v700_v13, %v688_v9  ;;  %v778_v12 = vrot.slane %v726_v57, %v5424_v32 }
 0x270   : > { %v713_v23 = vpop.permute.xlu0 %712 }
 0x271   : > { %v711_v24 = vadd.f32 %v709_v17, %v703_v16  ;;  %v710_v27 = vadd.f32 %v708_v19, %v702_v6  ;;  %v720_v28 = vmul.f32 %v3755_v14, %v713_v23  ;;  %4190 = vmatpush3.bf16.msra.mxu1 %v4187_v46  ;;  %v786_v6 = vrot.slane %v726_v57, %v5422_v31 }
 0x272   : > { %4192 = vmatprep.subr.bf16.mxu1 %v4191_v50  ;;  %v798_v23 = vrot.slane %v726_v57, %v5429_v45 }
 0x273   : > { %v723_v29 = vadd.f32 %v721_v25, %v711_v24  ;;  %v722_v22 = vadd.f32 %v720_v28, %v710_v27 }
 0x275   : > { %v5442_v35 = vmax.f32 %v723_v29, 0.0  ;;  %v5444_v36 = vmax.f32 %v722_v22, 0.0  ;;  %4194 = vmatpush3.bf16.msra.mxu1 %v4191_v50 }
 0x276   : > { %4196 = vmatprep.subr.bf16.mxu1 %v4195_v53 }
 0x277   : > { %729 = vst [vmem:[#allocation2 + $0x10] sm:$0xff] %v5442_v35  ;;  %728 = vst [vmem:[#allocation2 + $0x8] sm:$0xff] %v5444_v36  ;;  %v788_v29 = vmul.f32 %v786_v6, %v5442_v35  ;;  %v787_v22 = vmul.f32 %v786_v6, %v5444_v36 }
 0x279   : > { %4198 = vmatpush3.bf16.msra.mxu1 %v4195_v53 }
 0x27e   : > { %v736_v41 = vld [vmem:[#allocation2 + $0xf] sm:$0xff]  ;;  %v735_v42 = vld [vmem:[#allocation2 + $0x7] sm:$0xff] }
 0x27f   : > { %739 = vrot.lane.b32.xlu1 %v736_v41, %s4978_s8  ;;  %737 = vrot.lane.b32.xlu0 %v735_v42, %s4978_s8  ;;  %v804_v55 = vld [vmem:[#allocation2 + $0x11] sm:$0xff]  ;;  %v803_v56 = vld [vmem:[#allocation2 + $0x9] sm:$0xff]  ;;  %v754_v4 = vmul.f32 %v752_v59, %v736_v41  ;;  %v753_v7 = vmul.f32 %v752_v59, %v735_v42 }
 0x283   : > { %759 = vrot.lane.b32.xlu1 %v736_v41, %s4979_s22  ;;  %757 = vrot.lane.b32.xlu0 %v735_v42, %s4979_s22  ;;  %v820_v41 = vrot.slane %v726_v57, %v5434_v54 }
 0x285   : > { %v822_v51 = vmul.f32 %v820_v41, %v804_v55  ;;  %v821_v52 = vmul.f32 %v820_v41, %v803_v56 }
 0x287   : > { %773 = vrot.lane.b32.xlu1 %v5442_v35, %s4978_s8  ;;  %771 = vrot.lane.b32.xlu0 %v5444_v36, %s4978_s8 }
 0x28b   : > { %793 = vrot.lane.b32.xlu1 %v5442_v35, %s4979_s22  ;;  %791 = vrot.lane.b32.xlu0 %v5444_v36, %s4979_s22 }
 0x28f   : > { %807 = vrot.lane.b32.xlu1 %v804_v55, %s4978_s8  ;;  %805 = vrot.lane.b32.xlu0 %v803_v56, %s4978_s8 }
 0x293   : > { %827 = vrot.lane.b32.xlu1 %v804_v55, %s4979_s22  ;;  %825 = vrot.lane.b32.xlu0 %v803_v56, %s4979_s22  ;;  %v1054_v55 = vld [vmem:[#allocation13 + $0x98] sm:$0xff] }
 0x2f1   : > { %v740_v61 = vpop.permute.xlu1 %739  ;;  %v738_v62 = vpop.permute.xlu0 %737 }
 0x2f2   : > { %v746_v63 = vmul.f32 %v744_v58, %v740_v61  ;;  %v745_v0 = vmul.f32 %v744_v58, %v738_v62 }
 0x2f4   : > { %v748_v2 = vadd.f32 %v3756_v60, %v746_v63  ;;  %v747_v3 = vadd.f32 %v3756_v60, %v745_v0 }
 0x2f5   : > { %v760_v8 = vpop.permute.xlu1 %759  ;;  %v758_v9 = vpop.permute.xlu0 %757 }
 0x2f6   : > { %v756_v13 = vadd.f32 %v754_v4, %v748_v2  ;;  %v766_v14 = vmul.f32 %v764_v1, %v760_v8  ;;  %v755_v15 = vadd.f32 %v753_v7, %v747_v3  ;;  %v765_v16 = vmul.f32 %v764_v1, %v758_v9  ;;  %v1051_v2 = vld [vmem:[#allocation13 + $0x80] sm:$0xff]  ;;  %v1052_v3 = vld [vmem:[#allocation13 + $0x88] sm:$0xff]  ;;  %v1053_v7 = vld [vmem:[#allocation13 + $0x90] sm:$0xff] }
 0x2f7   : > { %v4199_v4 = vpack.c.bf16 %v1052_v3, %v1051_v2  ;;  %v4203_v56 = vpack.c.bf16 %v1054_v55, %v1053_v7  ;;  %v3758_v8 = vld [vmem:[#allocation7 + $0x2] ss:$0 sm:$0xff] }
 0x2f8   : > { %v768_v24 = vadd.f32 %v766_v14, %v756_v13  ;;  %v767_v25 = vadd.f32 %v765_v16, %v755_v15  ;;  %v1055_v15 = vld [vmem:[#allocation13 + $0xa0] sm:$0xff]  ;;  %v1056_v16 = vld [vmem:[#allocation13 + $0xa8] sm:$0xff] }
 0x2f9   : > { %v774_v17 = vpop.permute.xlu1 %773  ;;  %v772_v19 = vpop.permute.xlu0 %771  ;;  %4200 = vmatprep.subr.bf16.mxu0 %v4199_v4 }
 0x2fa   : > { %v780_v27 = vmul.f32 %v778_v12, %v774_v17  ;;  %v779_v28 = vmul.f32 %v778_v12, %v772_v19  ;;  %4202 = vmatpush3.bf16.msra.mxu0 %v4199_v4  ;;  %v4207_v17 = vpack.c.bf16 %v1056_v16, %v1055_v15 }
 0x2fb   : > { %4204 = vmatprep.subr.bf16.mxu0 %v4203_v56 }
 0x2fc   : > { %v782_v30 = vadd.f32 %v780_v27, %v768_v24  ;;  %v781_v33 = vadd.f32 %v779_v28, %v767_v25  ;;  %v1058_v24 = vld [vmem:[#allocation13 + $0xb8] sm:$0xff]  ;;  %v1059_v27 = vld [vmem:[#allocation13 + $0xc0] sm:$0xff]  ;;  %v1060_v28 = vld [vmem:[#allocation13 + $0xc8] sm:$0xff] }
 0x2fd   : > { %v794_v34 = vpop.permute.xlu1 %793  ;;  %v792_v10 = vpop.permute.xlu0 %791 }
 0x2fe   : > { %v790_v37 = vadd.f32 %v788_v29, %v782_v30  ;;  %v800_v38 = vmul.f32 %v798_v23, %v794_v34  ;;  %v789_v39 = vadd.f32 %v787_v22, %v781_v33  ;;  %v799_v40 = vmul.f32 %v798_v23, %v792_v10  ;;  %4206 = vmatpush3.bf16.msra.mxu0 %v4203_v56  ;;  %v1057_v23 = vld [vmem:[#allocation13 + $0xb0] sm:$0xff]  ;;  %v1062_v34 = vld [vmem:[#allocation13 + $0xd8] sm:$0xff] }
 0x2ff   : > { %4208 = vmatprep.subr.bf16.mxu0 %v4207_v17  ;;  %v4211_v25 = vpack.c.bf16 %v1058_v24, %v1057_v23  ;;  %v4215_v29 = vpack.c.bf16 %v1060_v28, %v1059_v27  ;;  %v1061_v33 = vld [vmem:[#allocation13 + $0xd0] sm:$0xff] }
 0x300   : > { %v802_v44 = vadd.f32 %v800_v38, %v790_v37  ;;  %v801_v46 = vadd.f32 %v799_v40, %v789_v39  ;;  %v4219_v10 = vpack.c.bf16 %v1062_v34, %v1061_v33  ;;  %v1064_v37 = vld [vmem:[#allocation13 + $0xe8] sm:$0xff]  ;;  %v1065_v39 = vld [vmem:[#allocation13 + $0xf0] sm:$0xff]  ;;  %v1066_v40 = vld [vmem:[#allocation13 + $0xf8] sm:$0xff] }
 0x301   : > { %v808_v42 = vpop.permute.xlu1 %807  ;;  %v806_v43 = vpop.permute.xlu0 %805  ;;  %v4227_v41 = vpack.c.bf16 %v1066_v40, %v1065_v39 }
 0x302   : > { %v814_v47 = vmul.f32 %v812_v11, %v808_v42  ;;  %v813_v35 = vmul.f32 %v812_v11, %v806_v43  ;;  %4210 = vmatpush3.bf16.msra.mxu0 %v4207_v17  ;;  %v1063_v11 = vld [vmem:[#allocation13 + $0xe0] sm:$0xff] }
 0x303   : > { %4212 = vmatprep.subr.bf16.mxu0 %v4211_v25  ;;  %v4223_v38 = vpack.c.bf16 %v1064_v37, %v1063_v11 }
 0x304   : > { %v816_v36 = vadd.f32 %v814_v47, %v802_v44  ;;  %v815_v50 = vadd.f32 %v813_v35, %v801_v46  ;;  %v937_v44 = vld [vmem:[#allocation10 + $0x12] sm:$0xff] }
 0x305   : > { %v828_v53 = vpop.permute.xlu1 %827  ;;  %v826_v58 = vpop.permute.xlu0 %825  ;;  %v955_v47 = vrot.slane %v937_v44, %v5414_v20  ;;  %v963_v35 = vrot.slane %v937_v44, %v5416_v21  ;;  %v1009_v56 = vrot.slane %v937_v44, %v5429_v45  ;;  %v1023_v16 = vrot.slane %v937_v44, %v5431_v48 }
 0x306   : > { %v824_v59 = vadd.f32 %v822_v51, %v816_v36  ;;  %v834_v60 = vmul.f32 %v3757_v49, %v828_v53  ;;  %v823_v61 = vadd.f32 %v821_v52, %v815_v50  ;;  %v833_v62 = vmul.f32 %v3757_v49, %v826_v58  ;;  %4214 = vmatpush3.bf16.msra.mxu0 %v4211_v25  ;;  %v3759_v49 = vld [vmem:[#allocation7 + $0x3] ss:$0 sm:$0xff] }
 0x307   : > { %4216 = vmatprep.subr.bf16.mxu0 %v4215_v29  ;;  %v975_v53 = vrot.slane %v937_v44, %v5420_v26  ;;  %v989_v58 = vrot.slane %v937_v44, %v5424_v32 }
 0x308   : > { %v836_v63 = vadd.f32 %v834_v60, %v824_v59  ;;  %v835_v0 = vadd.f32 %v833_v62, %v823_v61 }
 0x30a   : > { %v838_v57 = vmax.f32 %v836_v63, 0.0  ;;  %v837_v1 = vmax.f32 %v835_v0, 0.0  ;;  %4218 = vmatpush3.bf16.msra.mxu0 %v4215_v29  ;;  %v997_v63 = vrot.slane %v937_v44, %v5422_v31  ;;  %v1031_v29 = vrot.slane %v937_v44, %v5434_v54 }
 0x30b   : > { %4220 = vmatprep.subr.bf16.mxu0 %v4219_v10 }
 0x30c   : > { %4020 = vmatprep.mubr.f32.mxu1 %v837_v1 }
 0x30d   : > { %4021 = vmatmul.mubr.f32.vlgmr.msra.gmra.mrb[2].mxu1 %v838_v57 }
 0x30e   : > { %4222 = vmatpush3.bf16.msra.mxu0 %v4219_v10  ;;  %v3760_v10 = vld [vmem:[#allocation10 + $0x1a] ss:$0 sm:$0xff] }
 0x30f   : > { %4224 = vmatprep.subr.bf16.mxu0 %v4223_v38 }
 0x312   : > { %4226 = vmatpush3.bf16.msra.mxu0 %v4223_v38 }
 0x313   : > { %4228 = vmatprep.subr.bf16.mxu0 %v4227_v41 }
 0x316   : > { %4230 = vmatpush3.bf16.msra.mxu0 %v4227_v41 }
 0x3e0   : > { %v4022_v9 = vpop.f32.mrb[2].mxu1 }
 0x3e1   : > { %v932_v12 = vadd.f32 %v4022_v9, %v3758_v8  ;;  %v926_v13 = vpop.f32.mrb[3].mxu1 }
 0x3e2   : > { %v927_v14 = vadd.f32 %v3758_v8, %v926_v13 }
 0x3e3   : > { %v5474_v6 = vmax.f32 %v932_v12, 0.0 }
 0x3e4   : > { %v5476_v19 = vmax.f32 %v927_v14, 0.0 }
 0x3e5   : > { %940 = vst [vmem:[#allocation2 + $0x10] sm:$0xff] %v5474_v6  ;;  %984 = vrot.lane.b32.xlu1 %v5474_v6, %s4978_s8  ;;  %v999_v8 = vmul.f32 %v997_v63, %v5474_v6 }
 0x3e6   : > { %939 = vst [vmem:[#allocation2 + $0x8] sm:$0xff] %v5476_v19  ;;  %v998_v17 = vmul.f32 %v997_v63, %v5476_v19 }
 0x3ec   : > { %v1015_v42 = vld [vmem:[#allocation2 + $0x11] sm:$0xff] }
 0x3ed   : > { %v946_v22 = vld [vmem:[#allocation2 + $0x7] sm:$0xff]  ;;  %v947_v30 = vld [vmem:[#allocation2 + $0xf] sm:$0xff]  ;;  %v1033_v37 = vmul.f32 %v1031_v29, %v1015_v42 }
 0x3ee   : > { %948 = vrot.lane.b32.xlu0 %v946_v22, %s4978_s8  ;;  %950 = vrot.lane.b32.xlu1 %v947_v30, %s4978_s8  ;;  %v1014_v43 = vld [vmem:[#allocation2 + $0x9] sm:$0xff]  ;;  %v964_v61 = vmul.f32 %v963_v35, %v946_v22  ;;  %v965_v62 = vmul.f32 %v963_v35, %v947_v30 }
 0x3f2   : > { %968 = vrot.lane.b32.xlu0 %v946_v22, %s4979_s22  ;;  %970 = vrot.lane.b32.xlu1 %v947_v30, %s4979_s22 }
 0x3f6   : > { %982 = vrot.lane.b32.xlu0 %v5476_v19, %s4978_s8  ;;  %1004 = vrot.lane.b32.xlu1 %v5474_v6, %s4979_s22 }
 0x3fa   : > { %1002 = vrot.lane.b32.xlu0 %v5476_v19, %s4979_s22  ;;  %1018 = vrot.lane.b32.xlu1 %v1015_v42, %s4978_s8 }
 0x3fe   : > { %1016 = vrot.lane.b32.xlu0 %v1014_v43, %s4978_s8  ;;  %1038 = vrot.lane.b32.xlu1 %v1015_v42, %s4979_s22  ;;  %v3761_v42 = vld [vmem:[#allocation7 + $0x4] ss:$0 sm:$0xff] }
 0x402   : > { %1036 = vrot.lane.b32.xlu0 %v1014_v43, %s4979_s22 }
 0x457   : > { %v985_v46 = vpop.permute.xlu1 %984 }
 0x458   : > { %v991_v7 = vmul.f32 %v989_v58, %v985_v46 }
 0x460   : > { %v949_v36 = vpop.permute.xlu0 %948  ;;  %v951_v50 = vpop.permute.xlu1 %950 }
 0x461   : > { %v956_v51 = vmul.f32 %v955_v47, %v949_v36  ;;  %v957_v52 = vmul.f32 %v955_v47, %v951_v50  ;;  %v1032_v47 = vmul.f32 %v1031_v29, %v1014_v43 }
 0x463   : > { %v958_v59 = vadd.f32 %v3759_v49, %v956_v51  ;;  %v959_v60 = vadd.f32 %v3759_v49, %v957_v52 }
 0x464   : > { %v969_v0 = vpop.permute.xlu0 %968  ;;  %v971_v57 = vpop.permute.xlu1 %970 }
 0x465   : > { %v966_v1 = vadd.f32 %v964_v61, %v958_v59  ;;  %v976_v2 = vmul.f32 %v975_v53, %v969_v0  ;;  %v967_v3 = vadd.f32 %v965_v62, %v959_v60  ;;  %v977_v4 = vmul.f32 %v975_v53, %v971_v57 }
 0x467   : > { %v979_v55 = vadd.f32 %v977_v4, %v967_v3  ;;  %v978_v13 = vadd.f32 %v976_v2, %v966_v1 }
 0x468   : > { %v983_v9 = vpop.permute.xlu0 %982  ;;  %v1005_v12 = vpop.permute.xlu1 %1004 }
 0x469   : > { %v993_v14 = vadd.f32 %v991_v7, %v979_v55  ;;  %v990_v15 = vmul.f32 %v989_v58, %v983_v9  ;;  %v1011_v25 = vmul.f32 %v1009_v56, %v1005_v12 }
 0x46b   : > { %v992_v23 = vadd.f32 %v990_v15, %v978_v13  ;;  %v1001_v24 = vadd.f32 %v999_v8, %v993_v14 }
 0x46c   : > { %v1003_v27 = vpop.permute.xlu0 %1002  ;;  %v1019_v28 = vpop.permute.xlu1 %1018 }
 0x46d   : > { %v1013_v22 = vadd.f32 %v1011_v25, %v1001_v24  ;;  %v1000_v30 = vadd.f32 %v998_v17, %v992_v23  ;;  %v1010_v33 = vmul.f32 %v1009_v56, %v1003_v27  ;;  %v1025_v6 = vmul.f32 %v1023_v16, %v1019_v28 }
 0x46f   : > { %v1027_v34 = vadd.f32 %v1025_v6, %v1013_v22  ;;  %v1012_v39 = vadd.f32 %v1010_v33, %v1000_v30  ;;  %v5705_v30 = vld [vmem:[#allocation7 + $0x5] ss:$0 sm:$0xff] }
 0x470   : > { %v1017_v11 = vpop.permute.xlu0 %1016  ;;  %v1039_v38 = vpop.permute.xlu1 %1038 }
 0x471   : > { %v1024_v40 = vmul.f32 %v1023_v16, %v1017_v11  ;;  %v1035_v41 = vadd.f32 %v1033_v37, %v1027_v34  ;;  %v1045_v19 = vmul.f32 %v3760_v10, %v1039_v38  ;;  %v1149_v16 = vld [vmem:[#allocation10 + $0x1b] sm:$0xff] }
 0x472   : > { %v5690_v24 = vrot.slane %v1149_v16, %v5414_v20  ;;  %v5697_v25 = vrot.slane %v1149_v16, %v5416_v21  ;;  %v5703_v22 = vrot.slane %v1149_v16, %v5420_v26  ;;  %v5721_v38 = vrot.slane %v1149_v16, %v5424_v32 }
 0x473   : > { %v1026_v46 = vadd.f32 %v1024_v40, %v1012_v39  ;;  %v5506_v50 = vadd.f32 %v1045_v19, %v1035_v41  ;;  %v5726_v19 = vrot.slane %v1149_v16, %v5422_v31 }
 0x474   : > { %v1037_v35 = vpop.permute.xlu0 %1036 }
 0x475   : > { %v1044_v49 = vmul.f32 %v3760_v10, %v1037_v35  ;;  %v1034_v36 = vadd.f32 %v1032_v47, %v1026_v46  ;;  %6493 = vst [vmem:[#allocation24_spill] sm:$0xff] %v5506_v50  ;;  %v6458_v52 = vmax.f32 %v5506_v50, 0.0  ;;  %v5735_v47 = vrot.slane %v1149_v16, %v5429_v45 }
 0x477   : > { %v5508_v44 = vadd.f32 %v1044_v49, %v1034_v36 }
 0x479   : > { %6494 = vst [vmem:[#allocation25_spill] sm:$0xff] %v5508_v44  ;;  %v6459_v51 = vmax.f32 %v5508_v44, 0.0  ;;  %v1862_v44 = vld [vmem:[#allocation13 + $0x148] sm:$0xff] }
 0x47b   : > { %4055 = vmatprep.mubr.f32.mxu0 %v6459_v51 }
 0x47c   : > { %4056 = vmatmul.mubr.f32.vlgmr.msra.gmra.mrb[0].mxu0 %v6458_v52 }
 0x47d   : > { %2059 = vmatprep.mubr.f32.mxu0 %v4977_v5 }
 0x54f   : > { %v4057_v43 = vpop.f32.mrb[0].mxu0 }
 0x550   : > { %v1144_v53 = vadd.f32 %v4057_v43, %v3761_v42  ;;  %v1138_v58 = vpop.f32.mrb[1].mxu0  ;;  %v5741_v43 = vrot.slane %v1149_v16, %v5431_v48 }
 0x551   : > { %v1139_v59 = vadd.f32 %v3761_v42, %v1138_v58 }
 0x552   : > { %v5517_v60 = vmax.f32 %v1144_v53, 0.0 }
 0x553   : > { %v5519_v61 = vmax.f32 %v1139_v59, 0.0  ;;  %v5751_v59 = vrot.slane %v1149_v16, %v5434_v54 }
 0x554   : > { %1157 = vst [vmem:[#allocation2 + $0x10] sm:$0xff] %v5517_v60  ;;  %1413 = vrot.lane.b32.xlu1 %v5517_v60, %s4980_s20 }
 0x555   : > { %1156 = vst [vmem:[#allocation2 + $0x8] sm:$0xff] %v5519_v61 }
 0x558   : > { %1425 = vrot.lane.b32.xlu1 %v5517_v60, %s4981_s21 }
 0x55b   : > { %v5527_v5 = vld [vmem:[#allocation2 + $0x12] sm:$0xff] }
 0x55c   : > { %6495 = vst [vmem:[#allocation26_spill] sm:$0xff] %v5527_v5  ;;  %v5529_v62 = vld [vmem:[#allocation2 + $0x11] sm:$0xff]  ;;  %1633 = vrot.lane.b32.xlu0 %v5527_v5, %s4982_s28  ;;  %v5537_v57 = vld [vmem:[#allocation2 + $0x5] sm:$0xff]  ;;  %1437 = vrot.lane.b32.xlu1 %v5517_v60, %s4978_s8 }
 0x55d   : > { %6496 = vst [vmem:[#allocation27_spill] sm:$0xff] %v5529_v62  ;;  %v5531_v63 = vld [vmem:[#allocation2 + $0x13] sm:$0xff]  ;;  %v5533_v0 = vld [vmem:[#allocation2 + $0xb] sm:$0xff]  ;;  %v1205_v46 = vmul.f32 %v5721_v38, %v5537_v57 }
 0x55e   : > { %6497 = vst [vmem:[#allocation28_spill] sm:$0xff] %v5533_v0  ;;  %v5541_v1 = vld [vmem:[#allocation2 + $0x6] sm:$0xff]  ;;  %v5547_v4 = vld [vmem:[#allocation2 + $0xe] sm:$0xff] }
 0x55f   : > { %v5543_v2 = vld [vmem:[#allocation2 + $0x7] sm:$0xff]  ;;  %v5549_v7 = vld [vmem:[#allocation2 + $0xf] sm:$0xff] }
 0x560   : > { %v5545_v3 = vld [vmem:[#allocation2 + $0xd] sm:$0xff]  ;;  %1165 = vrot.lane.b32.xlu0 %v5537_v57, %s4980_s20  ;;  %1457 = vrot.lane.b32.xlu1 %v5517_v60, %s4979_s22 }
 0x561   : > { %v5551_v55 = vld [vmem:[#allocation2 + $0x9] sm:$0xff] }
 0x562   : > { %6498 = vst [vmem:[#allocation29_spill] sm:$0xff] %v5551_v55  ;;  %v5553_v56 = vld [vmem:[#allocation2 + $0xa] sm:$0xff] }
 0x563   : > { %6499 = vst [vmem:[#allocation30_spill] sm:$0xff] %v5553_v56  ;;  %1739 = vst [vmem:[#allocation2 + $0x8] sm:$0xff] %v5519_v61 }
 0x564   : > { %1740 = vst [vmem:[#allocation2 + $0x10] sm:$0xff] %v5517_v60  ;;  %1177 = vrot.lane.b32.xlu0 %v5537_v57, %s4981_s21  ;;  %1469 = vrot.lane.b32.xlu1 %v5517_v60, %s4982_s28 }
 0x568   : > { %1189 = vrot.lane.b32.xlu0 %v5537_v57, %s4978_s8  ;;  %1481 = vrot.lane.b32.xlu1 %v5517_v60, %s4983_s25 }
 0x56a   : > { %v5743_v53 = vld [vmem:[#allocation2 + $0x7] sm:$0xff] }
 0x56b   : > { %6506 = vst [vmem:[#allocation37_spill] sm:$0xff] %v5743_v53 }
 0x56c   : > { %1209 = vrot.lane.b32.xlu0 %v5537_v57, %s4979_s22  ;;  %1495 = vrot.lane.b32.xlu1 %v5529_v62, %s4980_s20 }
 0x570   : > { %1221 = vrot.lane.b32.xlu0 %v5537_v57, %s4982_s28  ;;  %1507 = vrot.lane.b32.xlu1 %v5529_v62, %s4981_s21 }
 0x574   : > { %1233 = vrot.lane.b32.xlu0 %v5537_v57, %s4983_s25  ;;  %1519 = vrot.lane.b32.xlu1 %v5529_v62, %s4978_s8 }
 0x578   : > { %1247 = vrot.lane.b32.xlu0 %v5541_v1, %s4980_s20  ;;  %1539 = vrot.lane.b32.xlu1 %v5529_v62, %s4979_s22 }
 0x57c   : > { %1259 = vrot.lane.b32.xlu0 %v5541_v1, %s4981_s21  ;;  %1551 = vrot.lane.b32.xlu1 %v5529_v62, %s4982_s28 }
 0x580   : > { %1271 = vrot.lane.b32.xlu0 %v5541_v1, %s4978_s8  ;;  %1563 = vrot.lane.b32.xlu1 %v5529_v62, %s4983_s25 }
 0x584   : > { %1291 = vrot.lane.b32.xlu0 %v5541_v1, %s4979_s22  ;;  %1577 = vrot.lane.b32.xlu1 %v5527_v5, %s4980_s20 }
 0x588   : > { %1303 = vrot.lane.b32.xlu0 %v5541_v1, %s4982_s28  ;;  %1589 = vrot.lane.b32.xlu1 %v5527_v5, %s4981_s21 }
 0x58c   : > { %1315 = vrot.lane.b32.xlu0 %v5541_v1, %s4983_s25  ;;  %1601 = vrot.lane.b32.xlu1 %v5527_v5, %s4978_s8 }
 0x590   : > { %1329 = vrot.lane.b32.xlu0 %v5543_v2, %s4980_s20  ;;  %1621 = vrot.lane.b32.xlu1 %v5527_v5, %s4979_s22 }
 0x594   : > { %1341 = vrot.lane.b32.xlu0 %v5543_v2, %s4981_s21  ;;  %1167 = vrot.lane.b32.xlu1 %v5545_v3, %s4980_s20 }
 0x598   : > { %1353 = vrot.lane.b32.xlu0 %v5543_v2, %s4978_s8  ;;  %1179 = vrot.lane.b32.xlu1 %v5545_v3, %s4981_s21 }
 0x59c   : > { %1373 = vrot.lane.b32.xlu0 %v5543_v2, %s4979_s22  ;;  %1191 = vrot.lane.b32.xlu1 %v5545_v3, %s4978_s8 }
 0x5a0   : > { %1385 = vrot.lane.b32.xlu0 %v5543_v2, %s4982_s28  ;;  %1211 = vrot.lane.b32.xlu1 %v5545_v3, %s4979_s22 }
 0x5a4   : > { %1397 = vrot.lane.b32.xlu0 %v5543_v2, %s4983_s25  ;;  %1223 = vrot.lane.b32.xlu1 %v5545_v3, %s4982_s28 }
 0x5a8   : > { %1659 = vrot.lane.b32.xlu0 %v5531_v63, %s4980_s20  ;;  %1235 = vrot.lane.b32.xlu1 %v5545_v3, %s4983_s25 }
 0x5ac   : > { %1671 = vrot.lane.b32.xlu0 %v5531_v63, %s4981_s21  ;;  %1249 = vrot.lane.b32.xlu1 %v5547_v4, %s4980_s20 }
 0x5b0   : > { %1703 = vrot.lane.b32.xlu0 %v5531_v63, %s4979_s22  ;;  %1261 = vrot.lane.b32.xlu1 %v5547_v4, %s4981_s21 }
 0x5b4   : > { %1411 = vrot.lane.b32.xlu0 %v5519_v61, %s4980_s20  ;;  %1273 = vrot.lane.b32.xlu1 %v5547_v4, %s4978_s8 }
 0x5b8   : > { %1423 = vrot.lane.b32.xlu0 %v5519_v61, %s4981_s21  ;;  %1293 = vrot.lane.b32.xlu1 %v5547_v4, %s4979_s22 }
 0x5bc   : > { %1435 = vrot.lane.b32.xlu0 %v5519_v61, %s4978_s8  ;;  %1305 = vrot.lane.b32.xlu1 %v5547_v4, %s4982_s28 }
 0x5c0   : > { %1455 = vrot.lane.b32.xlu0 %v5519_v61, %s4979_s22  ;;  %1317 = vrot.lane.b32.xlu1 %v5547_v4, %s4983_s25 }
 0x5c4   : > { %1467 = vrot.lane.b32.xlu0 %v5519_v61, %s4982_s28  ;;  %1331 = vrot.lane.b32.xlu1 %v5549_v7, %s4980_s20 }
 0x5c6   : > { %v5661_v8 = vpop.permute.xlu1 %1413 }
 0x5c8   : > { %1479 = vrot.lane.b32.xlu0 %v5519_v61, %s4983_s25  ;;  %1343 = vrot.lane.b32.xlu1 %v5549_v7, %s4981_s21 }
 0x5ca   : > { %v5667_v9 = vpop.permute.xlu1 %1425 }
 0x5cc   : > { %1493 = vrot.lane.b32.xlu0 %v5551_v55, %s4980_s20  ;;  %1355 = vrot.lane.b32.xlu1 %v5549_v7, %s4978_s8 }
 0x5ce   : > { %v5673_v12 = vpop.permute.xlu0 %1633  ;;  %v5675_v13 = vpop.permute.xlu1 %1437 }
 0x5cf   : > { %6500 = vst [vmem:[#allocation31_spill] sm:$0xff] %v5673_v12  ;;  %v1864_v12 = vld [vmem:[#allocation13 + $0x158] sm:$0xff] }
 0x5d0   : > { %1505 = vrot.lane.b32.xlu0 %v5551_v55, %s4981_s21  ;;  %1375 = vrot.lane.b32.xlu1 %v5549_v7, %s4979_s22 }
 0x5d2   : > { %v1166_v14 = vpop.permute.xlu0 %1165  ;;  %v5681_v15 = vpop.permute.xlu1 %1457 }
 0x5d3   : > { %v1173_v29 = vmul.f32 %v5690_v24, %v1166_v14  ;;  %v5753_v14 = vld [vmem:[#allocation10 + $0x23] sm:$0xff] }
 0x5d4   : > { %1517 = vrot.lane.b32.xlu0 %v5551_v55, %s4978_s8  ;;  %1387 = vrot.lane.b32.xlu1 %v5549_v7, %s4982_s28 }
 0x5d5   : > { %v1175_v10 = vadd.f32 %v5705_v30, %v1173_v29 }
 0x5d6   : > { %v1178_v17 = vpop.permute.xlu0 %1177  ;;  %v5687_v23 = vpop.permute.xlu1 %1469 }
 0x5d7   : > { %6501 = vst [vmem:[#allocation32_spill] sm:$0xff] %v5687_v23  ;;  %v1185_v33 = vmul.f32 %v5697_v25, %v1178_v17 }
 0x5d8   : > { %1537 = vrot.lane.b32.xlu0 %v5551_v55, %s4979_s22  ;;  %1399 = vrot.lane.b32.xlu1 %v5549_v7, %s4983_s25 }
 0x5d9   : > { %v1187_v37 = vadd.f32 %v1185_v33, %v1175_v10  ;;  %v5760_v33 = vrot.slane %v5753_v14, %v5414_v20 }
 0x5da   : > { %v1190_v27 = vpop.permute.xlu0 %1189  ;;  %v5699_v28 = vpop.permute.xlu1 %1481 }
 0x5db   : > { %6502 = vst [vmem:[#allocation33_spill] sm:$0xff] %v5699_v28  ;;  %v1197_v11 = vmul.f32 %v5703_v22, %v1190_v27 }
 0x5dc   : > { %1549 = vrot.lane.b32.xlu0 %v5551_v55, %s4982_s28  ;;  %1645 = vrot.lane.b32.xlu1 %v5527_v5, %s4983_s25 }
 0x5dd   : > { %v1199_v41 = vadd.f32 %v1197_v11, %v1187_v37 }
 0x5de   : > { %v1210_v6 = vpop.permute.xlu0 %1209  ;;  %v5712_v34 = vpop.permute.xlu1 %1495 }
 0x5df   : > { %6503 = vst [vmem:[#allocation34_spill] sm:$0xff] %v5712_v34  ;;  %v1207_v36 = vadd.f32 %v1205_v46, %v1199_v41  ;;  %v1217_v42 = vmul.f32 %v5726_v19, %v1210_v6  ;;  %v5762_v6 = vld [vmem:[#allocation2 + $0xf] sm:$0xff]  ;;  %v5774_v46 = vrot.slane %v5753_v14, %v5416_v21  ;;  %v1962_v34 = vld [vmem:[#allocation15 + $0x58] sm:$0xff] }
 0x5e0   : > { %1561 = vrot.lane.b32.xlu0 %v5551_v55, %s4983_s25  ;;  %1683 = vrot.lane.b32.xlu1 %v5531_v63, %s4978_s8  ;;  %6508 = vst [vmem:[#allocation39_spill] sm:$0xff] %v5762_v6  ;;  %v1960_v55 = vld [vmem:[#allocation15 + $0x48] sm:$0xff] }
 0x5e1   : > { %v1219_v27 = vadd.f32 %v1217_v42, %v1207_v36  ;;  %v5782_v36 = vrot.slane %v5753_v14, %v5420_v26 }
 0x5e2   : > { %v1222_v39 = vpop.permute.xlu0 %1221  ;;  %v5723_v40 = vpop.permute.xlu1 %1507 }
 0x5e3   : > { %6504 = vst [vmem:[#allocation35_spill] sm:$0xff] %v5723_v40  ;;  %v1229_v58 = vmul.f32 %v5735_v47, %v1222_v39 }
 0x5e4   : > { %1575 = vrot.lane.b32.xlu0 %v5553_v56, %s4980_s20  ;;  %1715 = vrot.lane.b32.xlu1 %v5531_v63, %s4982_s28 }
 0x5e5   : > { %v1231_v16 = vadd.f32 %v1229_v58, %v1219_v27 }
 0x5e6   : > { %v1234_v35 = vpop.permute.xlu0 %1233  ;;  %v5737_v49 = vpop.permute.xlu1 %1519 }
 0x5e7   : > { %6505 = vst [vmem:[#allocation36_spill] sm:$0xff] %v5737_v49  ;;  %v1241_v29 = vmul.f32 %v5741_v43, %v1234_v35 }
 0x5e8   : > { %1587 = vrot.lane.b32.xlu0 %v5553_v56, %s4981_s21  ;;  %1748 = vrot.lane.b32.xlu1 %v5743_v53, %s4978_s8 }
 0x5e9   : > { %v1243_v39 = vadd.f32 %v1241_v29, %v1231_v16  ;;  %v1853_v29 = vld [vmem:[#allocation13 + $0x100] sm:$0xff]  ;;  %v1854_v16 = vld [vmem:[#allocation13 + $0x108] sm:$0xff] }
 0x5ea   : > { %v1248_v57 = vpop.permute.xlu0 %1247  ;;  %v5755_v17 = vpop.permute.xlu1 %1539 }
 0x5eb   : > { %6507 = vst [vmem:[#allocation38_spill] sm:$0xff] %v5755_v17  ;;  %v1255_v10 = vmul.f32 %v5751_v59, %v1248_v57  ;;  %v1958_v17 = vld [vmem:[#allocation15 + $0x38] sm:$0xff] }
 0x5ec   : > { %1599 = vrot.lane.b32.xlu0 %v5553_v56, %s4978_s8  ;;  %1750 = vrot.lane.b32.xlu1 %v5762_v6, %s4978_s8 }
 0x5ed   : > { %v1257_v35 = vadd.f32 %v1255_v10, %v1243_v39  ;;  %v1287_v10 = vmul.f32 %v5782_v36, %v5541_v1 }
 0x5ee   : > { %v1260_v11 = vpop.permute.xlu0 %1259  ;;  %v5769_v37 = vpop.permute.xlu1 %1551 }
 0x5ef   : > { %6509 = vst [vmem:[#allocation40_spill] sm:$0xff] %v5769_v37  ;;  %v1267_v41 = vmul.f32 %v5760_v33, %v1260_v11  ;;  %v4231_v11 = vpack.c.bf16 %v1854_v16, %v1853_v29  ;;  %v1956_v37 = vld [vmem:[#allocation15 + $0x28] sm:$0xff] }
 0x5f0   : > { %1619 = vrot.lane.b32.xlu0 %v5553_v56, %s4979_s22  ;;  %1768 = vrot.lane.b32.xlu1 %v5743_v53, %s4979_s22  ;;  %v1863_v53 = vld [vmem:[#allocation13 + $0x150] sm:$0xff] }
 0x5f1   : > { %v1269_v57 = vadd.f32 %v1267_v41, %v1257_v35  ;;  %4232 = vmatprep.subr.bf16.mxu1 %v4231_v11  ;;  %v1855_v35 = vld [vmem:[#allocation13 + $0x110] sm:$0xff] }
 0x5f2   : > { %v1272_v42 = vpop.permute.xlu0 %1271  ;;  %v5784_v58 = vpop.permute.xlu1 %1563  ;;  %4234 = vmatpush3.bf16.msra.mxu1 %v4231_v11 }
 0x5f3   : > { %6510 = vst [vmem:[#allocation41_spill] sm:$0xff] %v5784_v58  ;;  %v1279_v27 = vmul.f32 %v5774_v46, %v1272_v42  ;;  %v1856_v42 = vld [vmem:[#allocation13 + $0x118] sm:$0xff]  ;;  %v1953_v58 = vld [vmem:[#allocation15 + $0x10] sm:$0xff] }
 0x5f4   : > { %1631 = vrot.lane.b32.xlu0 %v5553_v56, %s4982_s28  ;;  %1770 = vrot.lane.b32.xlu1 %v5762_v6, %s4979_s22  ;;  %v4235_v29 = vpack.c.bf16 %v1856_v42, %v1855_v35  ;;  %v1859_v35 = vld [vmem:[#allocation13 + $0x130] sm:$0xff]  ;;  %v1860_v42 = vld [vmem:[#allocation13 + $0x138] sm:$0xff] }
 0x5f5   : > { %v1281_v39 = vadd.f32 %v1279_v27, %v1269_v57  ;;  %v1857_v57 = vld [vmem:[#allocation13 + $0x120] sm:$0xff]  ;;  %v1858_v27 = vld [vmem:[#allocation13 + $0x128] sm:$0xff] }
 0x5f6   : > { %v5793_v18 = vpop.permute.xlu0 %1291  ;;  %v5795_v52 = vpop.permute.xlu1 %1577  ;;  %4236 = vmatprep.subr.bf16.mxu1 %v4235_v29  ;;  %v4239_v11 = vpack.c.bf16 %v1858_v27, %v1857_v57  ;;  %v5823_v57 = vld [vmem:[#allocation2 + $0x9] sm:$0xff] }
 0x5f7   : > { %6511 = vst [vmem:[#allocation42_spill] sm:$0xff] %v5795_v52  ;;  %v5797_v41 = vadd.f32 %v1287_v10, %v1281_v39  ;;  %4238 = vmatpush3.bf16.msra.mxu1 %v4235_v29  ;;  %v4243_v29 = vpack.c.bf16 %v1860_v42, %v1859_v35  ;;  %6515 = vst [vmem:[#allocation46_spill] sm:$0xff] %v5823_v57  ;;  %v1861_v27 = vld [vmem:[#allocation13 + $0x140] sm:$0xff]  ;;  %v5831_v42 = vld [vmem:[#allocation2 + $0x11] sm:$0xff] }
 0x5f8   : > { %1643 = vrot.lane.b32.xlu0 %v5553_v56, %s4983_s25  ;;  %1782 = vrot.lane.b32.xlu1 %v5519_v61, %s4978_s8  ;;  %6516 = vst [vmem:[#allocation47_spill] sm:$0xff] %v5831_v42 }
 0x5f9   : > { %4240 = vmatprep.subr.bf16.mxu1 %v4239_v11 }
 0x5fa   : > { %v5803_v16 = vpop.permute.xlu0 %1303  ;;  %v5805_v1 = vpop.permute.xlu1 %1589 }
 0x5fb   : > { %6512 = vst [vmem:[#allocation43_spill] sm:$0xff] %v5805_v1  ;;  %4242 = vmatpush3.bf16.msra.mxu1 %v4239_v11  ;;  %v4247_v11 = vpack.c.bf16 %v1862_v44, %v1861_v27  ;;  %v1865_v44 = vld [vmem:[#allocation13 + $0x160] sm:$0xff]  ;;  %v1866_v27 = vld [vmem:[#allocation13 + $0x168] sm:$0xff] }
 0x5fc   : > { %1657 = vrot.lane.b32.xlu0 %v5533_v0, %s4980_s20  ;;  %1784 = vrot.lane.b32.xlu1 %v5517_v60, %s4978_s8 }
 0x5fd   : > { %4244 = vmatprep.subr.bf16.mxu1 %v4243_v29 }
 0x5fe   : > { %v5811_v10 = vpop.permute.xlu0 %1315  ;;  %v5813_v39 = vpop.permute.xlu1 %1601 }
 0x5ff   : > { %6513 = vst [vmem:[#allocation44_spill] sm:$0xff] %v5813_v39  ;;  %4246 = vmatpush3.bf16.msra.mxu1 %v4243_v29  ;;  %v4251_v29 = vpack.c.bf16 %v1864_v12, %v1863_v53  ;;  %v1867_v12 = vld [vmem:[#allocation13 + $0x170] sm:$0xff]  ;;  %v1868_v53 = vld [vmem:[#allocation13 + $0x178] sm:$0xff] }
 0x600   : > { %1669 = vrot.lane.b32.xlu0 %v5533_v0, %s4981_s21  ;;  %1804 = vrot.lane.b32.xlu1 %v5517_v60, %s4979_s22 }
 0x601   : > { %4248 = vmatprep.subr.bf16.mxu1 %v4247_v11 }
 0x602   : > { %v5819_v51 = vpop.permute.xlu0 %1329  ;;  %v5821_v50 = vpop.permute.xlu1 %1621 }
 0x603   : > { %6514 = vst [vmem:[#allocation45_spill] sm:$0xff] %v5821_v50  ;;  %4250 = vmatpush3.bf16.msra.mxu1 %v4247_v11  ;;  %v4255_v11 = vpack.c.bf16 %v1866_v27, %v1865_v44  ;;  %v1952_v44 = vld [vmem:[#allocation15 + $0x8] sm:$0xff]  ;;  %v1954_v27 = vld [vmem:[#allocation15 + $0x18] sm:$0xff] }
 0x604   : > { %1681 = vrot.lane.b32.xlu0 %v5533_v0, %s4978_s8  ;;  %1816 = vrot.lane.b32.xlu1 %v5823_v57, %s4978_s8 }
 0x605   : > { %4252 = vmatprep.subr.bf16.mxu1 %v4251_v29 }
 0x606   : > { %v5829_v6 = vpop.permute.xlu0 %1341  ;;  %v1168_v35 = vpop.permute.xlu1 %1167 }
 0x607   : > { %4254 = vmatpush3.bf16.msra.mxu1 %v4251_v29  ;;  %v4259_v29 = vpack.c.bf16 %v1868_v53, %v1867_v12  ;;  %v1174_v62 = vmul.f32 %v5690_v24, %v1168_v35  ;;  %v1955_v12 = vld [vmem:[#allocation15 + $0x20] sm:$0xff]  ;;  %v1957_v53 = vld [vmem:[#allocation15 + $0x30] sm:$0xff]  ;;  %v1966_v35 = vld [vmem:[#allocation15 + $0x78] sm:$0xff] }
 0x608   : > { %1701 = vrot.lane.b32.xlu0 %v5533_v0, %s4979_s22  ;;  %1818 = vrot.lane.b32.xlu1 %v5831_v42, %s4978_s8  ;;  %v1959_v24 = vld [vmem:[#allocation15 + $0x40] sm:$0xff] }
 0x609   : > { %4256 = vmatprep.subr.bf16.mxu1 %v4255_v11 }
 0x60a   : > { %v5837_v50 = vpop.permute.xlu0 %1353  ;;  %v1180_v56 = vpop.permute.xlu1 %1179 }
 0x60b   : > { %4258 = vmatpush3.bf16.msra.mxu1 %v4255_v11  ;;  %v4263_v11 = vpack.c.bf16 %v1954_v27, %v1952_v44  ;;  %v1186_v28 = vmul.f32 %v5697_v25, %v1180_v56  ;;  %v4271_v44 = vpack.c.bf16 %v1962_v34, %v1960_v55  ;;  %v1968_v55 = vld [vmem:[#allocation15 + $0x88] sm:$0xff]  ;;  %v1970_v34 = vld [vmem:[#allocation15 + $0x98] sm:$0xff] }
 0x60c   : > { %1713 = vrot.lane.b32.xlu0 %v5533_v0, %s4982_s28  ;;  %1836 = vrot.lane.b32.xlu1 %v5823_v57, %s4979_s22  ;;  %v1951_v57 = vld [vmem:[#allocation15] sm:$0xff] }
 0x60d   : > { %4260 = vmatprep.subr.bf16.mxu1 %v4259_v29  ;;  %v4265_v49 = vpack.c.bf16 %v1953_v58, %v1951_v57  ;;  %4264 = vmatprep.subr.bf16.mxu0 %v4263_v11  ;;  %v1961_v58 = vld [vmem:[#allocation15 + $0x50] sm:$0xff]  ;;  %v1964_v57 = vld [vmem:[#allocation15 + $0x68] sm:$0xff] }
 0x60e   : > { %v5843_v5 = vpop.permute.xlu0 %1373  ;;  %v1192_v39 = vpop.permute.xlu1 %1191  ;;  %v4273_v56 = vpack.c.bf16 %v1961_v58, %v1959_v24  ;;  %v4275_v25 = vpack.c.bf16 %v1966_v35, %v1964_v57  ;;  %v1972_v58 = vld [vmem:[#allocation15 + $0xa8] sm:$0xff] }
 0x60f   : > { %4262 = vmatpush3.bf16.msra.mxu1 %v4259_v29  ;;  %4266 = vmatpush1.bf16.msra.mxu0 %v4265_v49  ;;  %v1963_v49 = vld [vmem:[#allocation15 + $0x60] sm:$0xff] }
 0x610   : > { %1802 = vrot.lane.b32.xlu0 %v5519_v61, %s4979_s22  ;;  %1838 = vrot.lane.b32.xlu1 %v5831_v42, %s4979_s22  ;;  %v4267_v42 = vpack.c.bf16 %v1958_v17, %v1956_v37  ;;  %v1176_v17 = vadd.f32 %v5705_v30, %v1174_v62  ;;  %v1198_v37 = vmul.f32 %v5703_v22, %v1192_v39 }
 0x611   : > { %v1206_v22 = vmul.f32 %v5721_v38, %v5545_v3  ;;  %v4279_v39 = vpack.c.bf16 %v1970_v34, %v1968_v55  ;;  %v1971_v38 = vld [vmem:[#allocation15 + $0xa0] sm:$0xff] }
 0x612   : > { %v5849_v1 = vpop.permute.xlu0 %1385  ;;  %v1212_v52 = vpop.permute.xlu1 %1211  ;;  %4268 = vmatprep.subr.bf16.mxu0 %v4267_v42  ;;  %v1188_v23 = vadd.f32 %v1186_v28, %v1176_v17  ;;  %v1967_v28 = vld [vmem:[#allocation15 + $0x80] sm:$0xff]  ;;  %v1974_v17 = vld [vmem:[#allocation15 + $0xb8] sm:$0xff] }
 0x613   : > { %v4283_v3 = vpack.c.bf16 %v1974_v17, %v1972_v58 }
 0x614   : > { %1725 = vrot.lane.b32.xlu0 %v5533_v0, %s4983_s25  ;;  %v4269_v0 = vpack.c.bf16 %v1957_v53, %v1955_v12  ;;  %v1965_v12 = vld [vmem:[#allocation15 + $0x70] sm:$0xff]  ;;  %v1200_v42 = vadd.f32 %v1198_v37, %v1188_v23 }
 0x615   : > { %v4277_v30 = vpack.c.bf16 %v1965_v12, %v1963_v49 }
 0x616   : > { %v5854_v40 = vpop.permute.xlu0 %1397  ;;  %v1224_v29 = vpop.permute.xlu1 %1223  ;;  %4270 = vmatpush1.bf16.msra.mxu0 %v4269_v0  ;;  %v1969_v0 = vld [vmem:[#allocation15 + $0x90] sm:$0xff]  ;;  %v1208_v24 = vadd.f32 %v1206_v22, %v1200_v42 }
 0x617   : > { %4272 = vmatprep.subr.bf16.mxu0 %v4271_v44  ;;  %v1218_v44 = vmul.f32 %v5726_v19, %v1212_v52  ;;  %v1230_v57 = vmul.f32 %v5735_v47, %v1224_v29  ;;  %v4281_v35 = vpack.c.bf16 %v1969_v0, %v1967_v28  ;;  %v1976_v52 = vld [vmem:[#allocation15 + $0xc8] sm:$0xff]  ;;  %v1978_v19 = vld [vmem:[#allocation15 + $0xd8] sm:$0xff]  ;;  %v1310_v47 = vrot.slane %v5753_v14, %v5422_v31  ;;  %v1977_v28 = vld [vmem:[#allocation15 + $0xd0] sm:$0xff] }
 0x618   : > { %1727 = vrot.lane.b32.xlu0 %v5531_v63, %s4983_s25 }
 0x619   : > { %v1220_v49 = vadd.f32 %v1218_v44, %v1208_v24  ;;  %v1336_v44 = vrot.slane %v5753_v14, %v5431_v48 }
 0x61a   : > { %v5861_v27 = vpop.permute.xlu0 %1659  ;;  %v1236_v11 = vpop.permute.xlu1 %1235  ;;  %4274 = vmatpush1.bf16.msra.mxu0 %v4273_v56  ;;  %v1973_v56 = vld [vmem:[#allocation15 + $0xb0] sm:$0xff] }
 0x61b   : > { %4276 = vmatprep.subr.bf16.mxu0 %v4275_v25  ;;  %v1298_v25 = vrot.slane %v5753_v14, %v5424_v32  ;;  %v1242_v12 = vmul.f32 %v5741_v43, %v1236_v11  ;;  %v1232_v29 = vadd.f32 %v1230_v57, %v1220_v49  ;;  %v4285_v22 = vpack.c.bf16 %v1973_v56, %v1971_v38  ;;  %v1151_v38 = vld [vmem:[#allocation10 + $0x2b] sm:$0xff] }
 0x61c   : > { %v1322_v43 = vrot.slane %v5753_v14, %v5429_v45 }
 0x61d   : > { %v1299_v0 = vmul.f32 %v1298_v25, %v5793_v18  ;;  %v1244_v11 = vadd.f32 %v1242_v12, %v1232_v29 }
 0x61e   : > { %v5863_v53 = vpop.permute.xlu0 %1671  ;;  %v1250_v62 = vpop.permute.xlu1 %1249  ;;  %4278 = vmatpush1.bf16.msra.mxu0 %v4277_v30  ;;  %v4287_v30 = vpack.c.bf16 %v1978_v19, %v1976_v52  ;;  %v1360_v52 = vrot.slane %v1151_v38, %v5414_v20 }
 0x61f   : > { %4280 = vmatprep.subr.bf16.mxu0 %v4279_v39  ;;  %v1256_v34 = vmul.f32 %v5751_v59, %v1250_v62  ;;  %v1975_v39 = vld [vmem:[#allocation15 + $0xc0] sm:$0xff]  ;;  %v1311_v62 = vmul.f32 %v1310_v47, %v5803_v16  ;;  %v1301_v18 = vadd.f32 %v1299_v0, %v5797_v41  ;;  %v1337_v16 = vmul.f32 %v1336_v44, %v5819_v51 }
 0x620   : > { %v1288_v41 = vmul.f32 %v5782_v36, %v5547_v4  ;;  %v1368_v51 = vrot.slane %v1151_v38, %v5416_v21 }
 0x621   : > { %v1258_v17 = vadd.f32 %v1256_v34, %v1244_v11  ;;  %v1313_v12 = vadd.f32 %v1311_v62, %v1301_v18  ;;  %v1361_v34 = vmul.f32 %v1360_v52, %v5837_v50 }
 0x622   : > { %v5868_v23 = vpop.permute.xlu0 %1703  ;;  %v1262_v37 = vpop.permute.xlu1 %1261  ;;  %4282 = vmatpush1.bf16.msra.mxu0 %v4281_v35  ;;  %v4289_v35 = vpack.c.bf16 %v1977_v28, %v1975_v39  ;;  %v1369_v36 = vmul.f32 %v1368_v51, %v5543_v2 }
 0x623   : > { %4284 = vmatprep.subr.bf16.mxu0 %v4283_v3  ;;  %v1268_v24 = vmul.f32 %v5760_v33, %v1262_v37  ;;  %v1323_v3 = vmul.f32 %v1322_v43, %v5811_v10  ;;  %v1348_v33 = vrot.slane %v5753_v14, %v5434_v54 }
 0x625   : > { %v1270_v37 = vadd.f32 %v1268_v24, %v1258_v17  ;;  %v1325_v19 = vadd.f32 %v1323_v3, %v1313_v12  ;;  %v1392_v17 = vrot.slane %v1151_v38, %v5424_v32 }
 0x626   : > { %v5874_v42 = vpop.permute.xlu0 %1411  ;;  %v1274_v55 = vpop.permute.xlu1 %1273  ;;  %4286 = vmatpush1.bf16.msra.mxu0 %v4285_v22 }
 0x627   : > { %v1280_v57 = vmul.f32 %v5774_v46, %v1274_v55  ;;  %4288 = vmatprep.subr.bf16.mxu0 %v4287_v30  ;;  %v1349_v55 = vmul.f32 %v1348_v33, %v5829_v6  ;;  %v1339_v29 = vadd.f32 %v1337_v16, %v1325_v19  ;;  %v1380_v6 = vrot.slane %v1151_v38, %v5420_v26 }
 0x629   : > { %v1282_v46 = vadd.f32 %v1280_v57, %v1270_v37  ;;  %v1351_v39 = vadd.f32 %v1349_v55, %v1339_v29 }
 0x62a   : > { %v5885_v58 = vpop.permute.xlu0 %1423  ;;  %v1294_v59 = vpop.permute.xlu1 %1293  ;;  %4290 = vmatpush1.bf16.msra.mxu0 %v4289_v35 }
 0x62b   : > { %v1290_v22 = vadd.f32 %v1288_v41, %v1282_v46  ;;  %v1300_v30 = vmul.f32 %v1298_v25, %v1294_v59  ;;  %v1363_v24 = vadd.f32 %v1361_v34, %v1351_v39  ;;  %v1404_v25 = vrot.slane %v1151_v38, %v5422_v31 }
 0x62c   : > { %v1430_v41 = vrot.slane %v1151_v38, %v5431_v48  ;;  %v1370_v39 = vmul.f32 %v1368_v51, %v5549_v7 }
 0x62d   : > { %v1302_v62 = vadd.f32 %v1300_v30, %v1290_v22  ;;  %v1371_v18 = vadd.f32 %v1369_v36, %v1363_v24  ;;  %v1405_v19 = vmul.f32 %v1404_v25, %v5854_v40 }
 0x62e   : > { %v1436_v56 = vpop.permute.xlu0 %1435  ;;  %v1306_v49 = vpop.permute.xlu1 %1305  ;;  %v1431_v30 = vmul.f32 %v1430_v41, %v5885_v58 }
 0x62f   : > { %v1312_v28 = vmul.f32 %v1310_v47, %v1306_v49  ;;  %v1381_v47 = vmul.f32 %v1380_v6, %v5843_v5  ;;  %v1393_v49 = vmul.f32 %v1392_v17, %v5849_v1  ;;  %v1442_v1 = vrot.slane %v1151_v38, %v5434_v54 }
 0x631   : > { %v1314_v57 = vadd.f32 %v1312_v28, %v1302_v62  ;;  %v1383_v46 = vadd.f32 %v1381_v47, %v1371_v18  ;;  %v1152_v28 = vld [vmem:[#allocation10 + $0x33] sm:$0xff]  ;;  %v1443_v40 = vmul.f32 %v1442_v1, %v1436_v56 }
 0x632   : > { %v5898_v10 = vpop.permute.xlu0 %1455  ;;  %v1318_v14 = vpop.permute.xlu1 %1317  ;;  %v1462_v47 = vrot.slane %v1152_v28, %v5416_v21  ;;  %v1474_v56 = vrot.slane %v1152_v28, %v5420_v26 }
 0x633   : > { %v1324_v4 = vmul.f32 %v1322_v43, %v1318_v14  ;;  %v1418_v43 = vrot.slane %v1151_v38, %v5429_v45  ;;  %v1395_v14 = vadd.f32 %v1393_v49, %v1383_v46  ;;  %v1486_v46 = vrot.slane %v1152_v28, %v5424_v32 }
 0x635   : > { %v1326_v3 = vadd.f32 %v1324_v4, %v1314_v57  ;;  %v1419_v29 = vmul.f32 %v1418_v43, %v5874_v42  ;;  %v1407_v22 = vadd.f32 %v1405_v19, %v1395_v14  ;;  %v1450_v42 = vrot.slane %v1152_v28, %v5414_v20 }
 0x636   : > { %v5902_v0 = vpop.permute.xlu0 %1467  ;;  %v1332_v11 = vpop.permute.xlu1 %1331 }
 0x637   : > { %v1338_v50 = vmul.f32 %v1336_v44, %v1332_v11  ;;  %v1421_v11 = vadd.f32 %v1419_v29, %v1407_v22  ;;  %v1451_v58 = vmul.f32 %v1450_v42, %v5519_v61  ;;  %v1475_v19 = vmul.f32 %v1474_v56, %v5902_v0 }
 0x638   : > { %v1524_v0 = vrot.slane %v1152_v28, %v5431_v48  ;;  %v1464_v22 = vmul.f32 %v1462_v47, %v5681_v15  ;;  %v6519_v15 = vld [vmem:[#allocation34_spill] sm:$0xff] }
 0x639   : > { %v1340_v12 = vadd.f32 %v1338_v50, %v1326_v3  ;;  %v1433_v36 = vadd.f32 %v1431_v30, %v1421_v11  ;;  %v6517_v11 = vld [vmem:[#allocation32_spill] sm:$0xff] }
 0x63a   : > { %v1480_v59 = vpop.permute.xlu0 %1479  ;;  %v1344_v35 = vpop.permute.xlu1 %1343 }
 0x63b   : > { %v1350_v37 = vmul.f32 %v1348_v33, %v1344_v35  ;;  %v1445_v50 = vadd.f32 %v1443_v40, %v1433_v36 }
 0x63d   : > { %v1352_v44 = vadd.f32 %v1350_v37, %v1340_v12  ;;  %v1453_v3 = vadd.f32 %v1451_v58, %v1445_v50  ;;  %v1463_v37 = vmul.f32 %v1462_v47, %v5898_v10  ;;  %v1452_v10 = vmul.f32 %v1450_v42, %v5517_v60  ;;  %v1153_v58 = vld [vmem:[#allocation10 + $0x3b] sm:$0xff] }
 0x63e   : > { %v1494_v16 = vpop.permute.xlu0 %1493  ;;  %v1356_v2 = vpop.permute.xlu1 %1355  ;;  %v1476_v60 = vmul.f32 %v1474_v56, %v6517_v11  ;;  %v1544_v56 = vrot.slane %v1153_v58, %v5414_v20 }
 0x63f   : > { %v1362_v55 = vmul.f32 %v1360_v52, %v1356_v2  ;;  %v1432_v2 = vmul.f32 %v1430_v41, %v5667_v9 }
 0x641   : > { %v1364_v5 = vadd.f32 %v1362_v55, %v1352_v44  ;;  %v1444_v44 = vmul.f32 %v1442_v1, %v5675_v13  ;;  %v1465_v55 = vadd.f32 %v1463_v37, %v1453_v3  ;;  %v1556_v37 = vrot.slane %v1153_v58, %v5416_v21 }
 0x642   : > { %v1506_v34 = vpop.permute.xlu0 %1505  ;;  %v1376_v33 = vpop.permute.xlu1 %1375 }
 0x643   : > { %v1372_v24 = vadd.f32 %v1370_v39, %v1364_v5  ;;  %v1382_v52 = vmul.f32 %v1380_v6, %v1376_v33  ;;  %v1420_v6 = vmul.f32 %v1418_v43, %v5661_v8  ;;  %v1487_v8 = vmul.f32 %v1486_v46, %v1480_v59 }
 0x644   : > { %v1512_v5 = vrot.slane %v1152_v28, %v5429_v45  ;;  %v1477_v9 = vadd.f32 %v1475_v19, %v1465_v55  ;;  %v6523_v55 = vld [vmem:[#allocation27_spill] sm:$0xff] }
 0x645   : > { %v1384_v35 = vadd.f32 %v1382_v52, %v1372_v24 }
 0x646   : > { %v1518_v62 = vpop.permute.xlu0 %1517  ;;  %v1388_v4 = vpop.permute.xlu1 %1387  ;;  %v1489_v30 = vadd.f32 %v1487_v8, %v1477_v9  ;;  %v1513_v39 = vmul.f32 %v1512_v5, %v1506_v34 }
 0x647   : > { %v1394_v57 = vmul.f32 %v1392_v17, %v1388_v4  ;;  %v1525_v24 = vmul.f32 %v1524_v0, %v1518_v62  ;;  %v6518_v4 = vld [vmem:[#allocation33_spill] sm:$0xff] }
 0x648   : > { %v1488_v36 = vmul.f32 %v1486_v46, %v6518_v4  ;;  %v6521_v62 = vld [vmem:[#allocation29_spill] sm:$0xff] }
 0x649   : > { %v1396_v7 = vadd.f32 %v1394_v57, %v1384_v35 }
 0x64a   : > { %v1538_v18 = vpop.permute.xlu0 %1537  ;;  %v1400_v38 = vpop.permute.xlu1 %1399 }
 0x64b   : > { %v1406_v51 = vmul.f32 %v1404_v25, %v1400_v38  ;;  %v1500_v25 = vrot.slane %v1152_v28, %v5422_v31 }
 0x64d   : > { %v1408_v49 = vadd.f32 %v1406_v51, %v1396_v7  ;;  %v1501_v41 = vmul.f32 %v1500_v25, %v1494_v16  ;;  %v1532_v16 = vrot.slane %v1152_v28, %v5434_v54  ;;  %v1502_v34 = vmul.f32 %v1500_v25, %v6519_v15  ;;  %v6520_v7 = vld [vmem:[#allocation35_spill] sm:$0xff] }
 0x64e   : > { %v1550_v12 = vpop.permute.xlu0 %1549  ;;  %v5923_v17 = vpop.permute.xlu1 %1645  ;;  %v1514_v51 = vmul.f32 %v1512_v5, %v6520_v7  ;;  %v1568_v25 = vrot.slane %v1153_v58, %v5420_v26  ;;  %v1582_v5 = vrot.slane %v1153_v58, %v5424_v32 }
 0x64f   : > { %v1422_v61 = vadd.f32 %v1420_v6, %v1408_v49  ;;  %v1503_v40 = vadd.f32 %v1501_v41, %v1489_v30  ;;  %v1533_v6 = vmul.f32 %v1532_v16, %v6521_v62  ;;  %v1534_v8 = vmul.f32 %v1532_v16, %v6523_v55  ;;  %v6528_v62 = vld [vmem:[#allocation43_spill] sm:$0xff] }
 0x651   : > { %v1434_v43 = vadd.f32 %v1432_v2, %v1422_v61  ;;  %v1515_v42 = vadd.f32 %v1513_v39, %v1503_v40  ;;  %v6522_v2 = vld [vmem:[#allocation36_spill] sm:$0xff]  ;;  %v1545_v61 = vmul.f32 %v1544_v56, %v1538_v18 }
 0x652   : > { %v1562_v14 = vpop.permute.xlu0 %1561  ;;  %v5931_v29 = vpop.permute.xlu1 %1683  ;;  %v1526_v46 = vmul.f32 %v1524_v0, %v6522_v2  ;;  %v1594_v0 = vrot.slane %v1153_v58, %v5422_v31  ;;  %v6525_v18 = vld [vmem:[#allocation40_spill] sm:$0xff]  ;;  %v5962_v2 = vld [vmem:[#allocation10 + $0x4c] sm:$0xff] }
 0x653   : > { %v1446_v33 = vadd.f32 %v1444_v44, %v1434_v43  ;;  %v1527_v38 = vadd.f32 %v1525_v24, %v1515_v42  ;;  %v1557_v43 = vmul.f32 %v1556_v37, %v1550_v12  ;;  %v1569_v39 = vmul.f32 %v1568_v25, %v1562_v14 }
 0x654   : > { %v1558_v11 = vmul.f32 %v1556_v37, %v6525_v18  ;;  %v1606_v12 = vrot.slane %v1153_v58, %v5429_v45 }
 0x655   : > { %v1454_v13 = vadd.f32 %v1452_v10, %v1446_v33  ;;  %v1535_v19 = vadd.f32 %v1533_v6, %v1527_v38  ;;  %v6524_v33 = vld [vmem:[#allocation38_spill] sm:$0xff]  ;;  %v1596_v6 = vmul.f32 %v1594_v0, %v6528_v62 }
 0x656   : > { %v1576_v1 = vpop.permute.xlu0 %1575  ;;  %v5936_v59 = vpop.permute.xlu1 %1715 }
 0x657   : > { %v1466_v52 = vadd.f32 %v1464_v22, %v1454_v13  ;;  %v1546_v22 = vmul.f32 %v1544_v56, %v6524_v33  ;;  %v1547_v30 = vadd.f32 %v1545_v61, %v1535_v19  ;;  %v1583_v24 = vmul.f32 %v1582_v5, %v1576_v1 }
 0x658   : > { %v1614_v1 = vrot.slane %v1153_v58, %v5431_v48  ;;  %v1626_v61 = vrot.slane %v1153_v58, %v5434_v54  ;;  %v1763_v58 = vrot.slane %v5962_v2, %v5416_v21 }
 0x659   : > { %v1478_v57 = vadd.f32 %v1476_v60, %v1466_v52  ;;  %v1559_v60 = vadd.f32 %v1557_v43, %v1547_v30 }
 0x65a   : > { %v1588_v50 = vpop.permute.xlu0 %1587  ;;  %v5941_v35 = vpop.permute.xlu1 %1748 }
 0x65b   : > { %v1490_v47 = vadd.f32 %v1488_v36, %v1478_v57  ;;  %v6526_v36 = vld [vmem:[#allocation41_spill] sm:$0xff]  ;;  %v1571_v16 = vadd.f32 %v1569_v39, %v1559_v60  ;;  %v1595_v15 = vmul.f32 %v1594_v0, %v1588_v50 }
 0x65c   : > { %v1570_v42 = vmul.f32 %v1568_v25, %v6526_v36  ;;  %v5966_v25 = vld [vmem:[#allocation10 + $0x43] sm:$0xff] }
 0x65d   : > { %v1504_v3 = vadd.f32 %v1502_v34, %v1490_v47  ;;  %v6527_v34 = vld [vmem:[#allocation42_spill] sm:$0xff]  ;;  %v1585_v47 = vadd.f32 %v1583_v24, %v1571_v16  ;;  %v1638_v43 = vrot.slane %v5966_v25, %v5414_v20  ;;  %v1650_v39 = vrot.slane %v5966_v25, %v5416_v21  ;;  %v6532_v0 = vld [vmem:[#allocation45_spill] sm:$0xff] }
 0x65e   : > { %v1600_v49 = vpop.permute.xlu0 %1599  ;;  %v1751_v28 = vpop.permute.xlu1 %1750  ;;  %v1584_v38 = vmul.f32 %v1582_v5, %v6527_v34  ;;  %v1628_v18 = vmul.f32 %v1626_v61, %v6532_v0  ;;  %v3764_v34 = vld [vmem:[#allocation7 + $0x6] ss:$0 sm:$0xff] }
 0x65f   : > { %v1516_v44 = vadd.f32 %v1514_v51, %v1504_v3  ;;  %v1607_v7 = vmul.f32 %v1606_v12, %v1600_v49  ;;  %v1597_v37 = vadd.f32 %v1595_v15, %v1585_v47  ;;  %v1755_v49 = vrot.slane %v5962_v2, %v5414_v20 }
 0x660   : > { %v1652_v62 = vmul.f32 %v1650_v39, %v5923_v17 }
 0x661   : > { %v1528_v10 = vadd.f32 %v1526_v46, %v1516_v44  ;;  %v6529_v46 = vld [vmem:[#allocation44_spill] sm:$0xff]  ;;  %v1609_v44 = vadd.f32 %v1607_v7, %v1597_v37  ;;  %v1756_v24 = vmul.f32 %v1755_v49, %v5941_v35 }
 0x662   : > { %v1620_v9 = vpop.permute.xlu0 %1619  ;;  %v5952_v41 = vpop.permute.xlu1 %1768  ;;  %v1608_v19 = vmul.f32 %v1606_v12, %v6529_v46 }
 0x663   : > { %v1536_v13 = vadd.f32 %v1534_v8, %v1528_v10  ;;  %v6530_v10 = vld [vmem:[#allocation26_spill] sm:$0xff]  ;;  %v1758_v46 = vadd.f32 %v3764_v34, %v1756_v24 }
 0x664   : > { %v1616_v5 = vmul.f32 %v1614_v1, %v6530_v10 }
 0x665   : > { %v1548_v40 = vadd.f32 %v1546_v22, %v1536_v13  ;;  %v6531_v22 = vld [vmem:[#allocation30_spill] sm:$0xff]  ;;  %v1757_v13 = vmul.f32 %v1755_v49, %v1751_v28  ;;  %v1676_v28 = vrot.slane %v5966_v25, %v5424_v32 }
 0x666   : > { %v1632_v52 = vpop.permute.xlu0 %1631  ;;  %v1771_v4 = vpop.permute.xlu1 %1770  ;;  %v1615_v30 = vmul.f32 %v1614_v1, %v6531_v22 }
 0x667   : > { %v1560_v57 = vadd.f32 %v1558_v11, %v1548_v40  ;;  %v1627_v40 = vmul.f32 %v1626_v61, %v1620_v9  ;;  %v1759_v7 = vadd.f32 %v3764_v34, %v1757_v13  ;;  %v1775_v9 = vrot.slane %v5962_v2, %v5420_v26 }
 0x668   : > { %v1617_v60 = vadd.f32 %v1615_v30, %v1609_v44  ;;  %v1678_v22 = vmul.f32 %v1676_v28, %v5863_v53  ;;  %v1696_v53 = vrot.slane %v5966_v25, %v5429_v45 }
 0x669   : > { %v1572_v14 = vadd.f32 %v1570_v42, %v1560_v57  ;;  %v6533_v42 = vld [vmem:[#allocation31_spill] sm:$0xff]  ;;  %v1664_v57 = vrot.slane %v5966_v25, %v5420_v26  ;;  %v1776_v17 = vmul.f32 %v1775_v9, %v5952_v41 }
 0x66a   : > { %v1644_v51 = vpop.permute.xlu0 %1643  ;;  %v1783_v56 = vpop.permute.xlu1 %1782  ;;  %v1640_v16 = vmul.f32 %v1638_v43, %v6533_v42 }
 0x66b   : > { %v1586_v3 = vadd.f32 %v1584_v38, %v1572_v14  ;;  %v1639_v38 = vmul.f32 %v1638_v43, %v1632_v52  ;;  %v6534_v14 = vld [vmem:[#allocation37_spill] sm:$0xff]  ;;  %v1651_v1 = vmul.f32 %v1650_v39, %v1644_v51  ;;  %v1789_v52 = vrot.slane %v5962_v2, %v5424_v32 }
 0x66c   : > { %v1764_v47 = vmul.f32 %v1763_v58, %v6534_v14  ;;  %v1666_v44 = vmul.f32 %v1664_v57, %v5861_v27  ;;  %v1797_v39 = vrot.slane %v5962_v2, %v5422_v31  ;;  %v4655_v14 = vld [vmem:[#allocation2 + $0x8] sm:$0xff] }
 0x66d   : > { %v1598_v50 = vadd.f32 %v1596_v6, %v1586_v3  ;;  %v1629_v6 = vadd.f32 %v1627_v40, %v1617_v60  ;;  %v6535_v3 = vld [vmem:[#allocation39_spill] sm:$0xff]  ;;  %v1790_v0 = vmul.f32 %v1789_v52, %v1783_v56 }
 0x66e   : > { %v1658_v55 = vpop.permute.xlu0 %1657  ;;  %v1785_v8 = vpop.permute.xlu1 %1784  ;;  %v1765_v37 = vmul.f32 %v1763_v58, %v6535_v3  ;;  %v1766_v13 = vadd.f32 %v1764_v47, %v1758_v46  ;;  %v1798_v47 = vmul.f32 %v4655_v14, %v1797_v39  ;;  %v1831_v3 = vrot.slane %v5962_v2, %v5434_v54 }
 0x66f   : > { %v1610_v33 = vadd.f32 %v1608_v19, %v1598_v50  ;;  %v1777_v19 = vmul.f32 %v1775_v9, %v1771_v4  ;;  %v1641_v43 = vadd.f32 %v1639_v38, %v1629_v6  ;;  %v1665_v10 = vmul.f32 %v1664_v57, %v1658_v55  ;;  %v6536_v6 = vld [vmem:[#allocation28_spill] sm:$0xff] }
 0x670   : > { %v1767_v51 = vadd.f32 %v1765_v37, %v1759_v7  ;;  %v1778_v24 = vadd.f32 %v1776_v17, %v1766_v13  ;;  %v1823_v9 = vrot.slane %v5962_v2, %v5431_v48  ;;  %v1720_v37 = vrot.slane %v5966_v25, %v5434_v54 }
 0x671   : > { %v1618_v11 = vadd.f32 %v1616_v5, %v1610_v33  ;;  %v1688_v5 = vrot.slane %v5966_v25, %v5422_v31  ;;  %v1791_v33 = vmul.f32 %v1789_v52, %v1785_v8  ;;  %v1653_v30 = vadd.f32 %v1651_v1, %v1641_v43 }
 0x672   : > { %v1670_v12 = vpop.permute.xlu0 %1669  ;;  %v1805_v36 = vpop.permute.xlu1 %1804  ;;  %v1779_v27 = vadd.f32 %v1777_v19, %v1767_v51  ;;  %v1809_v8 = vrot.slane %v5962_v2, %v5429_v45  ;;  %v1697_v1 = vmul.f32 %v1696_v53, %v6536_v6 }
 0x673   : > { %v1630_v15 = vadd.f32 %v1628_v18, %v1618_v11  ;;  %v1677_v58 = vmul.f32 %v1676_v28, %v1670_v12  ;;  %v1667_v60 = vadd.f32 %v1665_v10, %v1653_v30  ;;  %v1690_v12 = vmul.f32 %v1688_v5, %v5931_v29  ;;  %v3763_v10 = vld [vmem:[#allocation10 + $0x4b] ss:$0 sm:$0xff]  ;;  %v3765_v30 = vld [vmem:[#allocation10 + $0x54] ss:$0 sm:$0xff] }
 0x674   : > { %v1793_v41 = vadd.f32 %v1791_v33, %v1779_v27  ;;  %v1811_v7 = vmul.f32 %v1809_v8, %v1805_v36  ;;  %v1698_v29 = vmul.f32 %v1696_v53, %v5531_v63  ;;  %v6537_v33 = vld [vmem:[#allocation46_spill] sm:$0xff] }
 0x675   : > { %v1642_v35 = vadd.f32 %v1640_v16, %v1630_v15  ;;  %v1679_v42 = vadd.f32 %v1677_v58, %v1667_v60  ;;  %v4654_v16 = vld [vmem:[#allocation2 + $0x10] sm:$0xff]  ;;  %v1792_v15 = vadd.f32 %v1790_v0, %v1778_v24  ;;  %v6538_v0 = vld [vmem:[#allocation47_spill] sm:$0xff] }
 0x676   : > { %v1682_v61 = vpop.permute.xlu0 %1681  ;;  %v1817_v50 = vpop.permute.xlu1 %1816  ;;  %v1799_v57 = vmul.f32 %v4654_v16, %v1797_v39 }
 0x677   : > { %v1654_v49 = vadd.f32 %v1652_v62, %v1642_v35  ;;  %v1689_v40 = vmul.f32 %v1688_v5, %v1682_v61  ;;  %v1708_v62 = vrot.slane %v5966_v25, %v5431_v48  ;;  %v1800_v19 = vadd.f32 %v1798_v47, %v1792_v15  ;;  %v1979_v47 = vld [vmem:[#allocation15 + $0xe0] sm:$0xff] }
 0x678   : > { %v1801_v28 = vadd.f32 %v1799_v57, %v1793_v41  ;;  %v1824_v17 = vmul.f32 %v1823_v9, %v1817_v50 }
 0x679   : > { %v1668_v4 = vadd.f32 %v1666_v44, %v1654_v49  ;;  %v1691_v38 = vadd.f32 %v1689_v40, %v1679_v42  ;;  %v1710_v5 = vmul.f32 %v1708_v62, %v5868_v23 }
 0x67a   : > { %v1702_v18 = vpop.permute.xlu0 %1701  ;;  %v1819_v55 = vpop.permute.xlu1 %1818  ;;  %v1813_v43 = vadd.f32 %v1811_v7, %v1801_v28  ;;  %v1981_v28 = vld [vmem:[#allocation15 + $0xf0] sm:$0xff] }
 0x67b   : > { %v1680_v11 = vadd.f32 %v1678_v22, %v1668_v4  ;;  %v1825_v36 = vmul.f32 %v1823_v9, %v1819_v55  ;;  %v1699_v61 = vadd.f32 %v1697_v1, %v1691_v38  ;;  %v1709_v44 = vmul.f32 %v1708_v62, %v1702_v18  ;;  %v1980_v38 = vld [vmem:[#allocation15 + $0xe8] sm:$0xff]  ;;  %v3766_v9 = vld [vmem:[#allocation7 + $0x7] ss:$0 sm:$0xff] }
 0x67c   : > { %v1832_v22 = vmul.f32 %v1831_v3, %v6537_v33  ;;  %v1833_v18 = vmul.f32 %v1831_v3, %v6538_v0  ;;  %v1722_v55 = vmul.f32 %v1720_v37, %v5936_v59  ;;  %v1982_v59 = vld [vmem:[#allocation15 + $0xf8] sm:$0xff]  ;;  %v4293_v7 = vpack.c.bf16 %v1981_v28, %v1979_v47  ;;  %v6539_v1 = vld [vmem:[#allocation25_spill] sm:$0xff]  ;;  %v2110_v33 = vld [vmem:[#allocation16 + $0x10] sm:$0xff] }
 0x67d   : > { %v1692_v34 = vadd.f32 %v1690_v12, %v1680_v11  ;;  %v1827_v2 = vadd.f32 %v1825_v36, %v1813_v43  ;;  %v1711_v39 = vadd.f32 %v1709_v44, %v1699_v61  ;;  %v4291_v14 = vpack.c.bf16 %v1982_v59, %v1980_v38  ;;  %v2124_v61 = vld [vmem:[#allocation16 + $0x80] sm:$0xff]  ;;  %v2125_v44 = vld [vmem:[#allocation16 + $0x88] sm:$0xff]  ;;  %v2131_v0 = vld [vmem:[#allocation16 + $0xb8] sm:$0xff] }
 0x67e   : > { %v1714_v56 = vpop.permute.xlu0 %1713  ;;  %v1837_v35 = vpop.permute.xlu1 %1836  ;;  %v6540_v3 = vmax.f32 %v6539_v1, 0.0  ;;  %v2108_v43 = vld [vmem:[#allocation16] sm:$0xff]  ;;  %v2138_v47 = vld [vmem:[#allocation16 + $0xf0] sm:$0xff]  ;;  %v2139_v28 = vld [vmem:[#allocation16 + $0xf8] sm:$0xff] }
 0x67f   : > { %v1700_v52 = vadd.f32 %v1698_v29, %v1692_v34  ;;  %v1721_v63 = vmul.f32 %v1720_v37, %v1714_v56  ;;  %v1844_v23 = vmul.f32 %v3765_v30, %v1837_v35  ;;  %v1835_v24 = vadd.f32 %v1833_v18, %v1827_v2  ;;  %4292 = vmatprep.subr.bf16.mxu0 %v4291_v14  ;;  %v2120_v59 = vld [vmem:[#allocation16 + $0x60] sm:$0xff]  ;;  %v2121_v14 = vld [vmem:[#allocation16 + $0x68] sm:$0xff]  ;;  %v2226_v1 = vld [vmem:[#allocation15 + $0x118] sm:$0xff] }
 0x680   : > { %4294 = vmatpush1.bf16.msra.mxu0 %v4293_v7  ;;  %v4321_v7 = vpack.c.bf16 %v2121_v14, %v2120_v59 }
 0x681   : > { %v1712_v58 = vadd.f32 %v1710_v5, %v1700_v52  ;;  %v1723_v11 = vadd.f32 %v1721_v63, %v1711_v39  ;;  %v2126_v63 = vld [vmem:[#allocation16 + $0x90] sm:$0xff]  ;;  %v2113_v39 = vld [vmem:[#allocation16 + $0x28] sm:$0xff] }
 0x682   : > { %v1803_v46 = vpop.permute.xlu0 %1802  ;;  %v1839_v25 = vpop.permute.xlu1 %1838 }
 0x683   : > { %v1810_v49 = vmul.f32 %v1809_v8, %v1803_v46  ;;  %v1845_v40 = vmul.f32 %v3765_v30, %v1839_v25  ;;  %v1724_v41 = vadd.f32 %v1722_v55, %v1712_v58  ;;  %v6023_v46 = vld [vmem:[#allocation2] sm:$0xff]  ;;  %v2129_v30 = vld [vmem:[#allocation16 + $0xa8] sm:$0xff]  ;;  %v2112_v58 = vld [vmem:[#allocation16 + $0x20] sm:$0xff] }
 0x684   : > { %v2114_v55 = vld [vmem:[#allocation16 + $0x30] sm:$0xff] }
 0x685   : > { %v1812_v51 = vadd.f32 %v1810_v49, %v1800_v19  ;;  %v1847_v16 = vadd.f32 %v1845_v40, %v1835_v24  ;;  %v6541_v19 = vld [vmem:[#allocation24_spill] sm:$0xff]  ;;  %v4295_v49 = vpack.c.bf16 %v2125_v44, %v2124_v61  ;;  %v2133_v40 = vld [vmem:[#allocation16 + $0xc8] sm:$0xff]  ;;  %v2230_v44 = vld [vmem:[#allocation15 + $0x138] sm:$0xff] }
 0x686   : > { %v1726_v4 = vpop.permute.xlu0 %1725  ;;  %v6542_v36 = vmax.f32 %v6541_v19, 0.0  ;;  %v2228_v61 = vld [vmem:[#allocation15 + $0x128] sm:$0xff] }
 0x687   : > { %v1826_v13 = vadd.f32 %v1824_v17, %v1812_v51  ;;  %v1733_v27 = vmul.f32 %v3763_v10, %v1726_v4  ;;  %4296 = vmatprep.subr.bf16.mxu1 %v4295_v49  ;;  %v2127_v17 = vld [vmem:[#allocation16 + $0x98] sm:$0xff]  ;;  %v2128_v4 = vld [vmem:[#allocation16 + $0xa0] sm:$0xff] }
 0x688   : > { %v4299_v51 = vpack.c.bf16 %v2127_v17, %v2126_v63  ;;  %v4303_v25 = vpack.c.bf16 %v2129_v30, %v2128_v4  ;;  %v2232_v63 = vld [vmem:[#allocation15 + $0x148] sm:$0xff]  ;;  %v2234_v17 = vld [vmem:[#allocation15 + $0x158] sm:$0xff] }
 0x689   : > { %v1834_v60 = vadd.f32 %v1832_v22, %v1826_v13  ;;  %v1735_v8 = vadd.f32 %v1733_v27, %v1723_v11  ;;  %v2111_v22 = vld [vmem:[#allocation16 + $0x18] sm:$0xff]  ;;  %v4305_v13 = vpack.c.bf16 %v2113_v39, %v2112_v58  ;;  %v2130_v27 = vld [vmem:[#allocation16 + $0xb0] sm:$0xff]  ;;  %v2236_v4 = vld [vmem:[#allocation15 + $0x168] sm:$0xff] }
 0x68a   : > { %v1728_v50 = vpop.permute.xlu0 %1727  ;;  %v4301_v2 = vpack.c.bf16 %v2111_v22, %v2110_v33  ;;  %v4307_v18 = vpack.c.bf16 %v2131_v0, %v2130_v27  ;;  %v2115_v11 = vld [vmem:[#allocation16 + $0x38] sm:$0xff]  ;;  %v4335_v33 = vpack.c.bf16 %v2234_v17, %v2232_v63  ;;  %v2231_v22 = vld [vmem:[#allocation15 + $0x140] sm:$0xff]  ;;  %v2240_v27 = vld [vmem:[#allocation15 + $0x188] sm:$0xff] }
 0x68b   : > { %v1846_v53 = vadd.f32 %v1844_v23, %v1834_v60  ;;  %v1734_v12 = vmul.f32 %v3763_v10, %v1728_v50  ;;  %v2109_v10 = vld [vmem:[#allocation16 + $0x8] sm:$0xff]  ;;  %v4309_v60 = vpack.c.bf16 %v2115_v11, %v2114_v55  ;;  %v2132_v23 = vld [vmem:[#allocation16 + $0xc0] sm:$0xff]  ;;  %v2238_v30 = vld [vmem:[#allocation15 + $0x178] sm:$0xff] }
 0x68c   : > { %v4297_v5 = vpack.c.bf16 %v2109_v10, %v2108_v43  ;;  %v2116_v50 = vld [vmem:[#allocation16 + $0x40] sm:$0xff]  ;;  %v4311_v24 = vpack.c.bf16 %v2133_v40, %v2132_v23  ;;  %v4331_v43 = vpack.c.bf16 %v2230_v44, %v2228_v61  ;;  %v4339_v58 = vpack.c.bf16 %v2238_v30, %v2236_v4  ;;  %v2242_v0 = vld [vmem:[#allocation15 + $0x198] sm:$0xff]  ;;  %v2244_v23 = vld [vmem:[#allocation15 + $0x1a8] sm:$0xff] }
 0x68d   : > { %v1736_v42 = vadd.f32 %v1734_v12, %v1724_v41  ;;  %v1848_v57 = vadd.f32 %v1846_v53, %v1735_v8  ;;  %v2117_v41 = vld [vmem:[#allocation16 + $0x48] sm:$0xff]  ;;  %v2134_v8 = vld [vmem:[#allocation16 + $0xd0] sm:$0xff]  ;;  %v2135_v53 = vld [vmem:[#allocation16 + $0xd8] sm:$0xff]  ;;  %v4343_v55 = vpack.c.bf16 %v2242_v0, %v2240_v27 }
 0x68e   : > { %v4313_v12 = vpack.c.bf16 %v2117_v41, %v2116_v50  ;;  %v2227_v10 = vld [vmem:[#allocation15 + $0x120] sm:$0xff]  ;;  %v2246_v40 = vld [vmem:[#allocation15 + $0x1b8] sm:$0xff] }
 0x68f   : > { %v1849_v15 = vadd.f32 %v1847_v16, %v1736_v42  ;;  %v1850_v56 = vmax.f32 %v1848_v57, 0.0  ;;  %v4315_v42 = vpack.c.bf16 %v2135_v53, %v2134_v8  ;;  %v2118_v16 = vld [vmem:[#allocation16 + $0x50] sm:$0xff]  ;;  %v2119_v57 = vld [vmem:[#allocation16 + $0x58] sm:$0xff]  ;;  %v2235_v39 = vld [vmem:[#allocation15 + $0x160] sm:$0xff] }
 0x690   : > { %v2239_v11 = vld [vmem:[#allocation15 + $0x180] sm:$0xff]  ;;  %v2245_v8 = vld [vmem:[#allocation15 + $0x1b0] sm:$0xff] }
 0x691   : > { %v1851_v34 = vmax.f32 %v1849_v15, 0.0  ;;  %4090 = vmatprep.mubr.f32.mxu1 %v1850_v56  ;;  %v2136_v15 = vld [vmem:[#allocation16 + $0xe0] sm:$0xff]  ;;  %v2137_v56 = vld [vmem:[#allocation16 + $0xe8] sm:$0xff] }
 0x692   : > { %v4319_v38 = vpack.c.bf16 %v2137_v56, %v2136_v15  ;;  %v2243_v41 = vld [vmem:[#allocation15 + $0x1a0] sm:$0xff] }
 0x693   : > { %4091 = vmatmul.mubr.f32.vlgmr.msra.gmra.mrb[4].mxu1 %v1851_v34  ;;  %v4317_v34 = vpack.c.bf16 %v2119_v57, %v2118_v16  ;;  %v4349_v53 = vpack.c.bf16 %v2245_v8, %v2243_v41  ;;  %v2247_v41 = vld [vmem:[#allocation15 + $0x1c0] sm:$0xff]  ;;  %v2249_v8 = vld [vmem:[#allocation15 + $0x1d0] sm:$0xff] }
 0x694   : > { %4298 = vmatpush3.bf16.msra.mxu1 %v4297_v5  ;;  %v2229_v5 = vld [vmem:[#allocation15 + $0x130] sm:$0xff] }
 0x695   : > { %4300 = vmatprep.subr.bf16.mxu1 %v4299_v51  ;;  %v4333_v51 = vpack.c.bf16 %v2229_v5, %v2227_v10 }
 0x698   : > { %4302 = vmatpush3.bf16.msra.mxu1 %v4301_v2  ;;  %v2233_v2 = vld [vmem:[#allocation15 + $0x150] sm:$0xff] }
 0x699   : > { %4304 = vmatprep.subr.bf16.mxu1 %v4303_v25  ;;  %v4337_v25 = vpack.c.bf16 %v2233_v2, %v2231_v22 }
 0x69c   : > { %4306 = vmatpush3.bf16.msra.mxu1 %v4305_v13  ;;  %v2237_v13 = vld [vmem:[#allocation15 + $0x170] sm:$0xff] }
 0x69d   : > { %4308 = vmatprep.subr.bf16.mxu1 %v4307_v18  ;;  %v4341_v18 = vpack.c.bf16 %v2237_v13, %v2235_v39 }
 0x6a0   : > { %4310 = vmatpush3.bf16.msra.mxu1 %v4309_v60  ;;  %v2241_v60 = vld [vmem:[#allocation15 + $0x190] sm:$0xff] }
 0x6a1   : > { %4312 = vmatprep.subr.bf16.mxu1 %v4311_v24  ;;  %v4345_v50 = vpack.c.bf16 %v2241_v60, %v2239_v11  ;;  %v4347_v24 = vpack.c.bf16 %v2246_v40, %v2244_v23  ;;  %v2248_v40 = vld [vmem:[#allocation15 + $0x1c8] sm:$0xff] }
 0x6a4   : > { %4314 = vmatpush3.bf16.msra.mxu1 %v4313_v12  ;;  %v1983_v12 = vld [vmem:[#allocation9] ss:$4 sm:$0x3] }
 0x6a5   : > { %4316 = vmatprep.subr.bf16.mxu1 %v4315_v42  ;;  %v1988_v42 = vrot.slane %v1983_v12, %v5414_v20  ;;  %v1992_v16 = vrot.slane %v1983_v12, %v5416_v21  ;;  %v2252_v12 = vld [vmem:[#allocation15 + $0x1e8] sm:$0xff] }
 0x6a8   : > { %4318 = vmatpush3.bf16.msra.mxu1 %v4317_v34 }
 0x6a9   : > { %4320 = vmatprep.subr.bf16.mxu1 %v4319_v38 }
 0x6ac   : > { %4322 = vmatpush3.bf16.msra.mxu1 %v4321_v7 }
 0x766   : > { %v4092_v35 = vpop.f32.mrb[4].mxu1 }
 0x767   : > { %v1940_v62 = vpop.f32.mrb[5].mxu1  ;;  %v1946_v6 = vadd.f32 %v4092_v35, %v3766_v9  ;;  %v2122_v35 = vld [vmem:[#allocation16 + $0x70] sm:$0xff] }
 0x768   : > { %v1941_v29 = vadd.f32 %v3766_v9, %v1940_v62  ;;  %v4323_v9 = vpack.c.bf16 %v2139_v28, %v2138_v47  ;;  %v2123_v62 = vld [vmem:[#allocation16 + $0x78] sm:$0xff] }
 0x769   : > { %v6028_v52 = vadd.f32 %v1946_v6, %v6542_v36  ;;  %v2224_v6 = vld [vmem:[#allocation15 + $0x108] sm:$0xff]  ;;  %v2225_v36 = vld [vmem:[#allocation15 + $0x110] sm:$0xff] }
 0x76a   : > { %v6020_v37 = vadd.f32 %v1941_v29, %v6540_v3  ;;  %v4325_v29 = vpack.c.bf16 %v2123_v62, %v2122_v35  ;;  %4324 = vmatprep.subr.bf16.mxu1 %v4323_v9  ;;  %v2223_v3 = vld [vmem:[#allocation15 + $0x100] sm:$0xff]  ;;  %v4327_v19 = vpack.c.bf16 %v2226_v1, %v2224_v6 }
 0x76b   : > { %v4329_v49 = vpack.c.bf16 %v2225_v36, %v2223_v3 }
 0x76c   : > { %2060 = vmatmul.mubr.f32.vlgmr.msra.gmra.mrb[2].mxu0 %v6020_v37  ;;  %4326 = vmatpush3.bf16.msra.mxu1 %v4325_v29 }
 0x76d   : > { %2065 = vmatprep.mubr.f32.mxu0 %v6023_v46  ;;  %4328 = vmatprep.subr.bf16.mxu0 %v4327_v19 }
 0x76e   : > { %4330 = vmatpush1.bf16.msra.mxu0 %v4329_v49 }
 0x76f   : > { %4332 = vmatprep.subr.bf16.mxu0 %v4331_v43 }
 0x770   : > { %2066 = vmatmul.mubr.f32.gmra.mrb[4].mxu0 %v6028_v52 }
 0x771   : > { %2332 = vmatprep.mubr.f32.mxu0 %v6023_v46 }
 0x772   : > { %4334 = vmatpush1.bf16.msra.mxu0 %v4333_v51 }
 0x773   : > { %4336 = vmatprep.subr.bf16.mxu0 %v4335_v33 }
 0x776   : > { %4338 = vmatpush1.bf16.msra.mxu0 %v4337_v25 }
 0x777   : > { %4340 = vmatprep.subr.bf16.mxu0 %v4339_v58 }
 0x77a   : > { %4342 = vmatpush1.bf16.msra.mxu0 %v4341_v18 }
 0x77b   : > { %4344 = vmatprep.subr.bf16.mxu0 %v4343_v55 }
 0x77e   : > { %4346 = vmatpush1.bf16.msra.mxu0 %v4345_v50  ;;  %v2250_v50 = vld [vmem:[#allocation15 + $0x1d8] sm:$0xff] }
 0x77f   : > { %4348 = vmatprep.subr.bf16.mxu0 %v4347_v24  ;;  %v4351_v24 = vpack.c.bf16 %v2250_v50, %v2248_v40 }
 0x782   : > { %4350 = vmatpush1.bf16.msra.mxu0 %v4349_v53  ;;  %v4353_v53 = vpack.c.bf16 %v2249_v8, %v2247_v41 }
 0x783   : > { %4352 = vmatprep.subr.bf16.mxu0 %v4351_v24 }
 0x786   : > { %4354 = vmatpush1.bf16.msra.mxu0 %v4353_v53 }
 0x83f   : > { %v2061_v57 = vpop.f32.mrb[2].mxu0 }
 0x840   : > { %v2062_v15 = vadd.f32 %v2061_v57, %v1988_v42  ;;  %v2063_v56 = vpop.f32.mrb[3].mxu0  ;;  %v2251_v57 = vld [vmem:[#allocation15 + $0x1e0] sm:$0xff] }
 0x841   : > { %v2064_v34 = vadd.f32 %v2063_v56, %v1992_v16 }
 0x842   : > { %v2072_v38 = vmul.f32 %v2062_v15, %v2062_v15 }
 0x843   : > { %v2073_v59 = vmul.f32 %v2064_v34, %v2064_v34  ;;  %v2067_v14 = vpop.f32.mrb[4].mxu0 }
 0x844   : > { %v2076_v47 = vmul.f32 %v2072_v38, %v2062_v15  ;;  %v2068_v28 = vadd.f32 %v2067_v14, %v1988_v42  ;;  %v2069_v7 = vpop.f32.mrb[5].mxu0  ;;  %v2254_v42 = vld [vmem:[#allocation15 + $0x1f8] sm:$0xff] }
 0x845   : > { %v2077_v9 = vmul.f32 %v2073_v59, %v2064_v34  ;;  %v2070_v35 = vadd.f32 %v2069_v7, %v1992_v16  ;;  %v4355_v16 = vpack.c.bf16 %v2254_v42, %v2252_v12  ;;  %v3767_v38 = vld [vmem:[#allocation7 + $0x8] ss:$0 sm:$0xff] }
 0x846   : > { %v2080_v62 = vmul.f32 0.044715, %v2076_v47  ;;  %v2074_v29 = vmul.f32 %v2068_v28, %v2068_v28 }
 0x847   : > { %v2081_v6 = vmul.f32 0.044715, %v2077_v9  ;;  %v2075_v1 = vmul.f32 %v2070_v35, %v2070_v35  ;;  %4356 = vmatprep.subr.bf16.mxu0 %v4355_v16 }
 0x848   : > { %v2084_v3 = vadd.f32 %v2080_v62, %v2062_v15  ;;  %v2078_v19 = vmul.f32 %v2074_v29, %v2068_v28 }
 0x849   : > { %v2085_v36 = vadd.f32 %v2081_v6, %v2064_v34  ;;  %v2079_v61 = vmul.f32 %v2075_v1, %v2070_v35  ;;  %v2256_v6 = vld [vmem:[#allocation9 + $0x1] ss:$4 sm:$0x3] }
 0x84a   : > { %v2088_v44 = vmul.f32 0.7978846, %v2084_v3  ;;  %v2082_v49 = vmul.f32 0.044715, %v2078_v19  ;;  %v6038_v1 = vld [vmem:[#allocation12] sm:$0xff]  ;;  %v6040_v3 = vld [vmem:[#allocation12 + $0x8] sm:$0xff]  ;;  %v2261_v19 = vrot.slane %v2256_v6, %v5414_v20 }
 0x84b   : > { %v2089_v43 = vmul.f32 0.7978846, %v2085_v36  ;;  %v2083_v10 = vmul.f32 0.044715, %v2079_v61  ;;  %v2265_v36 = vrot.slane %v2256_v6, %v5416_v21  ;;  %v6048_v61 = vrot.slane %v6040_v3, %v5416_v21 }
 0x84c   : > { %4642 = vtanh.f32 %v2088_v44  ;;  %v2086_v5 = vadd.f32 %v2082_v49, %v2068_v28  ;;  %v6052_v44 = vld [vmem:[#allocation3 + $0x8] sm:$0x80] }
 0x84d   : > { %v2087_v63 = vadd.f32 %v2083_v10, %v2070_v35  ;;  %4644 = vtanh.f32 %v2089_v43  ;;  %v2627_v10 = vrot.slane %v6038_v1, %v5434_v54 }
 0x84e   : > { %v2090_v17 = vmul.f32 0.7978846, %v2086_v5 }
 0x84f   : > { %v2091_v51 = vmul.f32 0.7978846, %v2087_v63 }
 0x850   : > { %4646 = vtanh.f32 %v2090_v17  ;;  %v6057_v17 = vld [vmem:[#allocation3 + $0x30] sm:$0x1] }
 0x851   : > { %4648 = vtanh.f32 %v2091_v51  ;;  %v2631_v51 = vrot.slane %v6040_v3, %v5434_v54 }
 0x856   : > { %v4643_v33 = vpop.eup %4642 }
 0x857   : > { %v4645_v22 = vpop.eup %4644  ;;  %v2096_v2 = vadd.f32 1.0, %v4643_v33 }
 0x858   : > { %v2097_v4 = vadd.f32 1.0, %v4645_v22  ;;  %v2437_v22 = vmul.f32 %v6048_v61, %v6052_v44 }
 0x859   : > { %v2100_v30 = vmul.f32 0.5, %v2096_v2  ;;  %v6065_v2 = vld [vmem:[#allocation3 + $0x38] sm:$0x1] }
 0x85a   : > { %v4647_v25 = vpop.eup %4646  ;;  %v2101_v58 = vmul.f32 0.5, %v2097_v4 }
 0x85b   : > { %v4649_v39 = vpop.eup %4648  ;;  %v2098_v13 = vadd.f32 1.0, %v4647_v25  ;;  %v2104_v18 = vmul.f32 %v2100_v30, %v2062_v15  ;;  %v2253_v15 = vld [vmem:[#allocation15 + $0x1f0] sm:$0xff] }
 0x85c   : > { %v2105_v27 = vmul.f32 %v2101_v58, %v2064_v34  ;;  %v2099_v0 = vadd.f32 1.0, %v4649_v39  ;;  %v4357_v56 = vpack.c.bf16 %v2253_v15, %v2251_v57 }
 0x85d   : > { %v2102_v55 = vmul.f32 0.5, %v2098_v13  ;;  %v2636_v13 = vmul.f32 %v2627_v10, %v6057_v17 }
 0x85e   : > { %2209 = vmatprep.mubr.f32.mxu1 %v2105_v27  ;;  %v2103_v11 = vmul.f32 0.5, %v2099_v0  ;;  %4358 = vmatpush1.bf16.msra.mxu0 %v4357_v56 }
 0x85f   : > { %2210 = vmatmul.mubr.f32.vlgmr.msra.gmra.mrb[6].mxu1 %v2104_v18  ;;  %v2106_v23 = vmul.f32 %v2102_v55, %v2068_v28  ;;  %v2637_v55 = vmul.f32 %v2631_v51, %v6065_v2  ;;  %v2650_v24 = vrot.slane %v2636_v13, 1 }
 0x860   : > { %v2107_v60 = vmul.f32 %v2103_v11, %v2070_v35 }
 0x861   : > { %v2652_v53 = vrot.slane %v2637_v55, 1 }
 0x862   : > { %2214 = vmatprep.mubr.f32.mxu1 %v2107_v60  ;;  %v2451_v60 = vrot.slane %v2437_v22, 7 }
 0x863   : > { %2215 = vmatmul.mubr.f32.gmra.mrb[8].mxu1 %v2106_v23 }
 0x864   : > { %2762 = vmatprep.mubr.f32.mxu1 %v6023_v46 }
 0x932   : > { %v3871_v34 = vpop.f32.mrb[6].mxu1 }
 0x933   : > { %v3872_v59 = vpop.f32.mrb[7].mxu1 }
 0x934   : > { %v3873_v14 = vadd.f32 %v3872_v59, %v3871_v34 }
 0x936   : > { %v2212_v47 = vadd.f32 %v3873_v14, %v3767_v38  ;;  %v3874_v28 = vpop.f32.mrb[8].mxu1 }
 0x937   : > { %v3875_v7 = vpop.f32.mrb[9].mxu1 }
 0x938   : > { %v2220_v9 = vadd.f32 %v2212_v47, %v6020_v37  ;;  %v3876_v35 = vadd.f32 %v3875_v7, %v3874_v28  ;;  %v2431_v37 = vrot.slane %v6038_v1, %v5416_v21 }
 0x93a   : > { %v2217_v62 = vadd.f32 %v3876_v35, %v3767_v38  ;;  %2333 = vmatmul.mubr.f32.vlgmr.msra.gmra.mrb[6].mxu0 %v2220_v9 }
 0x93b   : > { %2338 = vmatprep.mubr.f32.mxu0 %v6023_v46  ;;  %v6050_v46 = vld [vmem:[#allocation3] sm:$0x80] }
 0x93c   : > { %v2221_v29 = vadd.f32 %v2217_v62, %v6028_v52  ;;  %v2436_v63 = vmul.f32 %v2431_v37, %v6050_v46  ;;  %v2383_v28 = vrot.slane %v6050_v46, 7 }
 0x93e   : > { %2339 = vmatmul.mubr.f32.gmra.mrb[8].mxu0 %v2221_v29  ;;  %v2448_v18 = vrot.slane %v2436_v63, 7 }
 0xa0d   : > { %v2334_v52 = vpop.f32.mrb[6].mxu0 }
 0xa0e   : > { %v2335_v49 = vadd.f32 %v2334_v52, %v2261_v19  ;;  %v2336_v43 = vpop.f32.mrb[7].mxu0 }
 0xa0f   : > { %v2337_v5 = vadd.f32 %v2336_v43, %v2265_v36 }
 0xa10   : > { %v6061_v33 = vmax.f32 %v2335_v49, 0.0 }
 0xa11   : > { %v6067_v4 = vmax.f32 %v2337_v5, 0.0  ;;  %v2340_v30 = vpop.f32.mrb[8].mxu0  ;;  %v2386_v5 = vrot.slane %v6052_v44, 7 }
 0xa12   : > { %2353 = vst [vmem:[#allocation3 + $0x10] sm:$0xff] %v6061_v33  ;;  %v2341_v25 = vadd.f32 %v2340_v30, %v2261_v19  ;;  %v2342_v58 = vpop.f32.mrb[9].mxu0  ;;  %2497 = vrot.lane.b32.xlu0 %v6061_v33, %s4981_s21  ;;  %v2438_v39 = vmul.f32 %v2431_v37, %v6061_v33  ;;  %v2384_v7 = vrot.slane %v6061_v33, 7  ;;  %v2588_v30 = vrot.slane %v6057_v17, 1 }
 0xa13   : > { %2354 = vst [vmem:[#allocation3 + $0x18] sm:$0xff] %v6067_v4  ;;  %v2343_v27 = vadd.f32 %v2342_v58, %v2265_v36  ;;  %v2439_v0 = vmul.f32 %v6048_v61, %v6067_v4  ;;  %v2387_v63 = vrot.slane %v6067_v4, 7 }
 0xa14   : > { %v6078_v11 = vmax.f32 %v2341_v25, 0.0  ;;  %v2449_v40 = vrot.slane %v2438_v39, 7  ;;  %v2385_v52 = vsel %vm2382_vm1, %v2383_v28, %v2384_v7  ;;  %v2773_v28 = vld [vmem:[#allocation18 + $0x20] sm:$0xff] }
 0xa15   : > { %v6080_v23 = vmax.f32 %v2343_v27, 0.0  ;;  %v2452_v41 = vrot.slane %v2439_v0, 7 }
 0xa16   : > { %2355 = vst [vmem:[#allocation3 + $0x20] sm:$0xff] %v6078_v11  ;;  %2499 = vrot.lane.b32.xlu1 %v6078_v11, %s4981_s21  ;;  %2541 = vrot.lane.b32.xlu0 %v6061_v33, %s4982_s28  ;;  %v2634_v50 = vmul.f32 %v2627_v10, %v6078_v11  ;;  %v6091_v12 = vsel %vm2382_vm1, %v2448_v18, %v2449_v40  ;;  %v2583_v22 = vrot.slane %v6078_v11, 1  ;;  %v2590_v18 = vrot.slane %v6065_v2, 1 }
 0xa17   : > { %2356 = vst [vmem:[#allocation3 + $0x28] sm:$0xff] %v6080_v23  ;;  %v2635_v8 = vmul.f32 %v2631_v51, %v6080_v23  ;;  %v6094_v16 = vsel %vm2382_vm1, %v2451_v60, %v2452_v41  ;;  %v2586_v27 = vrot.slane %v6080_v23, 1  ;;  %v2785_v60 = vld [vmem:[#allocation18 + $0x80] sm:$0xff] }
 0xa18   : > { %v2645_v42 = vrot.slane %v2634_v50, 1  ;;  %v2589_v25 = vsel %vm2581_vm2, %v2583_v22, %v2588_v30  ;;  %v2769_v50 = vld [vmem:[#allocation18] sm:$0xff] }
 0xa19   : > { %v2569_v57 = vld [vmem:[#allocation3 + $0x10] sm:$0xfe]  ;;  %v2648_v15 = vrot.slane %v2635_v8, 1  ;;  %v2591_v55 = vsel %vm2581_vm2, %v2586_v27, %v2590_v18  ;;  %v2787_v8 = vld [vmem:[#allocation18 + $0x90] sm:$0xff] }
 0xa1a   : > { %2543 = vrot.lane.b32.xlu1 %v6078_v11, %s4982_s28  ;;  %2501 = vrot.lane.b32.xlu0 %v6067_v4, %s4981_s21  ;;  %v2632_v56 = vmul.f32 %v2627_v10, %v2569_v57  ;;  %v2570_v34 = vld [vmem:[#allocation3 + $0x18] sm:$0xfe]  ;;  %v6101_v38 = vsel %vm2581_vm2, %v2645_v42, %v2650_v24  ;;  %v2582_v44 = vrot.slane %v2569_v57, 1  ;;  %v2782_v18 = vld [vmem:[#allocation18 + $0x68] sm:$0xff] }
 0xa1b   : > { %v2633_v59 = vmul.f32 %v2631_v51, %v2570_v34  ;;  %v6104_v14 = vsel %vm2581_vm2, %v2648_v15, %v2652_v53  ;;  %v2388_v51 = vsel %vm2382_vm1, %v2386_v5, %v2387_v63  ;;  %v2585_v17 = vrot.slane %v2570_v34, 1  ;;  %v2788_v53 = vld [vmem:[#allocation18 + $0x98] sm:$0xff]  ;;  %v2771_v57 = vld [vmem:[#allocation18 + $0x10] sm:$0xff]  ;;  %v2790_v34 = vld [vmem:[#allocation18 + $0xa8] sm:$0xff] }
 0xa1c   : > { %v2644_v47 = vrot.slane %v2632_v56, 1  ;;  %v2584_v13 = vsel %vm2581_vm2, %v2582_v44, %v2583_v22  ;;  %v2789_v56 = vld [vmem:[#allocation18 + $0xa0] sm:$0xff]  ;;  %v2796_v22 = vld [vmem:[#allocation18 + $0xd8] sm:$0xff] }
 0xa1d   : > { %v2374_v9 = vld [vmem:[#allocation3 + $0x20] sm:$0x7f]  ;;  %v2647_v35 = vrot.slane %v2633_v59, 1  ;;  %v2587_v0 = vsel %vm2581_vm2, %v2585_v17, %v2586_v27  ;;  %v2777_v5 = vld [vmem:[#allocation18 + $0x40] sm:$0xff] }
 0xa1e   : > { %2503 = vrot.lane.b32.xlu1 %v6080_v23, %s4981_s21  ;;  %2545 = vrot.lane.b32.xlu0 %v6067_v4, %s4982_s28  ;;  %v2440_v62 = vmul.f32 %v2431_v37, %v2374_v9  ;;  %v2375_v29 = vld [vmem:[#allocation3 + $0x28] sm:$0x7f]  ;;  %v6113_v6 = vsel %vm2581_vm2, %v2644_v47, %v2645_v42  ;;  %v2389_v49 = vrot.slane %v2374_v9, 7  ;;  %v4367_v42 = vpack.c.bf16 %v2788_v53, %v2787_v8  ;;  %v2791_v9 = vld [vmem:[#allocation18 + $0xb0] sm:$0xff]  ;;  %v2780_v44 = vld [vmem:[#allocation18 + $0x58] sm:$0xff] }
 0xa1f   : > { %v2441_v19 = vmul.f32 %v6048_v61, %v2375_v29  ;;  %v6117_v36 = vsel %vm2581_vm2, %v2647_v35, %v2648_v15  ;;  %v2391_v58 = vrot.slane %v2375_v29, 7  ;;  %v2772_v15 = vld [vmem:[#allocation18 + $0x18] sm:$0xff]  ;;  %v4371_v47 = vpack.c.bf16 %v2790_v34, %v2789_v56 }
 0xa20   : > { %v2454_v46 = vrot.slane %v2440_v62, 7  ;;  %v2390_v61 = vsel %vm2382_vm1, %v2384_v7, %v2389_v49  ;;  %v4369_v59 = vpack.c.bf16 %v2772_v15, %v2771_v57  ;;  %v2774_v7 = vld [vmem:[#allocation18 + $0x28] sm:$0xff]  ;;  %v2792_v35 = vld [vmem:[#allocation18 + $0xb8] sm:$0xff]  ;;  %v6543_v34 = vlaneseq }
 0xa21   : > { %v2456_v43 = vrot.slane %v2441_v19, 7  ;;  %v2392_v39 = vsel %vm2382_vm1, %v2387_v63, %v2391_v58  ;;  %v4373_v62 = vpack.c.bf16 %v2774_v7, %v2773_v28  ;;  %v4375_v29 = vpack.c.bf16 %v2792_v35, %v2791_v9  ;;  %v2775_v19 = vld [vmem:[#allocation18 + $0x30] sm:$0xff]  ;;  %v2794_v49 = vld [vmem:[#allocation18 + $0xc8] sm:$0xff]  ;;  %v2358_v7 = vld [vmem:[#allocation9 + $0x2] ss:$4 sm:$0x3] }
 0xa22   : > { %2547 = vrot.lane.b32.xlu1 %v6080_v23, %s4982_s28  ;;  %2397 = vrot.lane.b32.xlu0 %v2385_v52, %s4981_s21  ;;  %v6124_v37 = vsel %vm2382_vm1, %v2449_v40, %v2454_v46  ;;  %v2786_v40 = vld [vmem:[#allocation18 + $0x88] sm:$0xff]  ;;  %v2776_v46 = vld [vmem:[#allocation18 + $0x38] sm:$0xff]  ;;  %v2779_v58 = vld [vmem:[#allocation18 + $0x50] sm:$0xff]  ;;  %v2415_v9 = vrot.slane %v6038_v1, %v5414_v20  ;;  %v2419_v35 = vrot.slane %v6040_v3, %v5414_v20 }
 0xa23   : > { %v6127_v10 = vsel %vm2382_vm1, %v2452_v41, %v2456_v43  ;;  %v4363_v24 = vpack.c.bf16 %v2786_v40, %v2785_v60  ;;  %v2770_v41 = vld [vmem:[#allocation18 + $0x8] sm:$0xff]  ;;  %v4377_v43 = vpack.c.bf16 %v2776_v46, %v2775_v19  ;;  %v4385_v17 = vpack.c.bf16 %v2780_v44, %v2779_v58  ;;  %v2800_v60 = vld [vmem:[#allocation18 + $0xf8] sm:$0xff] }
 0xa24   : > { %v4365_v2 = vpack.c.bf16 %v2770_v41, %v2769_v50  ;;  %v2778_v63 = vld [vmem:[#allocation18 + $0x48] sm:$0xff]  ;;  %v2367_v19 = vrot.slane %v2358_v7, %v5416_v21 }
 0xa25   : > { %4364 = vmatprep.subr.bf16.mxu0 %v4363_v24  ;;  %v4381_v30 = vpack.c.bf16 %v2778_v63, %v2777_v5  ;;  %v2482_v5 = vrot.slane %v6038_v1, %v5420_v26  ;;  %v2486_v63 = vrot.slane %v6040_v3, %v5420_v26 }
 0xa26   : > { %2399 = vrot.lane.b32.xlu1 %v2390_v61, %s4981_s21  ;;  %2466 = vrot.lane.b32.xlu0 %v2385_v52, %s4982_s28  ;;  %v2793_v52 = vld [vmem:[#allocation18 + $0xc0] sm:$0xff] }
 0xa27   : > { %4366 = vmatpush3.bf16.msra.mxu0 %v4365_v2 }
 0xa28   : > { %4368 = vmatprep.subr.bf16.mxu0 %v4367_v42 }
 0xa2a   : > { %2468 = vrot.lane.b32.xlu1 %v2390_v61, %s4982_s28  ;;  %2401 = vrot.lane.b32.xlu0 %v2388_v51, %s4981_s21  ;;  %v4379_v61 = vpack.c.bf16 %v2794_v49, %v2793_v52 }
 0xa2b   : > { %4370 = vmatpush3.bf16.msra.mxu0 %v4369_v59  ;;  %v6164_v59 = vand.u32 127, %v6543_v34 }
 0xa2c   : > { %4372 = vmatprep.subr.bf16.mxu0 %v4371_v47 }
 0xa2d   : > { %vm2407_vm3 = vcmp.lt.s32.totalorder %v6164_v59, 16  ;;  %vm2474_vm4 = vcmp.lt.s32.totalorder %v6164_v59, 112  ;;  %v2694_v59 = vld [vmem:[%s6544_s17] sm:$0xff] }
 0xa2e   : > { %2598 = vrot.lane.b32.xlu1 %v2589_v25, %s4981_s21  ;;  %2470 = vrot.lane.b32.xlu0 %v2388_v51, %s4982_s28  ;;  %v2795_v51 = vld [vmem:[#allocation18 + $0xd0] sm:$0xff] }
 0xa2f   : > { %4374 = vmatpush3.bf16.msra.mxu0 %v4373_v62 }
 0xa30   : > { %4376 = vmatprep.subr.bf16.mxu0 %v4375_v29  ;;  %v2363_v29 = vrot.slane %v2358_v7, %v5414_v20  ;;  %v2556_v7 = vrot.slane %v6038_v1, %v5429_v45 }
 0xa32   : > { %2403 = vrot.lane.b32.xlu1 %v2392_v39, %s4981_s21  ;;  %2596 = vrot.lane.b32.xlu0 %v2584_v13, %s4981_s21 }
 0xa33   : > { %4378 = vmatpush3.bf16.msra.mxu0 %v4377_v43 }
 0xa34   : > { %4380 = vmatprep.subr.bf16.mxu0 %v4379_v61 }
 0xa36   : > { %2472 = vrot.lane.b32.xlu1 %v2392_v39, %s4982_s28  ;;  %2662 = vrot.lane.b32.xlu0 %v2584_v13, %s4982_s28  ;;  %v2797_v39 = vld [vmem:[#allocation18 + $0xe0] sm:$0xff]  ;;  %v2798_v13 = vld [vmem:[#allocation18 + $0xe8] sm:$0xff] }
 0xa37   : > { %4382 = vmatpush3.bf16.msra.mxu0 %v4381_v30  ;;  %v4387_v27 = vpack.c.bf16 %v2798_v13, %v2797_v39  ;;  %v2512_v30 = vrot.slane %v6038_v1, %v5424_v32 }
 0xa3a   : > { %2664 = vrot.lane.b32.xlu1 %v2589_v25, %s4982_s28  ;;  %2600 = vrot.lane.b32.xlu0 %v2587_v0, %s4981_s21  ;;  %v4383_v25 = vpack.c.bf16 %v2796_v22, %v2795_v51  ;;  %v2528_v51 = vrot.slane %v6038_v1, %v5422_v31  ;;  %v2532_v22 = vrot.slane %v6040_v3, %v5422_v31 }
 0xa3c   : > { %4384 = vmatprep.subr.bf16.mxu0 %v4383_v25  ;;  %v2516_v25 = vrot.slane %v6040_v3, %v5424_v32  ;;  %v2534_v34 = vmul.f32 %v2532_v22, %v6067_v4 }
 0xa3d   : > { %4386 = vmatpush3.bf16.msra.mxu0 %v4385_v17 }
 0xa3e   : > { %2602 = vrot.lane.b32.xlu1 %v2591_v55, %s4981_s21  ;;  %2666 = vrot.lane.b32.xlu0 %v2587_v0, %s4982_s28  ;;  %v2781_v0 = vld [vmem:[#allocation18 + $0x60] sm:$0xff] }
 0xa3f   : > { %v4389_v40 = vpack.c.bf16 %v2782_v18, %v2781_v0  ;;  %4388 = vmatprep.subr.bf16.mxu0 %v4387_v27 }
 0xa41   : > { %4390 = vmatpush3.bf16.msra.mxu0 %v4389_v40 }
 0xa42   : > { %2668 = vrot.lane.b32.xlu1 %v2591_v55, %s4982_s28  ;;  %v2799_v55 = vld [vmem:[#allocation18 + $0xf0] sm:$0xff] }
 0xa43   : > { %v4391_v50 = vpack.c.bf16 %v2800_v60, %v2799_v55 }
 0xa45   : > { %4392 = vmatprep.subr.bf16.mxu0 %v4391_v50 }
 0xa84   : > { %v2498_v24 = vpop.permute.xlu0 %2497 }
 0xa88   : > { %v2500_v41 = vpop.permute.xlu1 %2499  ;;  %v6157_v8 = vpop.permute.xlu0 %2541 }
 0xa8c   : > { %v6159_v53 = vpop.permute.xlu1 %2543  ;;  %v2502_v2 = vpop.permute.xlu0 %2501 }
 0xa8d   : > { %v2505_v17 = vsel %vm2407_vm3, %v2498_v24, %v2502_v2  ;;  %v2507_v27 = vsel %vm2407_vm3, %v2502_v2, %v2498_v24  ;;  %v2560_v24 = vrot.slane %v6040_v3, %v5429_v45 }
 0xa8e   : > { %v2517_v2 = vmul.f32 %v2512_v30, %v2507_v27 }
 0xa90   : > { %v2504_v42 = vpop.permute.xlu1 %2503  ;;  %v2546_v57 = vpop.permute.xlu0 %2545 }
 0xa91   : > { %v2508_v27 = vsel %vm2407_vm3, %v2504_v42, %v2500_v41 }
 0xa94   : > { %v6161_v15 = vpop.permute.xlu1 %2547  ;;  %v2398_v56 = vpop.permute.xlu0 %2397 }
 0xa98   : > { %v2400_v47 = vpop.permute.xlu1 %2399  ;;  %v2467_v28 = vpop.permute.xlu0 %2466 }
 0xa9c   : > { %v2469_v62 = vpop.permute.xlu1 %2468  ;;  %v2402_v46 = vpop.permute.xlu0 %2401 }
 0xa9d   : > { %v2408_v52 = vsel %vm2407_vm3, %v2398_v56, %v2402_v46  ;;  %v2410_v49 = vsel %vm2407_vm3, %v2402_v46, %v2398_v56  ;;  %v2533_v56 = vmul.f32 %v2528_v51, %v6061_v33  ;;  %v2518_v46 = vmul.f32 %v2516_v25, %v2505_v17 }
 0xa9e   : > { %v2420_v43 = vmul.f32 %v2415_v9, %v2410_v49  ;;  %v2421_v61 = vmul.f32 %v2419_v35, %v2408_v52  ;;  %v2506_v17 = vsel %vm2407_vm3, %v2500_v41, %v2504_v42  ;;  %v2611_v42 = vrot.slane %v6038_v1, %v5431_v48 }
 0xa9f   : > { %v2552_v1 = vsel %vm2474_vm4, %v6161_v15, %v6159_v53 }
 0xaa0   : > { %v2424_v58 = vadd.f32 %v2420_v43, %v2363_v29  ;;  %v2425_v44 = vadd.f32 %v2421_v61, %v2367_v19  ;;  %v6190_v39 = vpop.permute.xlu1 %2598  ;;  %v2471_v13 = vpop.permute.xlu0 %2470  ;;  %v2536_v43 = vmul.f32 %v2532_v22, %v6080_v23  ;;  %v2551_v23 = vsel %vm2474_vm4, %v2546_v57, %v6157_v8 }
 0xaa1   : > { %v2475_v0 = vsel %vm2474_vm4, %v2467_v28, %v2471_v13  ;;  %v2477_v18 = vsel %vm2474_vm4, %v2471_v13, %v2467_v28 }
 0xaa2   : > { %v2462_v55 = vadd.f32 %v6091_v12, %v2424_v58  ;;  %v2463_v60 = vadd.f32 %v6094_v16, %v2425_v44  ;;  %v2487_v40 = vmul.f32 %v2482_v5, %v2475_v0  ;;  %v2488_v50 = vmul.f32 %v2486_v63, %v2477_v18 }
 0xaa3   : > { %v2535_v16 = vmul.f32 %v2528_v51, %v6078_v11  ;;  %v2549_v11 = vsel %vm2474_vm4, %v6157_v8, %v2546_v57 }
 0xaa4   : > { %v2491_v52 = vadd.f32 %v2487_v40, %v2462_v55  ;;  %v2492_v28 = vadd.f32 %v2488_v50, %v2463_v60  ;;  %v2404_v49 = vpop.permute.xlu1 %2403  ;;  %v2597_v12 = vpop.permute.xlu0 %2596  ;;  %v2615_v55 = vrot.slane %v6040_v3, %v5431_v48  ;;  %v2519_v60 = vmul.f32 %v2512_v30, %v2508_v27 }
 0xaa5   : > { %v2409_v33 = vsel %vm2407_vm3, %v2400_v47, %v2404_v49  ;;  %v2411_v4 = vsel %vm2407_vm3, %v2404_v49, %v2400_v47  ;;  %v2520_v40 = vmul.f32 %v2516_v25, %v2506_v17  ;;  %v2561_v50 = vmul.f32 %v2556_v7, %v2549_v11 }
 0xaa6   : > { %v2521_v61 = vadd.f32 %v2517_v2, %v2491_v52  ;;  %v2522_v58 = vadd.f32 %v2518_v46, %v2492_v28  ;;  %v2422_v44 = vmul.f32 %v2415_v9, %v2411_v4  ;;  %v2423_v13 = vmul.f32 %v2419_v35, %v2409_v33 }
 0xaa7   : > { %v2564_v33 = vmul.f32 %v2560_v24, %v2552_v1 }
 0xaa8   : > { %v2426_v51 = vadd.f32 %v2422_v44, %v2363_v29  ;;  %v2427_v47 = vadd.f32 %v2423_v13, %v2367_v19  ;;  %v2473_v22 = vpop.permute.xlu1 %2472  ;;  %v2663_v0 = vpop.permute.xlu0 %2662  ;;  %v2537_v9 = vadd.f32 %v2533_v56, %v2521_v61  ;;  %v2538_v35 = vadd.f32 %v2534_v34, %v2522_v58  ;;  %v3768_v44 = vld [vmem:[#allocation12 + $0x10] ss:$0 sm:$0xff]  ;;  %v3769_v13 = vld [vmem:[#allocation12 + $0x18] ss:$0 sm:$0xff] }
 0xaa9   : > { %v2476_v18 = vsel %vm2474_vm4, %v2469_v62, %v2473_v22  ;;  %v2478_v41 = vsel %vm2474_vm4, %v2473_v22, %v2469_v62  ;;  %v2562_v56 = vmul.f32 %v2560_v24, %v2551_v23  ;;  %v2550_v62 = vsel %vm2474_vm4, %v6159_v53, %v6161_v15 }
 0xaaa   : > { %v2464_v8 = vadd.f32 %v6124_v37, %v2426_v51  ;;  %v2465_v57 = vadd.f32 %v6127_v10, %v2427_v47  ;;  %v2489_v29 = vmul.f32 %v2482_v5, %v2476_v18  ;;  %v2490_v19 = vmul.f32 %v2486_v63, %v2478_v41 }
 0xaab   : > { %v2565_v5 = vadd.f32 %v2561_v50, %v2537_v9  ;;  %v2566_v63 = vadd.f32 %v2562_v56, %v2538_v35  ;;  %v2563_v49 = vmul.f32 %v2556_v7, %v2550_v62 }
 0xaac   : > { %v2493_v3 = vadd.f32 %v2489_v29, %v2464_v8  ;;  %v2494_v37 = vadd.f32 %v2490_v19, %v2465_v57  ;;  %v2665_v34 = vpop.permute.xlu1 %2664  ;;  %v2601_v10 = vpop.permute.xlu0 %2600 }
 0xaad   : > { %v2604_v30 = vsel %vm2407_vm3, %v2597_v12, %v2601_v10  ;;  %v2606_v25 = vsel %vm2407_vm3, %v2601_v10, %v2597_v12  ;;  %v2874_v10 = vld [vmem:[#allocation13 + $0x190] sm:$0xff] }
 0xaae   : > { %v2523_v2 = vadd.f32 %v2519_v60, %v2493_v3  ;;  %v2524_v46 = vadd.f32 %v2520_v40, %v2494_v37  ;;  %v2616_v52 = vmul.f32 %v2611_v42, %v2606_v25  ;;  %v2617_v28 = vmul.f32 %v2615_v55, %v2604_v30  ;;  %v2872_v37 = vld [vmem:[#allocation13 + $0x180] sm:$0xff]  ;;  %v2875_v30 = vld [vmem:[#allocation13 + $0x198] sm:$0xff] }
 0xaaf   : > { %v4399_v25 = vpack.c.bf16 %v2875_v30, %v2874_v10  ;;  %v3262_v30 = vld [vmem:[#allocation13 + $0x268] sm:$0xff] }
 0xab0   : > { %v2620_v4 = vadd.f32 %v2616_v52, %v2565_v5  ;;  %v2621_v53 = vadd.f32 %v2617_v28, %v2566_v63  ;;  %v2539_v15 = vadd.f32 %v2535_v16, %v2523_v2  ;;  %v2540_v61 = vadd.f32 %v2536_v43, %v2524_v46  ;;  %v2603_v58 = vpop.permute.xlu1 %2602  ;;  %v2667_v17 = vpop.permute.xlu0 %2666  ;;  %v2876_v2 = vld [vmem:[#allocation13 + $0x1a0] sm:$0xff]  ;;  %v2877_v46 = vld [vmem:[#allocation13 + $0x1a8] sm:$0xff]  ;;  %v2878_v28 = vld [vmem:[#allocation13 + $0x1b0] sm:$0xff] }
 0xab1   : > { %v2605_v27 = vsel %vm2407_vm3, %v6190_v39, %v2603_v58  ;;  %v2607_v12 = vsel %vm2407_vm3, %v2603_v58, %v6190_v39  ;;  %v2670_v7 = vsel %vm2474_vm4, %v2663_v0, %v2667_v17  ;;  %v2672_v24 = vsel %vm2474_vm4, %v2667_v17, %v2663_v0  ;;  %v2883_v58 = vld [vmem:[#allocation13 + $0x1d8] sm:$0xff]  ;;  %v2885_v17 = vld [vmem:[#allocation13 + $0x1e8] sm:$0xff] }
 0xab2   : > { %v2567_v16 = vadd.f32 %v2563_v49, %v2539_v15  ;;  %v2568_v43 = vadd.f32 %v2564_v33, %v2540_v61  ;;  %v2618_v11 = vmul.f32 %v2611_v42, %v2607_v12  ;;  %v2619_v23 = vmul.f32 %v2615_v55, %v2605_v27  ;;  %v2879_v49 = vld [vmem:[#allocation13 + $0x1b8] sm:$0xff]  ;;  %v2882_v61 = vld [vmem:[#allocation13 + $0x1d0] sm:$0xff] }
 0xab3   : > { %v2658_v51 = vadd.f32 %v6113_v6, %v2620_v4  ;;  %v2659_v47 = vadd.f32 %v6117_v36, %v2621_v53  ;;  %v2682_v22 = vmul.f32 %v3768_v44, %v2670_v7  ;;  %v2683_v9 = vmul.f32 %v3769_v13, %v2672_v24  ;;  %v2880_v4 = vld [vmem:[#allocation13 + $0x1c0] sm:$0xff]  ;;  %v2881_v53 = vld [vmem:[#allocation13 + $0x1c8] sm:$0xff]  ;;  %v2886_v24 = vld [vmem:[#allocation13 + $0x1f0] sm:$0xff] }
 0xab4   : > { %v2622_v35 = vadd.f32 %v2618_v11, %v2567_v16  ;;  %v2623_v18 = vadd.f32 %v2619_v23, %v2568_v43  ;;  %v2669_v41 = vpop.permute.xlu1 %2668  ;;  %v4984_v5 = vmov 0.0|0.0   ;;  %v4402_v52 = vpack.c.bf16 %v2877_v46, %v2876_v2  ;;  %v2887_v16 = vld [vmem:[#allocation13 + $0x1f8] sm:$0xff]  ;;  %v3263_v2 = vld [vmem:[#allocation13 + $0x270] sm:$0xff] }
 0xab5   : > { %v2686_v39 = vadd.f32 %v2682_v22, %v2658_v51  ;;  %v2687_v8 = vadd.f32 %v2683_v9, %v2659_v47  ;;  %v2671_v57 = vsel %vm2474_vm4, %v2665_v34, %v2669_v41  ;;  %v2673_v0 = vsel %vm2474_vm4, %v2669_v41, %v2665_v34  ;;  %v2873_v34 = vld [vmem:[#allocation13 + $0x188] sm:$0xff]  ;;  %v4657_v11 = vld [vmem:[#allocation2] sm:$0xff] }
 0xab6   : > { %v2660_v42 = vadd.f32 %v6101_v38, %v2622_v35  ;;  %v2661_v55 = vadd.f32 %v6104_v14, %v2623_v18  ;;  %v2684_v6 = vmul.f32 %v3768_v44, %v2671_v57  ;;  %v2685_v29 = vmul.f32 %v3769_v13, %v2673_v0  ;;  %v2783_v38 = vld [vmem:[#allocation18 + $0x70] sm:$0xff]  ;;  %v2784_v14 = vld [vmem:[#allocation18 + $0x78] sm:$0xff]  ;;  %v2884_v13 = vld [vmem:[#allocation13 + $0x1e0] sm:$0xff] }
 0xab7   : > { %v2690_v60 = vmax.f32 %v2686_v39, 0.0  ;;  %v2691_v40 = vmax.f32 %v2687_v8, 0.0  ;;  %v4393_v3 = vpack.c.bf16 %v2784_v14, %v2783_v38  ;;  %v4396_v63 = vpack.c.bf16 %v2873_v34, %v2872_v37  ;;  %v3771_v22 = vld [vmem:[#allocation7 + $0x9] ss:$0 sm:$0xff]  ;;  %v3257_v38 = vld [vmem:[#allocation13 + $0x240] sm:$0xff]  ;;  %v3258_v14 = vld [vmem:[#allocation13 + $0x248] sm:$0xff] }
 0xab8   : > { %v2688_v36 = vadd.f32 %v2684_v6, %v2660_v42  ;;  %v2689_v19 = vadd.f32 %v2685_v29, %v2661_v55  ;;  %v4405_v33 = vpack.c.bf16 %v2879_v49, %v2878_v28  ;;  %v4408_v15 = vpack.c.bf16 %v2881_v53, %v2880_v4  ;;  %v3249_v42 = vld [vmem:[#allocation13 + $0x200] sm:$0xff]  ;;  %v3250_v55 = vld [vmem:[#allocation13 + $0x208] sm:$0xff]  ;;  %v3251_v29 = vld [vmem:[#allocation13 + $0x210] sm:$0xff] }
 0xab9   : > { %4394 = vmatpush3.bf16.msra.mxu0 %v4393_v3  ;;  %v4411_v44 = vpack.c.bf16 %v2883_v58, %v2882_v61  ;;  %v4414_v27 = vpack.c.bf16 %v2885_v17, %v2884_v13  ;;  %v4417_v43 = vpack.c.bf16 %v2887_v16, %v2886_v24  ;;  %v4420_v6 = vpack.c.bf16 %v3250_v55, %v3249_v42  ;;  %v3259_v37 = vld [vmem:[#allocation13 + $0x250] sm:$0xff]  ;;  %v3260_v34 = vld [vmem:[#allocation13 + $0x258] sm:$0xff]  ;;  %v3343_v49 = vld [vmem:[#allocation15 + $0x208] sm:$0xff] }
 0xaba   : > { %v2692_v50 = vmax.f32 %v2688_v36, 0.0  ;;  %v2693_v56 = vmax.f32 %v2689_v19, 0.0  ;;  %4419 = vmatprep.subr.bf16.mxu0 %v4984_v5  ;;  %v3252_v36 = vld [vmem:[#allocation13 + $0x218] sm:$0xff]  ;;  %v4432_v3 = vpack.c.bf16 %v3258_v14, %v3257_v38  ;;  %v4435_v10 = vpack.c.bf16 %v3260_v34, %v3259_v37  ;;  %v3342_v4 = vld [vmem:[#allocation15 + $0x200] sm:$0xff]  ;;  %v3347_v61 = vld [vmem:[#allocation15 + $0x228] sm:$0xff] }
 0xabb   : > { %v4423_v19 = vpack.c.bf16 %v3252_v36, %v3251_v29  ;;  %v3264_v46 = vld [vmem:[#allocation13 + $0x278] sm:$0xff]  ;;  %v3348_v17 = vld [vmem:[#allocation15 + $0x230] sm:$0xff]  ;;  %v3350_v16 = vld [vmem:[#allocation15 + $0x240] sm:$0xff] }
 0xabc   : > { %v4361_v62 = vpack.c.bf16 %v2692_v50, %v2690_v60  ;;  %v4359_v1 = vpack.c.bf16 %v2693_v56, %v2691_v40  ;;  %v3253_v60 = vld [vmem:[#allocation13 + $0x220] sm:$0xff]  ;;  %v3254_v40 = vld [vmem:[#allocation13 + $0x228] sm:$0xff]  ;;  %v3255_v56 = vld [vmem:[#allocation13 + $0x230] sm:$0xff] }
 0xabd   : > { %v4426_v50 = vpack.c.bf16 %v3254_v40, %v3253_v60  ;;  %v3349_v58 = vld [vmem:[#allocation15 + $0x238] sm:$0xff]  ;;  %v3358_v29 = vld [vmem:[#allocation15 + $0x280] sm:$0xff]  ;;  %v3360_v36 = vld [vmem:[#allocation15 + $0x290] sm:$0xff] }
 0xabe   : > { %4360 = vmatprep.subr.bf16.mxu1 %v4359_v1  ;;  %v4447_v13 = vpack.c.bf16 %v3349_v58, %v3347_v61  ;;  %v3361_v42 = vld [vmem:[#allocation15 + $0x298] sm:$0xff]  ;;  %v4461_v40 = vpack.c.bf16 %v3360_v36, %v3358_v29  ;;  %v3366_v37 = vld [vmem:[#allocation15 + $0x2c0] sm:$0xff]  ;;  %v3368_v34 = vld [vmem:[#allocation15 + $0x2d0] sm:$0xff] }
 0xabf   : > { %4362 = vmatpush1.bf16.msra.mxu1 %v4361_v62  ;;  %v3256_v62 = vld [vmem:[#allocation13 + $0x238] sm:$0xff] }
 0xac0   : > { %4395 = vmatprep.subr.bf16.mxu1 %v4984_v5  ;;  %v4429_v1 = vpack.c.bf16 %v3256_v62, %v3255_v56  ;;  %v3365_v60 = vld [vmem:[#allocation15 + $0x2b8] sm:$0xff]  ;;  %v3362_v56 = vld [vmem:[#allocation15 + $0x2a0] sm:$0xff]  ;;  %v3364_v62 = vld [vmem:[#allocation15 + $0x2b0] sm:$0xff] }
 0xac1   : > { %v3369_v38 = vld [vmem:[#allocation15 + $0x2d8] sm:$0xff]  ;;  %v4465_v14 = vpack.c.bf16 %v3364_v62, %v3362_v56 }
 0xac2   : > { %3770 = vmatmul.mubr.msk.f32.vlgmr.msra.gmra.mrb[10].mxu1 %vm531_vm0, %v2694_v59 }
 0xac3   : > { %4397 = vmatpush3.bf16.msra.mxu1 %v4396_v63  ;;  %4125 = vmatprep.mubr.msk.f32.mxu1 %vm4985_vm5, %v4657_v11  ;;  %v3261_v63 = vld [vmem:[#allocation13 + $0x260] sm:$0xff] }
 0xac4   : > { %4398 = vmatprep.subr.bf16.mxu1 %v4984_v5 }
 0xac7   : > { %4400 = vmatpush3.bf16.msra.mxu1 %v4399_v25  ;;  %v4438_v25 = vpack.c.bf16 %v3262_v30, %v3261_v63  ;;  %v2964_v63 = vld [vmem:[#allocation10 + $0x55] sm:$0xff] }
 0xac8   : > { %4401 = vmatprep.subr.bf16.mxu1 %v4984_v5  ;;  %v2980_v30 = vrot.slane %v2964_v63, %v5414_v20 }
 0xacb   : > { %4403 = vmatpush3.bf16.msra.mxu1 %v4402_v52  ;;  %v4441_v52 = vpack.c.bf16 %v3264_v46, %v3263_v2  ;;  %v3772_v46 = vld [vmem:[#allocation7 + $0xa] ss:$0 sm:$0xff] }
 0xacc   : > { %4404 = vmatprep.subr.bf16.mxu1 %v4984_v5 }
 0xacf   : > { %4406 = vmatpush3.bf16.msra.mxu1 %v4405_v33  ;;  %v3345_v33 = vld [vmem:[#allocation15 + $0x218] sm:$0xff] }
 0xad0   : > { %4407 = vmatprep.subr.bf16.mxu1 %v4984_v5  ;;  %v4443_v53 = vpack.c.bf16 %v3345_v33, %v3343_v49  ;;  %v2994_v33 = vrot.slane %v2964_v63, %v5420_v26 }
 0xad3   : > { %4409 = vmatpush3.bf16.msra.mxu1 %v4408_v15  ;;  %v3344_v15 = vld [vmem:[#allocation15 + $0x210] sm:$0xff] }
 0xad4   : > { %4410 = vmatprep.subr.bf16.mxu1 %v4984_v5 }
 0xad7   : > { %4412 = vmatpush3.bf16.msra.mxu1 %v4411_v44  ;;  %v4445_v44 = vpack.c.bf16 %v3344_v15, %v3342_v4  ;;  %v3002_v15 = vrot.slane %v2964_v63, %v5424_v32 }
 0xad8   : > { %4413 = vmatprep.subr.bf16.mxu1 %v4984_v5 }
 0xadb   : > { %4415 = vmatpush3.bf16.msra.mxu1 %v4414_v27  ;;  %v3351_v27 = vld [vmem:[#allocation15 + $0x248] sm:$0xff] }
 0xadc   : > { %4416 = vmatprep.subr.bf16.mxu1 %v4984_v5 }
 0xadf   : > { %4418 = vmatpush3.bf16.msra.mxu1 %v4417_v43  ;;  %v3352_v43 = vld [vmem:[#allocation15 + $0x250] sm:$0xff] }
 0xae0   : > { %4444 = vmatprep.subr.bf16.mxu1 %v4443_v53 }
 0xb95   : > { %v2764_v12 = vpop.f32.mrb[10].mxu1 }
 0xb96   : > { %v2766_v7 = vpop.f32.mrb[11].mxu1 }
 0xb97   : > { %2865 = vmatprep.mubr.f32.mxu0 %v2766_v7 }
 0xb98   : > { %2866 = vmatmul.mubr.f32.vlgmr.msra.gmra.mrb[10].mxu0 %v2764_v12  ;;  %v3353_v12 = vld [vmem:[#allocation15 + $0x258] sm:$0xff] }
 0xb99   : > { %4160 = vmatprep.mubr.msk.f32.mxu0 %vm4985_vm5, %v4657_v11  ;;  %4421 = vmatpush3.bf16.msra.mxu0 %v4420_v6  ;;  %v4451_v24 = vpack.c.bf16 %v3353_v12, %v3351_v27  ;;  %v3019_v12 = vrot.slane %v2964_v63, %v5429_v45 }
 0xb9a   : > { %4422 = vmatprep.subr.bf16.mxu0 %v4984_v5 }
 0xb9d   : > { %4424 = vmatpush3.bf16.msra.mxu0 %v4423_v19  ;;  %v3363_v19 = vld [vmem:[#allocation15 + $0x2a8] sm:$0xff] }
 0xb9e   : > { %4425 = vmatprep.subr.bf16.mxu0 %v4984_v5 }
 0xba1   : > { %4427 = vmatpush3.bf16.msra.mxu0 %v4426_v50  ;;  %v4463_v50 = vpack.c.bf16 %v3365_v60, %v3363_v19 }
 0xba2   : > { %4428 = vmatprep.subr.bf16.mxu0 %v4984_v5 }
 0xba5   : > { %4430 = vmatpush3.bf16.msra.mxu0 %v4429_v1  ;;  %v3367_v1 = vld [vmem:[#allocation15 + $0x2c8] sm:$0xff] }
 0xba6   : > { %4431 = vmatprep.subr.bf16.mxu0 %v4984_v5 }
 0xba9   : > { %4433 = vmatpush3.bf16.msra.mxu0 %v4432_v3  ;;  %v4467_v3 = vpack.c.bf16 %v3369_v38, %v3367_v1 }
 0xbaa   : > { %4434 = vmatprep.subr.bf16.mxu0 %v4984_v5 }
 0xbad   : > { %4436 = vmatpush3.bf16.msra.mxu0 %v4435_v10  ;;  %v4469_v10 = vpack.c.bf16 %v3368_v34, %v3366_v37 }
 0xbae   : > { %4437 = vmatprep.subr.bf16.mxu0 %v4984_v5 }
 0xbb1   : > { %4439 = vmatpush3.bf16.msra.mxu0 %v4438_v25  ;;  %v2988_v25 = vrot.slane %v2964_v63, %v5416_v21 }
 0xbb2   : > { %4440 = vmatprep.subr.bf16.mxu0 %v4984_v5  ;;  %v3346_v5 = vld [vmem:[#allocation15 + $0x220] sm:$0xff] }
 0xbb3   : > { %v4449_v7 = vpack.c.bf16 %v3348_v17, %v3346_v5 }
 0xbb5   : > { %4442 = vmatpush3.bf16.msra.mxu0 %v4441_v52 }
 0xc6b   : > { %v3909_v23 = vpop.f32.mrb[10].mxu0 }
 0xc6c   : > { %v3910_v51 = vpop.f32.mrb[11].mxu0 }
 0xc6d   : > { %v6277_v47 = vadd.f32 %v3910_v51, %v3909_v23  ;;  %v3357_v23 = vld [vmem:[#allocation15 + $0x278] sm:$0xff]  ;;  %v4453_v51 = vpack.c.bf16 %v3352_v43, %v3350_v16 }
 0xc6f   : > { %4126 = vmatmul.mubr.f32.vlgmr.msra.gmra.mrb[12].mxu1 %v6277_v47 }
 0xc70   : > { %3451 = vmatprep.mubr.f32.mxu1 %v4657_v11  ;;  %4446 = vmatpush1.bf16.msra.mxu1 %v4445_v44  ;;  %v3355_v11 = vld [vmem:[#allocation15 + $0x268] sm:$0xff] }
 0xc71   : > { %4448 = vmatprep.subr.bf16.mxu1 %v4447_v13  ;;  %v3010_v13 = vrot.slane %v2964_v63, %v5422_v31 }
 0xc74   : > { %4450 = vmatpush1.bf16.msra.mxu1 %v4449_v7 }
 0xc75   : > { %4452 = vmatprep.subr.bf16.mxu1 %v4451_v24 }
 0xc78   : > { %4454 = vmatpush1.bf16.msra.mxu1 %v4453_v51 }
 0xd42   : > { %v2959_v9 = vpop.f32.mrb[12].mxu1 }
 0xd43   : > { %v2960_v35 = vadd.f32 %v3771_v22, %v2959_v9  ;;  %v4127_v18 = vpop.f32.mrb[13].mxu1  ;;  %v4455_v22 = vpack.c.bf16 %v3357_v23, %v3355_v11  ;;  %v3354_v9 = vld [vmem:[#allocation15 + $0x260] sm:$0xff]  ;;  %v3027_v11 = vrot.slane %v2964_v63, %v5431_v48 }
 0xd44   : > { %v3359_v18 = vld [vmem:[#allocation15 + $0x288] sm:$0xff] }
 0xd45   : > { %v6280_v41 = vmax.f32 %v2960_v35, 0.0  ;;  %v3356_v35 = vld [vmem:[#allocation15 + $0x270] sm:$0xff]  ;;  %4456 = vmatprep.subr.bf16.mxu1 %v4455_v22  ;;  %v4459_v6 = vpack.c.bf16 %v3361_v42, %v3359_v18  ;;  %v3033_v22 = vrot.slane %v2964_v63, %v5434_v54 }
 0xd46   : > { %v4457_v55 = vpack.c.bf16 %v3356_v35, %v3354_v9  ;;  %v2965_v9 = vld [vmem:[#allocation10 + $0x5d] sm:$0xff] }
 0xd47   : > { %2968 = vst [vmem:[#allocation4 + $0x8] sm:$0xff] %v6280_v41  ;;  %v3049_v29 = vrot.slane %v2965_v9, %v5416_v21  ;;  %v3058_v56 = vrot.slane %v2965_v9, %v5420_v26  ;;  %v3066_v38 = vrot.slane %v2965_v9, %v5424_v32 }
 0xd48   : > { %4458 = vmatpush1.bf16.msra.mxu1 %v4457_v55 }
 0xd49   : > { %4460 = vmatprep.subr.bf16.mxu1 %v4459_v6 }
 0xd4c   : > { %4462 = vmatpush1.bf16.msra.mxu1 %v4461_v40 }
 0xd4d   : > { %4464 = vmatprep.subr.bf16.mxu1 %v4463_v50 }
 0xd4e   : > { %v6283_v39 = vld [vmem:[#allocation4 + $0xa] sm:$0xff] }
 0xd4f   : > { %v6285_v8 = vld [vmem:[#allocation4 + $0x6] sm:$0xff] }
 0xd50   : > { %v6287_v57 = vld [vmem:[#allocation4 + $0x7] sm:$0xff]  ;;  %2983 = vrot.lane.b32.xlu1 %v6285_v8, %s4981_s21  ;;  %2975 = vrot.lane.b32.xlu0 %v6285_v8, %s4986_s13  ;;  %v2995_v5 = vmul.f32 %v2994_v33, %v6285_v8 }
 0xd51   : > { %v6293_v0 = vld [vmem:[#allocation4 + $0x9] sm:$0xff]  ;;  %4466 = vmatpush1.bf16.msra.mxu1 %v4465_v14  ;;  %v3034_v36 = vmul.f32 %v3033_v22, %v6287_v57 }
 0xd52   : > { %3171 = vst [vmem:[#allocation4 + $0x8] sm:$0xff] %v6280_v41  ;;  %4468 = vmatprep.subr.bf16.mxu1 %v4467_v3 }
 0xd54   : > { %3005 = vrot.lane.b32.xlu1 %v6285_v8, %s4987_s1  ;;  %2997 = vrot.lane.b32.xlu0 %v6285_v8, %s4982_s28  ;;  %v3041_v8 = vrot.slane %v2965_v9, %v5414_v20 }
 0xd55   : > { %4470 = vmatpush1.bf16.msra.mxu1 %v4469_v10  ;;  %v3072_v10 = vrot.slane %v2965_v9, %v5422_v31 }
 0xd57   : > { %v3073_v33 = vmul.f32 %v3072_v10, %v6280_v41 }
 0xd58   : > { %3022 = vrot.lane.b32.xlu1 %v6287_v57, %s4981_s21  ;;  %3014 = vrot.lane.b32.xlu0 %v6287_v57, %s4986_s13 }
 0xd59   : > { %v6323_v59 = vld [vmem:[#allocation4 + $0x7] sm:$0xff] }
 0xd5a   : > { %v6345_v28 = vld [vmem:[#allocation4 + $0x9] sm:$0xff] }
 0xd5c   : > { %3044 = vrot.lane.b32.xlu1 %v6287_v57, %s4987_s1  ;;  %3036 = vrot.lane.b32.xlu0 %v6287_v57, %s4982_s28  ;;  %v3080_v57 = vrot.slane %v2965_v9, %v5429_v45 }
 0xd60   : > { %3061 = vrot.lane.b32.xlu1 %v6280_v41, %s4981_s21  ;;  %3053 = vrot.lane.b32.xlu0 %v6280_v41, %s4986_s13 }
 0xd64   : > { %3083 = vrot.lane.b32.xlu1 %v6280_v41, %s4987_s1  ;;  %3075 = vrot.lane.b32.xlu0 %v6280_v41, %s4982_s28 }
 0xd68   : > { %3100 = vrot.lane.b32.xlu1 %v6293_v0, %s4981_s21  ;;  %3092 = vrot.lane.b32.xlu0 %v6293_v0, %s4986_s13 }
 0xd6c   : > { %3114 = vrot.lane.b32.xlu1 %v6293_v0, %s4982_s28  ;;  %3178 = vrot.lane.b32.xlu0 %v6323_v59, %s4981_s21 }
 0xd70   : > { %3122 = vrot.lane.b32.xlu1 %v6293_v0, %s4987_s1  ;;  %3192 = vrot.lane.b32.xlu0 %v6323_v59, %s4982_s28 }
 0xd74   : > { %3131 = vrot.lane.b32.xlu1 %v6283_v39, %s4986_s13  ;;  %3201 = vrot.lane.b32.xlu0 %v6280_v41, %s4981_s21 }
 0xd78   : > { %3215 = vrot.lane.b32.xlu1 %v6280_v41, %s4982_s28  ;;  %3139 = vrot.lane.b32.xlu0 %v6283_v39, %s4981_s21 }
 0xd7c   : > { %3153 = vrot.lane.b32.xlu1 %v6283_v39, %s4982_s28  ;;  %3224 = vrot.lane.b32.xlu0 %v6345_v28, %s4981_s21 }
 0xd80   : > { %3238 = vrot.lane.b32.xlu1 %v6345_v28, %s4982_s28  ;;  %3161 = vrot.lane.b32.xlu0 %v6283_v39, %s4987_s1 }
 0xdc2   : > { %v2984_v2 = vpop.permute.xlu1 %2983  ;;  %v2976_v52 = vpop.permute.xlu0 %2975 }
 0xdc3   : > { %v2981_v49 = vmul.f32 %v2980_v30, %v2976_v52  ;;  %v2989_v4 = vmul.f32 %v2988_v25, %v2984_v2  ;;  %v6371_v25 = vld [vmem:[#allocation10 + $0x6e] sm:$0xff] }
 0xdc5   : > { %v2982_v53 = vadd.f32 %v3772_v46, %v2981_v49  ;;  %v3088_v49 = vrot.slane %v2965_v9, %v5431_v48 }
 0xdc6   : > { %v3006_v61 = vpop.permute.xlu1 %3005  ;;  %v2998_v58 = vpop.permute.xlu0 %2997 }
 0xdc7   : > { %v2990_v44 = vadd.f32 %v2989_v4, %v2982_v53  ;;  %v3003_v27 = vmul.f32 %v3002_v15, %v2998_v58  ;;  %v3011_v16 = vmul.f32 %v3010_v13, %v3006_v61  ;;  %v3183_v4 = vrot.slane %v6371_v25, %v5414_v20  ;;  %v6379_v58 = vld [vmem:[#allocation10 + $0x65] sm:$0xff] }
 0xdc8   : > { %v3189_v53 = vrot.slane %v6371_v25, %v5416_v21  ;;  %v3105_v13 = vrot.slane %v6379_v58, %v5414_v20 }
 0xdc9   : > { %v2996_v17 = vadd.f32 %v2995_v5, %v2990_v44  ;;  %v3097_v44 = vrot.slane %v2965_v9, %v5434_v54  ;;  %v3119_v9 = vrot.slane %v6379_v58, %v5420_v26 }
 0xdca   : > { %v3023_v7 = vpop.permute.xlu1 %3022  ;;  %v3015_v24 = vpop.permute.xlu0 %3014 }
 0xdcb   : > { %v3004_v43 = vadd.f32 %v3003_v27, %v2996_v17  ;;  %v3020_v51 = vmul.f32 %v3019_v12, %v3015_v24  ;;  %v3028_v42 = vmul.f32 %v3027_v11, %v3023_v7  ;;  %v3774_v17 = vld [vmem:[#allocation7 + $0xb] ss:$0 sm:$0xff]  ;;  %v3190_v11 = vmul.f32 %v3189_v53, %v6323_v59 }
 0xdcd   : > { %v3012_v23 = vadd.f32 %v3011_v16, %v3004_v43  ;;  %v3197_v16 = vrot.slane %v6371_v25, %v5420_v26  ;;  %v3111_v43 = vrot.slane %v6379_v58, %v5416_v21  ;;  %v3136_v26 = vrot.slane %v6379_v58, %v5422_v31 }
 0xdce   : > { %v3045_v35 = vpop.permute.xlu1 %3044  ;;  %v3037_v18 = vpop.permute.xlu0 %3036 }
 0xdcf   : > { %v3021_v55 = vadd.f32 %v3020_v51, %v3012_v23  ;;  %v3042_v50 = vmul.f32 %v3041_v8, %v3037_v18  ;;  %v3050_v62 = vmul.f32 %v3049_v29, %v3045_v35  ;;  %v3112_v59 = vmul.f32 %v3111_v43, %v6293_v0 }
 0xdd1   : > { %v3029_v6 = vadd.f32 %v3028_v42, %v3021_v55  ;;  %v3206_v42 = vrot.slane %v6371_v25, %v5424_v32 }
 0xdd2   : > { %v3062_v19 = vpop.permute.xlu1 %3061  ;;  %v3054_v60 = vpop.permute.xlu0 %3053 }
 0xdd3   : > { %v3035_v40 = vadd.f32 %v3034_v36, %v3029_v6  ;;  %v3059_v34 = vmul.f32 %v3058_v56, %v3054_v60  ;;  %v3067_v63 = vmul.f32 %v3066_v38, %v3062_v19  ;;  %v3212_v36 = vrot.slane %v6371_v25, %v5422_v31 }
 0xdd4   : > { %v3127_v60 = vrot.slane %v6379_v58, %v5424_v32  ;;  %v3220_v56 = vrot.slane %v6371_v25, %v5429_v45  ;;  %v3144_v32 = vrot.slane %v6379_v58, %v5429_v45  ;;  %v3150_v31 = vrot.slane %v6379_v58, %v5431_v48 }
 0xdd5   : > { %v3043_v1 = vadd.f32 %v3042_v50, %v3035_v40  ;;  %v3158_v45 = vrot.slane %v6379_v58, %v5434_v54 }
 0xdd6   : > { %v3084_v14 = vpop.permute.xlu1 %3083  ;;  %v3076_v3 = vpop.permute.xlu0 %3075 }
 0xdd7   : > { %v3051_v37 = vadd.f32 %v3050_v62, %v3043_v1  ;;  %v3081_v61 = vmul.f32 %v3080_v57, %v3076_v3  ;;  %v3089_v12 = vmul.f32 %v3088_v49, %v3084_v14  ;;  %v3213_v3 = vmul.f32 %v3212_v36, %v6280_v41 }
 0xdd8   : > { %v3235_v41 = vrot.slane %v6371_v25, %v5434_v54 }
 0xdd9   : > { %v3060_v30 = vadd.f32 %v3059_v34, %v3051_v37 }
 0xdda   : > { %v3101_v2 = vpop.permute.xlu1 %3100  ;;  %v3093_v46 = vpop.permute.xlu0 %3092 }
 0xddb   : > { %v3068_v52 = vadd.f32 %v3067_v63, %v3060_v30  ;;  %v3098_v51 = vmul.f32 %v3097_v44, %v3093_v46  ;;  %v3106_v55 = vmul.f32 %v3105_v13, %v3101_v2  ;;  %v3229_v30 = vrot.slane %v6371_v25, %v5431_v48  ;;  %v3775_v48 = vld [vmem:[#allocation10 + $0x76] ss:$0 sm:$0xff] }
 0xddc   : > { %v3151_v44 = vmul.f32 %v3150_v31, %v6283_v39  ;;  %v3371_v39 = vld [vmem:[#allocation15 + $0x2e8] sm:$0xff]  ;;  %v3500_v31 = vld [vmem:[#allocation16 + $0x1b8] sm:$0xff] }
 0xddd   : > { %v3074_v15 = vadd.f32 %v3073_v33, %v3068_v52 }
 0xdde   : > { %v3115_v5 = vpop.permute.xlu1 %3114  ;;  %v3179_v27 = vpop.permute.xlu0 %3178 }
 0xddf   : > { %v3082_v7 = vadd.f32 %v3081_v61, %v3074_v15  ;;  %v3184_v24 = vmul.f32 %v3183_v4, %v3179_v27  ;;  %v3120_v1 = vmul.f32 %v3119_v9, %v3115_v5  ;;  %v3773_v5 = vld [vmem:[#allocation10 + $0x6d] ss:$0 sm:$0xff]  ;;  %v3373_v9 = vld [vmem:[#allocation15 + $0x2f8] sm:$0xff] }
 0xde1   : > { %v3090_v23 = vadd.f32 %v3089_v12, %v3082_v7  ;;  %v3185_v22 = vadd.f32 %v3774_v17, %v3184_v24  ;;  %v3236_v17 = vmul.f32 %v3235_v41, %v6345_v28  ;;  %v3502_v41 = vld [vmem:[#allocation16 + $0x1c8] sm:$0xff] }
 0xde2   : > { %v3123_v35 = vpop.permute.xlu1 %3122  ;;  %v3193_v18 = vpop.permute.xlu0 %3192 }
 0xde3   : > { %v3099_v8 = vadd.f32 %v3098_v51, %v3090_v23  ;;  %v3191_v6 = vadd.f32 %v3190_v11, %v3185_v22  ;;  %v3198_v29 = vmul.f32 %v3197_v16, %v3193_v18  ;;  %v3128_v34 = vmul.f32 %v3127_v60, %v3123_v35  ;;  %v3370_v18 = vld [vmem:[#allocation15 + $0x2e0] sm:$0xff] }
 0xde4   : > { %v4471_v35 = vpack.c.bf16 %v3373_v9, %v3371_v39 }
 0xde5   : > { %v3107_v19 = vadd.f32 %v3106_v55, %v3099_v8  ;;  %v3199_v38 = vadd.f32 %v3198_v29, %v3191_v6  ;;  %v3776_v55 = vld [vmem:[#allocation7 + $0xc] ss:$0 sm:$0xff] }
 0xde6   : > { %v3132_v40 = vpop.permute.xlu1 %3131  ;;  %v3202_v50 = vpop.permute.xlu0 %3201  ;;  %4472 = vmatprep.subr.bf16.mxu1 %v4471_v35 }
 0xde7   : > { %v3113_v62 = vadd.f32 %v3112_v59, %v3107_v19  ;;  %v3207_v14 = vmul.f32 %v3206_v42, %v3202_v50  ;;  %v3137_v2 = vmul.f32 %v3136_v26, %v3132_v40  ;;  %v3372_v42 = vld [vmem:[#allocation15 + $0x2f0] sm:$0xff]  ;;  %v3493_v19 = vld [vmem:[#allocation16 + $0x180] sm:$0xff]  ;;  %v3494_v59 = vld [vmem:[#allocation16 + $0x188] sm:$0xff] }
 0xde8   : > { %v4473_v28 = vpack.c.bf16 %v3372_v42, %v3370_v18  ;;  %v4475_v60 = vpack.c.bf16 %v3494_v59, %v3493_v19  ;;  %v3477_v26 = vld [vmem:[#allocation16 + $0x100] sm:$0xff]  ;;  %v3478_v40 = vld [vmem:[#allocation16 + $0x108] sm:$0xff] }
 0xde9   : > { %v3121_v37 = vadd.f32 %v3120_v1, %v3113_v62  ;;  %v3208_v0 = vadd.f32 %v3207_v14, %v3199_v38  ;;  %v4477_v50 = vpack.c.bf16 %v3478_v40, %v3477_v26  ;;  %v3496_v62 = vld [vmem:[#allocation16 + $0x198] sm:$0xff]  ;;  %v3479_v38 = vld [vmem:[#allocation16 + $0x110] sm:$0xff] }
 0xdea   : > { %v3216_v10 = vpop.permute.xlu1 %3215  ;;  %v3140_v63 = vpop.permute.xlu0 %3139  ;;  %4474 = vmatpush1.bf16.msra.mxu1 %v4473_v28  ;;  %4476 = vmatprep.subr.bf16.mxu0 %v4475_v60  ;;  %v3480_v14 = vld [vmem:[#allocation16 + $0x118] sm:$0xff] }
 0xdeb   : > { %v3129_v57 = vadd.f32 %v3128_v34, %v3121_v37  ;;  %v3214_v46 = vadd.f32 %v3213_v3, %v3208_v0  ;;  %v3221_v52 = vmul.f32 %v3220_v56, %v3216_v10  ;;  %v3145_v33 = vmul.f32 %v3144_v32, %v3140_v63  ;;  %v3495_v56 = vld [vmem:[#allocation16 + $0x190] sm:$0xff]  ;;  %v3498_v37 = vld [vmem:[#allocation16 + $0x1a8] sm:$0xff]  ;;  %v3481_v0 = vld [vmem:[#allocation16 + $0x120] sm:$0xff] }
 0xdec   : > { %v4479_v1 = vpack.c.bf16 %v3496_v62, %v3495_v56  ;;  %v4481_v3 = vpack.c.bf16 %v3480_v14, %v3479_v38  ;;  %v3482_v32 = vld [vmem:[#allocation16 + $0x128] sm:$0xff]  ;;  %v3499_v63 = vld [vmem:[#allocation16 + $0x1b0] sm:$0xff] }
 0xded   : > { %v3138_v49 = vadd.f32 %v3137_v2, %v3129_v57  ;;  %v3222_v15 = vadd.f32 %v3221_v52, %v3214_v46  ;;  %v4485_v10 = vpack.c.bf16 %v3482_v32, %v3481_v0  ;;  %v3483_v57 = vld [vmem:[#allocation16 + $0x130] sm:$0xff]  ;;  %v3484_v2 = vld [vmem:[#allocation16 + $0x138] sm:$0xff]  ;;  %v3501_v46 = vld [vmem:[#allocation16 + $0x1c0] sm:$0xff] }
 0xdee   : > { %v3154_v4 = vpop.permute.xlu1 %3153  ;;  %v3225_v53 = vpop.permute.xlu0 %3224  ;;  %v4489_v52 = vpack.c.bf16 %v3484_v2, %v3483_v57 }
 0xdef   : > { %v3146_v61 = vadd.f32 %v3145_v33, %v3138_v49  ;;  %v3230_v13 = vmul.f32 %v3229_v30, %v3225_v53  ;;  %v3159_v12 = vmul.f32 %v3158_v45, %v3154_v4  ;;  %v4487_v30 = vpack.c.bf16 %v3500_v31, %v3499_v63  ;;  %v3485_v49 = vld [vmem:[#allocation16 + $0x140] sm:$0xff]  ;;  %v3486_v33 = vld [vmem:[#allocation16 + $0x148] sm:$0xff]  ;;  %v3503_v4 = vld [vmem:[#allocation16 + $0x1d0] sm:$0xff] }
 0xdf0   : > { %v4491_v45 = vpack.c.bf16 %v3502_v41, %v3501_v46  ;;  %v3504_v53 = vld [vmem:[#allocation16 + $0x1d8] sm:$0xff] }
 0xdf1   : > { %v3152_v27 = vadd.f32 %v3151_v44, %v3146_v61  ;;  %v3231_v7 = vadd.f32 %v3230_v13, %v3222_v15  ;;  %v4493_v15 = vpack.c.bf16 %v3486_v33, %v3485_v49  ;;  %v4495_v61 = vpack.c.bf16 %v3504_v53, %v3503_v4  ;;  %v3487_v44 = vld [vmem:[#allocation16 + $0x150] sm:$0xff]  ;;  %v3488_v13 = vld [vmem:[#allocation16 + $0x158] sm:$0xff] }
 0xdf2   : > { %v3239_v25 = vpop.permute.xlu1 %3238  ;;  %v3162_v24 = vpop.permute.xlu0 %3161 }
 0xdf3   : > { %v3160_v16 = vadd.f32 %v3159_v12, %v3152_v27  ;;  %v3237_v43 = vadd.f32 %v3236_v17, %v3231_v7  ;;  %v3244_v11 = vmul.f32 %v3775_v48, %v3239_v25  ;;  %v3167_v54 = vmul.f32 %v3773_v5, %v3162_v24  ;;  %v3505_v48 = vld [vmem:[#allocation16 + $0x1e0] sm:$0xff]  ;;  %v3506_v5 = vld [vmem:[#allocation16 + $0x1e8] sm:$0xff]  ;;  %v3507_v25 = vld [vmem:[#allocation16 + $0x1f0] sm:$0xff] }
 0xdf4   : > { %v4497_v17 = vpack.c.bf16 %v3488_v13, %v3487_v44  ;;  %v4499_v27 = vpack.c.bf16 %v3506_v5, %v3505_v48  ;;  %v3489_v12 = vld [vmem:[#allocation16 + $0x160] sm:$0xff]  ;;  %v3490_v7 = vld [vmem:[#allocation16 + $0x168] sm:$0xff]  ;;  %v3508_v24 = vld [vmem:[#allocation16 + $0x1f8] sm:$0xff] }
 0xdf5   : > { %v3245_v58 = vadd.f32 %v3244_v11, %v3237_v43  ;;  %v3168_v23 = vadd.f32 %v3167_v54, %v3160_v16  ;;  %v4501_v16 = vpack.c.bf16 %v3490_v7, %v3489_v12  ;;  %v4503_v43 = vpack.c.bf16 %v3508_v24, %v3507_v25  ;;  %v3491_v11 = vld [vmem:[#allocation16 + $0x170] sm:$0xff]  ;;  %v3492_v54 = vld [vmem:[#allocation16 + $0x178] sm:$0xff] }
 0xdf7   : > { %v3246_v51 = vadd.f32 %v3245_v58, %v3168_v23  ;;  %v4505_v58 = vpack.c.bf16 %v3492_v54, %v3491_v11  ;;  %v3375_v23 = vld [vmem:[#allocation9 + $0x3] ss:$4 sm:$0x3] }
 0xdf9   : > { %v3247_v22 = vmax.f32 %v3246_v51, 0.0  ;;  %v3380_v51 = vrot.slane %v3375_v23, %v5414_v20 }
 0xdfb   : > { %4161 = vmatmul.mubr.f32.vlgmr.msra.gmra.mrb[12].mxu0 %v3247_v22  ;;  %v3384_v22 = vrot.slane %v3375_v23, %v5416_v21 }
 0xdfc   : > { %4478 = vmatpush3.bf16.msra.mxu0 %v4477_v50 }
 0xdfd   : > { %4480 = vmatprep.subr.bf16.mxu0 %v4479_v1 }
 0xe00   : > { %4482 = vmatpush3.bf16.msra.mxu0 %v4481_v3  ;;  %v3777_v3 = vld [vmem:[#allocation7 + $0xd] ss:$0 sm:$0xff] }
 0xece   : > { %v3336_v8 = vpop.f32.mrb[12].mxu0 }
 0xecf   : > { %v3337_v6 = vadd.f32 %v3776_v55, %v3336_v8  ;;  %v4162_v29 = vpop.f32.mrb[13].mxu0 }
 0xed1   : > { %v6416_v36 = vadd.f32 %v6277_v47, %v3337_v6  ;;  %v3497_v47 = vld [vmem:[#allocation16 + $0x1a0] sm:$0xff] }
 0xed2   : > { %v4483_v34 = vpack.c.bf16 %v3498_v37, %v3497_v47 }
 0xed3   : > { %3452 = vmatmul.mubr.f32.vlgmr.msra.gmra.mrb[14].mxu1 %v6416_v36 }
 0xed4   : > { %4484 = vmatprep.subr.bf16.mxu0 %v4483_v34 }
 0xed5   : > { %4486 = vmatpush3.bf16.msra.mxu0 %v4485_v10 }
 0xed6   : > { %4488 = vmatprep.subr.bf16.mxu0 %v4487_v30 }
 0xed9   : > { %4490 = vmatpush3.bf16.msra.mxu0 %v4489_v52 }
 0xeda   : > { %4492 = vmatprep.subr.bf16.mxu0 %v4491_v45 }
 0xedd   : > { %4494 = vmatpush3.bf16.msra.mxu0 %v4493_v15 }
 0xede   : > { %4496 = vmatprep.subr.bf16.mxu0 %v4495_v61 }
 0xee1   : > { %4498 = vmatpush3.bf16.msra.mxu0 %v4497_v17 }
 0xee2   : > { %4500 = vmatprep.subr.bf16.mxu0 %v4499_v27 }
 0xee5   : > { %4502 = vmatpush3.bf16.msra.mxu0 %v4501_v16 }
 0xee6   : > { %4504 = vmatprep.subr.bf16.mxu0 %v4503_v43 }
 0xee9   : > { %4506 = vmatpush3.bf16.msra.mxu0 %v4505_v58 }
 0xfa6   : > { %v3453_v39 = vpop.f32.mrb[14].mxu1 }
 0xfa7   : > { %v3454_v9 = vadd.f32 %v3453_v39, %v3380_v51  ;;  %v3455_v35 = vpop.f32.mrb[15].mxu1 }
 0xfa8   : > { %v3456_v18 = vadd.f32 %v3455_v35, %v3384_v22 }
 0xfa9   : > { %v3458_v42 = vmul.f32 %v3454_v9, %v3454_v9 }
 0xfaa   : > { %v3459_v28 = vmul.f32 %v3456_v18, %v3456_v18 }
 0xfab   : > { %v3460_v55 = vmul.f32 %v3458_v42, %v3454_v9 }
 0xfac   : > { %v3461_v8 = vmul.f32 %v3459_v28, %v3456_v18 }
 0xfad   : > { %v3462_v6 = vmul.f32 0.044715, %v3460_v55 }
 0xfae   : > { %v3463_v29 = vmul.f32 0.044715, %v3461_v8 }
 0xfaf   : > { %v3464_v19 = vadd.f32 %v3462_v6, %v3454_v9 }
 0xfb0   : > { %v3465_v59 = vadd.f32 %v3463_v29, %v3456_v18 }
 0xfb1   : > { %v3466_v60 = vmul.f32 0.7978846, %v3464_v19 }
 0xfb2   : > { %v3467_v26 = vmul.f32 0.7978846, %v3465_v59 }
 0xfb3   : > { %4650 = vtanh.f32 %v3466_v60 }
 0xfb4   : > { %4652 = vtanh.f32 %v3467_v26 }
 0xfbd   : > { %v4651_v20 = vpop.eup %4650 }
 0xfbe   : > { %v4653_v21 = vpop.eup %4652  ;;  %v3470_v40 = vadd.f32 1.0, %v4651_v20 }
 0xfbf   : > { %v3471_v50 = vadd.f32 1.0, %v4653_v21 }
 0xfc0   : > { %v3472_v56 = vmul.f32 0.5, %v3470_v40 }
 0xfc1   : > { %v3473_v62 = vmul.f32 0.5, %v3471_v50 }
 0xfc2   : > { %v3474_v38 = vmul.f32 %v3472_v56, %v3454_v9 }
 0xfc3   : > { %v3475_v1 = vmul.f32 %v3473_v62, %v3456_v18 }
 0xfc5   : > { %3578 = vmatprep.mubr.f32.mxu0 %v3475_v1 }
 0xfc6   : > { %3579 = vmatmul.mubr.f32.vlgmr.msra.gmra.mrb[14].mxu0 %v3474_v38 }
0x1099   : > { %v3978_v14 = vpop.f32.mrb[14].mxu0 }
0x109a   : > { %v3979_v47 = vpop.f32.mrb[15].mxu0 }
0x109b   : > { %v3980_v37 = vadd.f32 %v3979_v47, %v3978_v14 }
0x109d   : > { %v3581_v34 = vadd.f32 %v3980_v37, %v3777_v3 }
0x109f   : > { %v3584_v0 = vadd.f32 %v3581_v34, %v6416_v36 }
0x10a1   : > { %3585 = vst [vmem:[%s518_s15] sm:$0xff] %v3584_v0 }
0x10a2 PF: > { %p25_p10 = scmp.ge.s32.totalorder %s5280_s27, 4   ;;  %s6546_s17 = smov %s4954_s18 }
0x10a3   : > { %s6547_s18 = smov %s4958_s19  ;;  %s6548_s19 = smov %s5292_s9 }
0x10a4   : > { %s6549_s20 = smov %s5280_s27  ;;  %27 = sbr.rel (!%p25_p10) target bundleno = 12 (0xc), region = 146 }
0x10ab   :  { %3605 = vsyncpa [#allocation6], 1 }
0x10ac   :  { %3607 = vsyncpa [#allocation6 + $0x1], 1 }
0x10ad   :  { %3608 = vsyncpa [#allocation8], 1 }
0x10ae   :  { %3609 = vsyncpa [#allocation11], 1 }
0x10af   :  { %3610 = vsyncpa [#allocation14], 1 }
0x10b0   :  { %3611 = vsyncpa [#allocation17], 1 }

</bundles_post_ra>
